<compile_context>
chip_gen: v6e
topology: v6e:2x2x1
jax: 0.10.0
libtpu: 0.0.40
codegen_flags: <defaults>
</compile_context>

<pallas_src>
import math

import jax
import jax.numpy as jnp
from jax.experimental import pallas as pl
from jax.experimental.pallas import tpu as pltpu

HIDDEN = 1024
IN_FEATURES = 28 * 28
OUT_FEATURES = 10


def _fused_mlp_kernel(x_ref, w0_ref, wh_ref, wl_ref, bh_ref, bl_ref, o_ref, act_ref):
    """One grid step == one linear layer; activation persists in act_ref (VMEM)."""
    l = pl.program_id(0)
    n_layers = pl.num_programs(0)

    # Layer 0: act = x @ W0 + b0
    @pl.when(l == 0)
    def _():
        acc = jnp.dot(x_ref[...].astype(jnp.bfloat16), w0_ref[...],
                      preferred_element_type=jnp.float32)
        act_ref[...] = acc + bh_ref[0]

    # Hidden layers 1 .. n-2: act = act @ W_l + b_l (weight streamed per step)
    @pl.when(jnp.logical_and(l > 0, l < n_layers - 1))
    def _():
        acc = jnp.dot(act_ref[...].astype(jnp.bfloat16), wh_ref[0],
                      preferred_element_type=jnp.float32)
        act_ref[...] = acc + bh_ref[0]

    # Last layer: out = act @ W_last + b_last (only HBM write of the kernel)
    @pl.when(l == n_layers - 1)
    def _():
        acc = jnp.dot(act_ref[...].astype(jnp.bfloat16), wl_ref[...],
                      preferred_element_type=jnp.float32)
        o_ref[...] = (acc + bl_ref[...]).astype(o_ref.dtype)


def mnist_mlp_forward(params, x):
    """Forward matching MnistMLP: x.view(-1, 784) then `layers` sequential Linears."""
    n_layers = len(params)
    assert n_layers >= 3
    batch = x.shape[0]
    h = x.reshape(-1, IN_FEATURES).astype(jnp.float32)

    # Pad the (tiny) batch up to the f32 sublane tile (8) -> unmasked stores.
    m_pad = max(8, pl.cdiv(batch, 8) * 8)
    h = jnp.pad(h, ((0, m_pad - batch), (0, 0)))

    w0, b0 = params[0]
    wl, bl = params[-1]

    # Stack the identical-shape hidden weights (no zero padding of first/last
    # layers into the stack); cast all weights to bf16 to halve HBM traffic.
    wh = jnp.stack([w for w, _ in params[1:-1]], axis=0).astype(jnp.bfloat16)
    # Biases of layers 0 .. n-2 (all width HIDDEN), kept in f32 for the epilogue.
    bh = jnp.stack([b0] + [b for _, b in params[1:-1]], axis=0).reshape(
        n_layers - 1, 1, HIDDEN)

    w0_bf = w0.astype(jnp.bfloat16)
    wl_bf = wl.astype(jnp.bfloat16)
    bl2d = bl.reshape(1, OUT_FEATURES)

    n_hidden = n_layers - 2  # number of stacked 1024x1024 weights

    out = pl.pallas_call(
        _fused_mlp_kernel,
        out_shape=jax.ShapeDtypeStruct((m_pad, OUT_FEATURES), jnp.float32),
        grid_spec=pltpu.PrefetchScalarGridSpec(
            num_scalar_prefetch=0,
            grid=(n_layers,),
            in_specs=[
                # x: constant block index -> DMA'd once, resident.
                pl.BlockSpec((m_pad, IN_FEATURES), lambda l: (0, 0)),
                # W0 (784, 1024): DMA'd once, resident.
                pl.BlockSpec((IN_FEATURES, HIDDEN), lambda l: (0, 0)),
                # Hidden weight used at layer l is wh[l-1]; clamp so steps 0 and
                # n-1 reuse an already-resident block (no redundant DMA).
                pl.BlockSpec(
                    (1, HIDDEN, HIDDEN),
                    lambda l: (jnp.minimum(jnp.maximum(l - 1, 0), n_hidden - 1), 0, 0)),
                # Last weight (1024, 10): DMA'd once, resident.
                pl.BlockSpec((HIDDEN, OUT_FEATURES), lambda l: (0, 0)),
                # Bias of layer l (layers 0 .. n-2), streamed with the weights.
                pl.BlockSpec((1, 1, HIDDEN),
                             lambda l: (jnp.minimum(l, n_layers - 2), 0, 0)),
                # Last-layer bias, resident.
                pl.BlockSpec((1, OUT_FEATURES), lambda l: (0, 0)),
            ],
            out_specs=pl.BlockSpec((m_pad, OUT_FEATURES), lambda l: (0, 0)),
            scratch_shapes=[pltpu.VMEM((m_pad, HIDDEN), jnp.float32)],
        ),
        compiler_params=pltpu.CompilerParams(
            # Layers are strictly sequential (activation carried in scratch).
            dimension_semantics=("arbitrary",),
        ),
    )(h, w0_bf, wh, wl_bf, bh, bl2d)

    return out[:batch]


def init_mnist_mlp_params(key, layers=8):
    """Deterministic init matching nn.Linear default (uniform +-1/sqrt(fan_in)).

    Returns a list of (W, b) with W of shape (in_features, out_features).
    """
    dims = [IN_FEATURES] + [HIDDEN] * (layers - 1) + [OUT_FEATURES]
    params = []
    for i in range(layers):
        fan_in, fan_out = dims[i], dims[i + 1]
        key, kw, kb = jax.random.split(key, 3)
        bound = 1.0 / math.sqrt(fan_in)
        w = jax.random.uniform(kw, (fan_in, fan_out), jnp.float32, -bound, bound)
        b = jax.random.uniform(kb, (fan_out,), jnp.float32, -bound, bound)
        params.append((w, b))
    return params


if __name__ == "__main__":
    key = jax.random.PRNGKey(0)
    kp, kx = jax.random.split(key)

    params = init_mnist_mlp_params(kp, layers=8)

    batch = 2
    x = jax.random.normal(kx, (batch, 1, 28, 28), dtype=jnp.float32)

    fwd = jax.jit(mnist_mlp_forward)
    out = fwd(params, x)
    out = jax.block_until_ready(out)

    # Reference mirroring the kernel's arithmetic (bf16 operands, f32 accumulate).
    ref = x.reshape(-1, IN_FEATURES)
    for w, b in params:
        ref = jnp.dot(ref.astype(jnp.bfloat16), w.astype(jnp.bfloat16),
                      preferred_element_type=jnp.float32) + b

    assert out.shape == (batch, OUT_FEATURES), out.shape
    assert jnp.allclose(out, ref, atol=2e-2, rtol=2e-2), "mismatch vs reference"

    print("KERNEL_OK")
</pallas_src>

<mosaic_0001>
module attributes {stable_mosaic.version = 11 : i64} {
  func.func @_fused_mlp_kernel(%arg0: i32, %arg1: memref<8x784xf32, #tpu.memory_space<vmem>>, %arg2: memref<784x1024xbf16, #tpu.memory_space<vmem>>, %arg3: memref<1x1024x1024xbf16, #tpu.memory_space<vmem>>, %arg4: memref<1024x10xbf16, #tpu.memory_space<vmem>>, %arg5: memref<1x1x1024xf32, #tpu.memory_space<vmem>>, %arg6: memref<1x10xf32, #tpu.memory_space<vmem>>, %arg7: memref<8x10xf32, #tpu.memory_space<vmem>>, %arg8: memref<8x1024xf32, #tpu.memory_space<vmem>>) attributes {dimension_semantics = [#tpu.dimension_semantics<arbitrary>], iteration_bounds = array<i64: 8>, scalar_prefetch = 0 : i64, scratch_operands = 1 : i64, tpu.core_type = #tpu.core_type<tc>, window_params = [{pipeline_mode = #tpu.pipeline_mode<synchronous>, transform_indices = @transform_0, window_bounds = array<i64: 8, 784>}, {pipeline_mode = #tpu.pipeline_mode<synchronous>, transform_indices = @transform_1, window_bounds = array<i64: 784, 1024>}, {transform_indices = @transform_2, window_bounds = array<i64: 1, 1024, 1024>}, {pipeline_mode = #tpu.pipeline_mode<synchronous>, transform_indices = @transform_3, window_bounds = array<i64: 1024, 10>}, {transform_indices = @transform_4, window_bounds = array<i64: 1, 1, 1024>}, {pipeline_mode = #tpu.pipeline_mode<synchronous>, transform_indices = @transform_5, window_bounds = array<i64: 1, 10>}, {pipeline_mode = #tpu.pipeline_mode<synchronous>, transform_indices = @transform_6, window_bounds = array<i64: 8, 10>}]} {
    %c0_i32 = arith.constant 0 : i32
    %0 = arith.cmpi eq, %arg0, %c0_i32 : i32
    %1 = arith.extui %0 : i1 to i32
    %c0_i32_0 = arith.constant 0 : i32
    %2 = arith.cmpi ne, %1, %c0_i32_0 : i32
    scf.if %2 {
      %c0 = arith.constant 0 : index
      %c0_5 = arith.constant 0 : index
      %11 = vector.load %arg1[%c0, %c0_5] : memref<8x784xf32, #tpu.memory_space<vmem>>, vector<8x784xf32>
      %12 = arith.truncf %11 : vector<8x784xf32> to vector<8x784xbf16>
      %c0_6 = arith.constant 0 : index
      %c0_7 = arith.constant 0 : index
      %13 = vector.load %arg2[%c0_6, %c0_7] : memref<784x1024xbf16, #tpu.memory_space<vmem>>, vector<784x1024xbf16>
      %cst = arith.constant dense<0.000000e+00> : vector<8x1024xf32>
      %14 = tpu.matmul %12, %13, %cst {dimension_numbers = #tpu.dot_dimension_numbers<[1], [0], [0], [1], [0, 0, 1, 1], [], []>} : vector<8x784xbf16>, vector<784x1024xbf16>, vector<8x1024xf32> -> vector<8x1024xf32>
      %c0_8 = arith.constant 0 : index
      %c0_9 = arith.constant 0 : index
      %c0_10 = arith.constant 0 : index
      %15 = vector.load %arg5[%c0_8, %c0_9, %c0_10] : memref<1x1x1024xf32, #tpu.memory_space<vmem>>, vector<1x1x1024xf32>
      %16 = vector.shape_cast %15 : vector<1x1x1024xf32> to vector<1x1024xf32>
      %17 = vector.broadcast %16 : vector<1x1024xf32> to vector<8x1024xf32>
      %18 = arith.addf %14, %17 : vector<8x1024xf32>
      %c0_11 = arith.constant 0 : index
      %c0_12 = arith.constant 0 : index
      %19 = vector.load %arg8[%c0_11, %c0_12] : memref<8x1024xf32, #tpu.memory_space<vmem>>, vector<8x1024xf32>
      tpu.vector_store %arg8[%c0_11, %c0_12], %18 {strides = array<i32>} : memref<8x1024xf32, #tpu.memory_space<vmem>>, vector<8x1024xf32>,
    } else {
    }
    %c0_i32_1 = arith.constant 0 : i32
    %3 = arith.cmpi sgt, %arg0, %c0_i32_1 : i32
    %c7_i32 = arith.constant 7 : i32
    %4 = arith.cmpi slt, %arg0, %c7_i32 : i32
    %5 = arith.andi %3, %4 : i1
    %6 = arith.extui %5 : i1 to i32
    %c0_i32_2 = arith.constant 0 : i32
    %7 = arith.cmpi ne, %6, %c0_i32_2 : i32
    scf.if %7 {
      %c0 = arith.constant 0 : index
      %c0_5 = arith.constant 0 : index
      %11 = vector.load %arg8[%c0, %c0_5] : memref<8x1024xf32, #tpu.memory_space<vmem>>, vector<8x1024xf32>
      %12 = arith.truncf %11 : vector<8x1024xf32> to vector<8x1024xbf16>
      %c0_6 = arith.constant 0 : index
      %c0_7 = arith.constant 0 : index
      %c0_8 = arith.constant 0 : index
      %13 = vector.load %arg3[%c0_6, %c0_7, %c0_8] : memref<1x1024x1024xbf16, #tpu.memory_space<vmem>>, vector<1x1024x1024xbf16>
      %14 = vector.shape_cast %13 : vector<1x1024x1024xbf16> to vector<1024x1024xbf16>
      %cst = arith.constant dense<0.000000e+00> : vector<8x1024xf32>
      %15 = tpu.matmul %12, %14, %cst {dimension_numbers = #tpu.dot_dimension_numbers<[1], [0], [0], [1], [0, 0, 1, 1], [], []>} : vector<8x1024xbf16>, vector<1024x1024xbf16>, vector<8x1024xf32> -> vector<8x1024xf32>
      %c0_9 = arith.constant 0 : index
      %c0_10 = arith.constant 0 : index
      %c0_11 = arith.constant 0 : index
      %16 = vector.load %arg5[%c0_9, %c0_10, %c0_11] : memref<1x1x1024xf32, #tpu.memory_space<vmem>>, vector<1x1x1024xf32>
      %17 = vector.shape_cast %16 : vector<1x1x1024xf32> to vector<1x1024xf32>
      %18 = vector.broadcast %17 : vector<1x1024xf32> to vector<8x1024xf32>
      %19 = arith.addf %15, %18 : vector<8x1024xf32>
      %c0_12 = arith.constant 0 : index
      %c0_13 = arith.constant 0 : index
      %20 = vector.load %arg8[%c0_12, %c0_13] : memref<8x1024xf32, #tpu.memory_space<vmem>>, vector<8x1024xf32>
      tpu.vector_store %arg8[%c0_12, %c0_13], %19 {strides = array<i32>} : memref<8x1024xf32, #tpu.memory_space<vmem>>, vector<8x1024xf32>,
    } else {
    }
    %c7_i32_3 = arith.constant 7 : i32
    %8 = arith.cmpi eq, %arg0, %c7_i32_3 : i32
    %9 = arith.extui %8 : i1 to i32
    %c0_i32_4 = arith.constant 0 : i32
    %10 = arith.cmpi ne, %9, %c0_i32_4 : i32
    scf.if %10 {
      %c0 = arith.constant 0 : index
      %c0_5 = arith.constant 0 : index
      %11 = vector.load %arg8[%c0, %c0_5] : memref<8x1024xf32, #tpu.memory_space<vmem>>, vector<8x1024xf32>
      %12 = arith.truncf %11 : vector<8x1024xf32> to vector<8x1024xbf16>
      %c0_6 = arith.constant 0 : index
      %c0_7 = arith.constant 0 : index
      %13 = vector.load %arg4[%c0_6, %c0_7] : memref<1024x10xbf16, #tpu.memory_space<vmem>>, vector<1024x10xbf16>
      %cst = arith.constant dense<0.000000e+00> : vector<8x10xf32>
      %14 = tpu.matmul %12, %13, %cst {dimension_numbers = #tpu.dot_dimension_numbers<[1], [0], [0], [1], [0, 0, 1, 1], [], []>} : vector<8x1024xbf16>, vector<1024x10xbf16>, vector<8x10xf32> -> vector<8x10xf32>
      %c0_8 = arith.constant 0 : index
      %c0_9 = arith.constant 0 : index
      %15 = vector.load %arg6[%c0_8, %c0_9] : memref<1x10xf32, #tpu.memory_space<vmem>>, vector<1x10xf32>
      %16 = vector.broadcast %15 : vector<1x10xf32> to vector<8x10xf32>
      %17 = arith.addf %14, %16 : vector<8x10xf32>
      %c0_10 = arith.constant 0 : index
      %c0_11 = arith.constant 0 : index
      %18 = vector.load %arg7[%c0_10, %c0_11] : memref<8x10xf32, #tpu.memory_space<vmem>>, vector<8x10xf32>
      tpu.vector_store %arg7[%c0_10, %c0_11], %17 {strides = array<i32>} : memref<8x10xf32, #tpu.memory_space<vmem>>, vector<8x10xf32>,
    } else {
    }
    return
  }
  func.func @transform_0(%arg0: i32) -> (i32, i32) {
    %c0_i32 = arith.constant 0 : i32
    %c0_i32_0 = arith.constant 0 : i32
    %c0_i32_1 = arith.constant 0 : i32
    return %c0_i32, %c0_i32_0 : i32, i32
  }
  func.func @transform_1(%arg0: i32) -> (i32, i32) {
    %c0_i32 = arith.constant 0 : i32
    %c0_i32_0 = arith.constant 0 : i32
    %c0_i32_1 = arith.constant 0 : i32
    return %c0_i32, %c0_i32_0 : i32, i32
  }
  func.func @transform_2(%arg0: i32) -> (i32, i32, i32) {
    %c1_i32 = arith.constant 1 : i32
    %0 = arith.subi %arg0, %c1_i32 : i32
    %c0_i32 = arith.constant 0 : i32
    %1 = arith.maxsi %0, %c0_i32 : i32
    %c5_i32 = arith.constant 5 : i32
    %2 = arith.minsi %1, %c5_i32 : i32
    %c0_i32_0 = arith.constant 0 : i32
    %c0_i32_1 = arith.constant 0 : i32
    %c0_i32_2 = arith.constant 0 : i32
    return %2, %c0_i32_0, %c0_i32_1 : i32, i32, i32
  }
  func.func @transform_3(%arg0: i32) -> (i32, i32) {
    %c0_i32 = arith.constant 0 : i32
    %c0_i32_0 = arith.constant 0 : i32
    %c0_i32_1 = arith.constant 0 : i32
    return %c0_i32, %c0_i32_0 : i32, i32
  }
  func.func @transform_4(%arg0: i32) -> (i32, i32, i32) {
    %c6_i32 = arith.constant 6 : i32
    %0 = arith.minsi %arg0, %c6_i32 : i32
    %c0_i32 = arith.constant 0 : i32
    %c0_i32_0 = arith.constant 0 : i32
    %c0_i32_1 = arith.constant 0 : i32
    return %0, %c0_i32, %c0_i32_0 : i32, i32, i32
  }
  func.func @transform_5(%arg0: i32) -> (i32, i32) {
    %c0_i32 = arith.constant 0 : i32
    %c0_i32_0 = arith.constant 0 : i32
    %c0_i32_1 = arith.constant 0 : i32
    return %c0_i32, %c0_i32_0 : i32, i32
  }
  func.func @transform_6(%arg0: i32) -> (i32, i32) {
    %c0_i32 = arith.constant 0 : i32
    %c0_i32_0 = arith.constant 0 : i32
    %c0_i32_1 = arith.constant 0 : i32
    return %c0_i32, %c0_i32_0 : i32, i32
  }
}

</mosaic_0001>

<bundles_post_ra>
// kernel: mnist_mlp_forward.1
= control target key start
LH: loop header
LB: loop body
LE: loop exit
PB: predicated region body
PF: predicated region fallthrough
CT: control target
= control target key end

     0   :  { %s9143_s21 = smov 0   ;;  %s11265_s0 = inlined_call_operand.vmem [shape: f32[8,784], index: 0, kind: input, shape index: {}]   ;;  %s11266_s1 = inlined_call_operand.vmem [shape: bf16[784,1024], index: 1, kind: input, shape index: {}]   ;;  %s11267_s2 = inlined_call_operand.vmem [shape: bf16[6,1024,1024], index: 2, kind: input, shape index: {}]   ;;  %s11268_s3 = inlined_call_operand.vmem [shape: bf16[1024,10], index: 3, kind: input, shape index: {}]   ;;  %s11269_s4 = inlined_call_operand.vmem [shape: f32[7,1,1024], index: 4, kind: input, shape index: {}]   ;;  %s11270_s5 = inlined_call_operand.vmem [shape: f32[1,10], index: 5, kind: input, shape index: {}]   ;;  %s11271_s6 = inlined_call_operand.vmem [shape: f32[8,10], index: 6, kind: output, shape index: {}]  }
   0x1 LB: > { %s9149_s22 = sadd.s32 4294967295, %s9105_s21   ;;  %p7940_p0 = scmp.ge.s32.totalorder %s9105_s21, 1  ;;  %s9105_s21 = sphi %s9143_s21, %s16_s21  }
   0x2   : > { %p244_p1 = scmp.lt.s32.totalorder %s9105_s21, 9 }
   0x4   : > { %p245_p2 = pnand %p7940_p0, %p244_p1 }
   0x5   : > { %s7941_s23 = sadd.s32 (!%p245_p2), 4294967295, %s9149_s22  ;;  %p295_p3 = scmp.lt.s32.totalorder (!%p245_p2), %s9149_s22, 6 }
   0x6   : > { %248 = sbr.rel (%p245_p2) target bundleno = 1629 (0x65d), region = 44  ;;  %p281_p4 = scmp.gt.s32.totalorder (!%p245_p2), %s7941_s23, 0 }
   0x7   : > { %p7942_p5 = scmp.lt.s32.totalorder (!%p245_p2), %s7941_s23, 5  ;;  %p7953_p7 = scmp.ne.s32.totalorder (!%p245_p2), %s9149_s22, 0 }
   0xb   : > { %s296_s24 = scalar_select %p295_p3, %s9149_s22, 6 }
   0xc   : > { %s11273_s23 = smov (!%p281_p4, %s7941_s23), 0 }
   0xd   : > { %s11275_s24 = smov (!%p295_p3, %s296_s24), 6  ;;  %s11277_s23 = smov (!%p7942_p5, %s11273_s23), 5 }
   0xe   : > { %s7952_s25 = sshll.u32 %s11275_s24, 3  ;;  %p285_p6 = scmp.lt.s32.totalorder %s11277_s23, 5 }
   0xf   : > { %s9159_s28 = scalar_lea.vmem %s11269_s4, %s7952_s25  ;;  %307 = sbr.rel (%p7953_p7) target bundleno = 626 (0x272), region = 48 }
  0x10   : > { %s11279_s23 = smov (!%p285_p6, %s11277_s23), 5 }
  0x11   : > { %s8936_s29 = sshll.u32 %s11279_s23, 12 }
  0x12   : > { %s9164_s8 = scalar_lea.vmem %s11267_s2, %s8936_s29 }
  0x14   : > { %v378_v0 = vld [vmem:[%s11266_s1 + $0x1c0] sm:$0xff]  ;;  %v309_v53 = vld [vmem:[%s11265_s0 + $0x8] sm:$0xff]  ;;  %v311_v54 = vld [vmem:[%s11265_s0 + $0x18] sm:$0xff]  ;;  %vm2716_vm0 = vcmask 130048  }
  0x15   : > { %v382_v1 = vld [vmem:[%s11266_s1 + $0x1e0] sm:$0xff]  ;;  %v9263_v58 = vpack.c.bf16 %v309_v53, %v309_v53  ;;  %v9265_v59 = vpack.c.bf16 %v311_v54, %v311_v54 }
  0x16   : > { %v506_v2 = vld [vmem:[%s11266_s1 + $0x5c0] sm:$0xff]  ;;  %v8011_v3 = vcombine.high %v378_v0, %v382_v1  ;;  %v8010_v5 = vcombine.low %v378_v0, %v382_v1 }
  0x17   : > { %v510_v4 = vld [vmem:[%s11266_s1 + $0x5e0] sm:$0xff]  ;;  %2752 = vmatprep.mubr.bf16.mxu0 %v9263_v58  ;;  %2793 = vmatprep.mubr.bf16.mxu1 %v9265_v59 }
  0x18   : > { %v370_v6 = vld [vmem:[%s11266_s1 + $0x180] sm:$0xff]  ;;  %v8139_v8 = vcombine.high %v506_v2, %v510_v4  ;;  %v8138_v9 = vcombine.low %v506_v2, %v510_v4  ;;  %2720 = vmatprep.subr.bf16.mxu0 %v8011_v3 }
  0x19   : > { %v374_v7 = vld [vmem:[%s11266_s1 + $0x1a0] sm:$0xff]  ;;  %2721 = vmatpush1.bf16.msra.mxu0 %v8010_v5 }
  0x1a   : > { %v8003_v10 = vcombine.high %v370_v6, %v374_v7  ;;  %v498_v11 = vld [vmem:[%s11266_s1 + $0x580] sm:$0xff]  ;;  %2761 = vmatprep.subr.bf16.mxu1 %v8139_v8  ;;  %v8002_v18 = vcombine.low %v370_v6, %v374_v7 }
  0x1b   : > { %v502_v12 = vld [vmem:[%s11266_s1 + $0x5a0] sm:$0xff]  ;;  %2762 = vmatpush1.bf16.msra.mxu1 %v8138_v9 }
  0x1c   : > { %v362_v13 = vld [vmem:[%s11266_s1 + $0x140] sm:$0xff]  ;;  %v8131_v14 = vcombine.high %v498_v11, %v502_v12  ;;  %2722 = vmatprep.subr.bf16.mxu0 %v8003_v10  ;;  %v8130_v19 = vcombine.low %v498_v11, %v502_v12 }
  0x1d   : > { %v366_v15 = vld [vmem:[%s11266_s1 + $0x160] sm:$0xff]  ;;  %2723 = vmatpush1.bf16.msra.mxu0 %v8002_v18 }
  0x1e   : > { %v490_v16 = vld [vmem:[%s11266_s1 + $0x540] sm:$0xff]  ;;  %v7995_v20 = vcombine.high %v362_v13, %v366_v15  ;;  %2763 = vmatprep.subr.bf16.mxu1 %v8131_v14  ;;  %v7994_v26 = vcombine.low %v362_v13, %v366_v15 }
  0x1f   : > { %v494_v17 = vld [vmem:[%s11266_s1 + $0x560] sm:$0xff]  ;;  %2764 = vmatpush1.bf16.msra.mxu1 %v8130_v19 }
  0x20   : > { %v8123_v21 = vcombine.high %v490_v16, %v494_v17  ;;  %v354_v22 = vld [vmem:[%s11266_s1 + $0x100] sm:$0xff]  ;;  %2724 = vmatprep.subr.bf16.mxu0 %v7995_v20  ;;  %v8122_v27 = vcombine.low %v490_v16, %v494_v17 }
  0x21   : > { %v358_v23 = vld [vmem:[%s11266_s1 + $0x120] sm:$0xff]  ;;  %2725 = vmatpush1.bf16.msra.mxu0 %v7994_v26 }
  0x22   : > { %v482_v24 = vld [vmem:[%s11266_s1 + $0x500] sm:$0xff]  ;;  %v7987_v28 = vcombine.high %v354_v22, %v358_v23  ;;  %2765 = vmatprep.subr.bf16.mxu1 %v8123_v21  ;;  %v7986_v34 = vcombine.low %v354_v22, %v358_v23 }
  0x23   : > { %v486_v25 = vld [vmem:[%s11266_s1 + $0x520] sm:$0xff]  ;;  %2766 = vmatpush1.bf16.msra.mxu1 %v8122_v27 }
  0x24   : > { %v8115_v29 = vcombine.high %v482_v24, %v486_v25  ;;  %v346_v30 = vld [vmem:[%s11266_s1 + $0xc0] sm:$0xff]  ;;  %2726 = vmatprep.subr.bf16.mxu0 %v7987_v28  ;;  %v8114_v35 = vcombine.low %v482_v24, %v486_v25 }
  0x25   : > { %v350_v31 = vld [vmem:[%s11266_s1 + $0xe0] sm:$0xff]  ;;  %2727 = vmatpush1.bf16.msra.mxu0 %v7986_v34 }
  0x26   : > { %v474_v32 = vld [vmem:[%s11266_s1 + $0x4c0] sm:$0xff]  ;;  %v7979_v36 = vcombine.high %v346_v30, %v350_v31  ;;  %2767 = vmatprep.subr.bf16.mxu1 %v8115_v29  ;;  %v7978_v42 = vcombine.low %v346_v30, %v350_v31 }
  0x27   : > { %v478_v33 = vld [vmem:[%s11266_s1 + $0x4e0] sm:$0xff]  ;;  %2768 = vmatpush1.bf16.msra.mxu1 %v8114_v35 }
  0x28   : > { %v8107_v37 = vcombine.high %v474_v32, %v478_v33  ;;  %v338_v38 = vld [vmem:[%s11266_s1 + $0x80] sm:$0xff]  ;;  %2728 = vmatprep.subr.bf16.mxu0 %v7979_v36  ;;  %v8106_v43 = vcombine.low %v474_v32, %v478_v33 }
  0x29   : > { %v342_v39 = vld [vmem:[%s11266_s1 + $0xa0] sm:$0xff]  ;;  %2729 = vmatpush1.bf16.msra.mxu0 %v7978_v42 }
  0x2a   : > { %v466_v40 = vld [vmem:[%s11266_s1 + $0x480] sm:$0xff]  ;;  %v7971_v44 = vcombine.high %v338_v38, %v342_v39  ;;  %2769 = vmatprep.subr.bf16.mxu1 %v8107_v37  ;;  %v7970_v50 = vcombine.low %v338_v38, %v342_v39 }
  0x2b   : > { %v470_v41 = vld [vmem:[%s11266_s1 + $0x4a0] sm:$0xff]  ;;  %2770 = vmatpush1.bf16.msra.mxu1 %v8106_v43 }
  0x2c   : > { %v8099_v45 = vcombine.high %v466_v40, %v470_v41  ;;  %v330_v46 = vld [vmem:[%s11266_s1 + $0x40] sm:$0xff]  ;;  %2730 = vmatprep.subr.bf16.mxu0 %v7971_v44  ;;  %v8098_v51 = vcombine.low %v466_v40, %v470_v41 }
  0x2d   : > { %v334_v47 = vld [vmem:[%s11266_s1 + $0x60] sm:$0xff]  ;;  %2731 = vmatpush1.bf16.msra.mxu0 %v7970_v50 }
  0x2e   : > { %v458_v48 = vld [vmem:[%s11266_s1 + $0x440] sm:$0xff]  ;;  %v7963_v52 = vcombine.high %v330_v46, %v334_v47  ;;  %2771 = vmatprep.subr.bf16.mxu1 %v8099_v45  ;;  %v7962_v62 = vcombine.low %v330_v46, %v334_v47 }
  0x2f   : > { %v462_v49 = vld [vmem:[%s11266_s1 + $0x460] sm:$0xff]  ;;  %2772 = vmatpush1.bf16.msra.mxu1 %v8098_v51 }
  0x30   : > { %v8091_v55 = vcombine.high %v458_v48, %v462_v49  ;;  %v322_v56 = vld [vmem:[%s11266_s1] sm:$0xff]  ;;  %2732 = vmatprep.subr.bf16.mxu0 %v7963_v52  ;;  %v8090_v63 = vcombine.low %v458_v48, %v462_v49 }
  0x31   : > { %v326_v57 = vld [vmem:[%s11266_s1 + $0x20] sm:$0xff]  ;;  %2733 = vmatpush1.bf16.msra.mxu0 %v7962_v62 }
  0x32   : > { %v450_v60 = vld [vmem:[%s11266_s1 + $0x400] sm:$0xff]  ;;  %v7955_v0 = vcombine.high %v322_v56, %v326_v57  ;;  %2773 = vmatprep.subr.bf16.mxu1 %v8091_v55  ;;  %v7954_v6 = vcombine.low %v322_v56, %v326_v57 }
  0x33   : > { %v454_v61 = vld [vmem:[%s11266_s1 + $0x420] sm:$0xff]  ;;  %2774 = vmatpush1.bf16.msra.mxu1 %v8090_v63 }
  0x34   : > { %v8083_v1 = vcombine.high %v450_v60, %v454_v61  ;;  %v442_v2 = vld [vmem:[%s11266_s1 + $0x3c0] sm:$0xff]  ;;  %2734 = vmatprep.subr.bf16.mxu0 %v7955_v0  ;;  %v8082_v7 = vcombine.low %v450_v60, %v454_v61 }
  0x35   : > { %v446_v3 = vld [vmem:[%s11266_s1 + $0x3e0] sm:$0xff]  ;;  %2735 = vmatpush1.bf16.msra.mxu0 %v7954_v6 }
  0x36   : > { %v570_v4 = vld [vmem:[%s11266_s1 + $0x7c0] sm:$0xff]  ;;  %v8075_v8 = vcombine.high %v442_v2, %v446_v3  ;;  %2775 = vmatprep.subr.bf16.mxu1 %v8083_v1  ;;  %v8074_v14 = vcombine.low %v442_v2, %v446_v3 }
  0x37   : > { %v574_v5 = vld [vmem:[%s11266_s1 + $0x7e0] sm:$0xff]  ;;  %2776 = vmatpush1.bf16.msra.mxu1 %v8082_v7 }
  0x38   : > { %v8203_v9 = vcombine.high %v570_v4, %v574_v5  ;;  %v434_v10 = vld [vmem:[%s11266_s1 + $0x380] sm:$0xff]  ;;  %2736 = vmatprep.subr.bf16.mxu0 %v8075_v8  ;;  %v8202_v15 = vcombine.low %v570_v4, %v574_v5 }
  0x39   : > { %v438_v11 = vld [vmem:[%s11266_s1 + $0x3a0] sm:$0xff]  ;;  %2737 = vmatpush2.bf16.msra.mxu0 %v8074_v14 }
  0x3a   : > { %v562_v12 = vld [vmem:[%s11266_s1 + $0x780] sm:$0xff]  ;;  %v8067_v16 = vcombine.high %v434_v10, %v438_v11  ;;  %2777 = vmatprep.subr.bf16.mxu1 %v8203_v9  ;;  %v8066_v22 = vcombine.low %v434_v10, %v438_v11  ;;  %v310_v11 = vld [vmem:[%s11265_s0 + $0x10] sm:$0xff] }
  0x3b   : > { %v566_v13 = vld [vmem:[%s11266_s1 + $0x7a0] sm:$0xff]  ;;  %2778 = vmatpush2.bf16.msra.mxu1 %v8202_v15 }
  0x3c   : > { %v8195_v17 = vcombine.high %v562_v12, %v566_v13  ;;  %v426_v18 = vld [vmem:[%s11266_s1 + $0x340] sm:$0xff]  ;;  %2738 = vmatprep.subr.bf16.mxu0 %v8067_v16  ;;  %v8194_v23 = vcombine.low %v562_v12, %v566_v13 }
  0x3d   : > { %v430_v19 = vld [vmem:[%s11266_s1 + $0x360] sm:$0xff]  ;;  %2739 = vmatpush2.bf16.msra.mxu0 %v8066_v22 }
  0x3e   : > { %v554_v20 = vld [vmem:[%s11266_s1 + $0x740] sm:$0xff]  ;;  %v8059_v24 = vcombine.high %v426_v18, %v430_v19  ;;  %2779 = vmatprep.subr.bf16.mxu1 %v8195_v17  ;;  %v8058_v30 = vcombine.low %v426_v18, %v430_v19  ;;  %v379_v17 = vld [vmem:[%s11266_s1 + $0x1c8] sm:$0xff]  ;;  %v9403_v19 = vpack.c.bf16 %v310_v11, %v310_v11 }
  0x3f   : > { %v558_v21 = vld [vmem:[%s11266_s1 + $0x760] sm:$0xff]  ;;  %2780 = vmatpush2.bf16.msra.mxu1 %v8194_v23  ;;  %v383_v18 = vld [vmem:[%s11266_s1 + $0x1e8] sm:$0xff] }
  0x40   : > { %v8187_v25 = vcombine.high %v554_v20, %v558_v21  ;;  %v418_v26 = vld [vmem:[%s11266_s1 + $0x300] sm:$0xff]  ;;  %2740 = vmatprep.subr.bf16.mxu0 %v8059_v24  ;;  %v8186_v31 = vcombine.low %v554_v20, %v558_v21  ;;  %v313_v21 = vld [vmem:[%s11265_s0 + $0x28] sm:$0xff]  ;;  %v8013_v24 = vcombine.high %v379_v17, %v383_v18 }
  0x41   : > { %v422_v27 = vld [vmem:[%s11266_s1 + $0x320] sm:$0xff]  ;;  %2741 = vmatpush2.bf16.msra.mxu0 %v8058_v30  ;;  %v314_v30 = vld [vmem:[%s11265_s0 + $0x30] sm:$0xff] }
  0x42   : > { %v546_v28 = vld [vmem:[%s11266_s1 + $0x700] sm:$0xff]  ;;  %v8051_v32 = vcombine.high %v418_v26, %v422_v27  ;;  %2781 = vmatprep.subr.bf16.mxu1 %v8187_v25  ;;  %v8050_v38 = vcombine.low %v418_v26, %v422_v27  ;;  %v9415_v27 = vpack.c.bf16 %v313_v21, %v313_v21 }
  0x43   : > { %v550_v29 = vld [vmem:[%s11266_s1 + $0x720] sm:$0xff]  ;;  %2782 = vmatpush2.bf16.msra.mxu1 %v8186_v31  ;;  %v9107_v31 = vmov 0  }
  0x44   : > { %v8179_v33 = vcombine.high %v546_v28, %v550_v29  ;;  %v410_v34 = vld [vmem:[%s11266_s1 + $0x2c0] sm:$0xff]  ;;  %2742 = vmatprep.subr.bf16.mxu0 %v8051_v32  ;;  %v8178_v39 = vcombine.low %v546_v28, %v550_v29 }
  0x45   : > { %v414_v35 = vld [vmem:[%s11266_s1 + $0x2e0] sm:$0xff]  ;;  %2743 = vmatpush2.bf16.msra.mxu0 %v8050_v38  ;;  %v8012_v38 = vcombine.low %v379_v17, %v383_v18 }
  0x46   : > { %v538_v36 = vld [vmem:[%s11266_s1 + $0x6c0] sm:$0xff]  ;;  %v8043_v40 = vcombine.high %v410_v34, %v414_v35  ;;  %2783 = vmatprep.subr.bf16.mxu1 %v8179_v33  ;;  %v8042_v46 = vcombine.low %v410_v34, %v414_v35  ;;  %v371_v34 = vld [vmem:[%s11266_s1 + $0x188] sm:$0xff] }
  0x47   : > { %v542_v37 = vld [vmem:[%s11266_s1 + $0x6e0] sm:$0xff]  ;;  %2784 = vmatpush2.bf16.msra.mxu1 %v8178_v39  ;;  %v375_v35 = vld [vmem:[%s11266_s1 + $0x1a8] sm:$0xff] }
  0x48   : > { %v8171_v41 = vcombine.high %v538_v36, %v542_v37  ;;  %v402_v42 = vld [vmem:[%s11266_s1 + $0x280] sm:$0xff]  ;;  %2744 = vmatprep.subr.bf16.mxu0 %v8043_v40  ;;  %v8170_v47 = vcombine.low %v538_v36, %v542_v37  ;;  %v9435_v37 = vpack.c.bf16 %v314_v30, %v314_v30  ;;  %v8005_v40 = vcombine.high %v371_v34, %v375_v35 }
  0x49   : > { %v406_v43 = vld [vmem:[%s11266_s1 + $0x2a0] sm:$0xff]  ;;  %2745 = vmatpush2.bf16.msra.mxu0 %v8042_v46  ;;  %v8004_v46 = vcombine.low %v371_v34, %v375_v35  ;;  %v447_v34 = vld [vmem:[%s11266_s1 + $0x3e8] sm:$0xff] }
  0x4a   : > { %v530_v44 = vld [vmem:[%s11266_s1 + $0x680] sm:$0xff]  ;;  %v8035_v48 = vcombine.high %v402_v42, %v406_v43  ;;  %2785 = vmatprep.subr.bf16.mxu1 %v8171_v41  ;;  %v8034_v54 = vcombine.low %v402_v42, %v406_v43  ;;  %v363_v43 = vld [vmem:[%s11266_s1 + $0x148] sm:$0xff] }
  0x4b   : > { %v534_v45 = vld [vmem:[%s11266_s1 + $0x6a0] sm:$0xff]  ;;  %2786 = vmatpush2.bf16.msra.mxu1 %v8170_v47 }
  0x4c   : > { %v8163_v49 = vcombine.high %v530_v44, %v534_v45  ;;  %v394_v50 = vld [vmem:[%s11266_s1 + $0x240] sm:$0xff]  ;;  %2746 = vmatprep.subr.bf16.mxu0 %v8035_v48  ;;  %v8162_v55 = vcombine.low %v530_v44, %v534_v45  ;;  %v367_v44 = vld [vmem:[%s11266_s1 + $0x168] sm:$0xff] }
  0x4d   : > { %v398_v51 = vld [vmem:[%s11266_s1 + $0x260] sm:$0xff]  ;;  %2747 = vmatpush2.bf16.msra.mxu0 %v8034_v54  ;;  %v7997_v48 = vcombine.high %v363_v43, %v367_v44  ;;  %v7996_v54 = vcombine.low %v363_v43, %v367_v44  ;;  %v439_v43 = vld [vmem:[%s11266_s1 + $0x3a8] sm:$0xff] }
  0x4e   : > { %v522_v52 = vld [vmem:[%s11266_s1 + $0x640] sm:$0xff]  ;;  %v8027_v56 = vcombine.high %v394_v50, %v398_v51  ;;  %2787 = vmatprep.subr.bf16.mxu1 %v8163_v49  ;;  %v8026_v0 = vcombine.low %v394_v50, %v398_v51  ;;  %v355_v51 = vld [vmem:[%s11266_s1 + $0x108] sm:$0xff] }
  0x4f   : > { %v526_v53 = vld [vmem:[%s11266_s1 + $0x660] sm:$0xff]  ;;  %2788 = vmatpush2.bf16.msra.mxu1 %v8162_v55 }
  0x50   : > { %v8155_v57 = vcombine.high %v522_v52, %v526_v53  ;;  %v386_v60 = vld [vmem:[%s11266_s1 + $0x200] sm:$0xff]  ;;  %2748 = vmatprep.subr.bf16.mxu0 %v8027_v56  ;;  %v8154_v1 = vcombine.low %v522_v52, %v526_v53  ;;  %v359_v52 = vld [vmem:[%s11266_s1 + $0x128] sm:$0xff] }
  0x51   : > { %v390_v61 = vld [vmem:[%s11266_s1 + $0x220] sm:$0xff]  ;;  %2749 = vmatpush2.bf16.msra.mxu0 %v8026_v0  ;;  %v7989_v56 = vcombine.high %v355_v51, %v359_v52  ;;  %v7988_v0 = vcombine.low %v355_v51, %v359_v52  ;;  %v431_v51 = vld [vmem:[%s11266_s1 + $0x368] sm:$0xff] }
  0x52   : > { %v514_v62 = vld [vmem:[%s11266_s1 + $0x600] sm:$0xff]  ;;  %v8019_v2 = vcombine.high %v386_v60, %v390_v61  ;;  %2789 = vmatprep.subr.bf16.mxu1 %v8155_v57  ;;  %v8018_v8 = vcombine.low %v386_v60, %v390_v61  ;;  %v347_v61 = vld [vmem:[%s11266_s1 + $0xc8] sm:$0xff] }
  0x53   : > { %v518_v63 = vld [vmem:[%s11266_s1 + $0x620] sm:$0xff]  ;;  %2790 = vmatpush2.bf16.msra.mxu1 %v8154_v1 }
  0x54   : > { %v8147_v3 = vcombine.high %v514_v62, %v518_v63  ;;  %v634_v4 = vld [vmem:[%s11266_s1 + $0x9c0] sm:$0xff]  ;;  %2750 = vmatprep.subr.bf16.mxu0 %v8019_v2  ;;  %v8146_v10 = vcombine.low %v514_v62, %v518_v63  ;;  %v351_v62 = vld [vmem:[%s11266_s1 + $0xe8] sm:$0xff] }
  0x55   : > { %v638_v5 = vld [vmem:[%s11266_s1 + $0x9e0] sm:$0xff]  ;;  %2751 = vmatpush2.bf16.msra.mxu0 %v8018_v8  ;;  %v7981_v2 = vcombine.high %v347_v61, %v351_v62  ;;  %v7980_v8 = vcombine.low %v347_v61, %v351_v62  ;;  %v423_v61 = vld [vmem:[%s11266_s1 + $0x328] sm:$0xff] }
  0x56   : > { %v706_v6 = vld [vmem:[%s11266_s1 + $0xc00] sm:$0xff]  ;;  %v8267_v12 = vcombine.high %v634_v4, %v638_v5  ;;  %2791 = vmatprep.subr.bf16.mxu1 %v8147_v3  ;;  %v8266_v20 = vcombine.low %v634_v4, %v638_v5  ;;  %v339_v5 = vld [vmem:[%s11266_s1 + $0x88] sm:$0xff] }
  0x57   : > { %v710_v7 = vld [vmem:[%s11266_s1 + $0xc20] sm:$0xff]  ;;  %2792 = vmatpush2.bf16.msra.mxu1 %v8146_v10 }
  0x58   : > { %v308_v9 = vld [vmem:[%s11265_s0] sm:$0xff]  ;;  %v8339_v13 = vcombine.high %v706_v6, %v710_v7  ;;  %2802 = vmatprep.subr.bf16.mxu0 %v8267_v12  ;;  %v8338_v22 = vcombine.low %v706_v6, %v710_v7  ;;  %v343_v6 = vld [vmem:[%s11266_s1 + $0xa8] sm:$0xff] }
  0x59   : > { %v626_v14 = vld [vmem:[%s11266_s1 + $0x980] sm:$0xff]  ;;  %v9395_v16 = vpack.c.bf16 %v308_v9, %v308_v9  ;;  %v7973_v10 = vcombine.high %v339_v5, %v343_v6  ;;  %v7972_v17 = vcombine.low %v339_v5, %v343_v6  ;;  %v415_v5 = vld [vmem:[%s11266_s1 + $0x2e8] sm:$0xff] }
  0x5a   : > { %v630_v15 = vld [vmem:[%s11266_s1 + $0x9a0] sm:$0xff]  ;;  %2857 = vmatprep.subr.bf16.mxu1 %v8339_v13  ;;  %2794 = vmatmul.mubr.bf16.vlgmr.msra.gmra.mxu1 %v9403_v19  ;;  %v331_v13 = vld [vmem:[%s11266_s1 + $0x48] sm:$0xff] }
  0x5b   : > { %v8259_v23 = vcombine.high %v626_v14, %v630_v15  ;;  %v618_v25 = vld [vmem:[%s11266_s1 + $0x940] sm:$0xff]  ;;  %2753 = vmatmul.mubr.bf16.vlgmr.msra.gmra.mxu0 %v9395_v16  ;;  %v8258_v28 = vcombine.low %v626_v14, %v630_v15  ;;  %2858 = vmatpush1.bf16.msra.mxu1 %v8338_v22  ;;  %v335_v14 = vld [vmem:[%s11266_s1 + $0x68] sm:$0xff] }
  0x5c   : > { %v622_v26 = vld [vmem:[%s11266_s1 + $0x960] sm:$0xff]  ;;  %2803 = vmatpush1.bf16.msra.mxu0 %v8266_v20  ;;  %2875 = vmatprep.mubr.bf16.mxu1 %v9107_v31  ;;  %v7965_v20 = vcombine.high %v331_v13, %v335_v14 }
  0x5d   : > { %2804 = vmatprep.subr.bf16.mxu0 %v8259_v23  ;;  %v8251_v29 = vcombine.high %v618_v25, %v622_v26  ;;  %2884 = vmatprep.subr.bf16.mxu1 %v8013_v24  ;;  %v610_v32 = vld [vmem:[%s11266_s1 + $0x900] sm:$0xff]  ;;  %v8250_v36 = vcombine.low %v618_v25, %v622_v26  ;;  %v323_v23 = vld [vmem:[%s11266_s1 + $0x8] sm:$0xff]  ;;  %v7964_v26 = vcombine.low %v331_v13, %v335_v14 }
  0x5e   : > { %v614_v33 = vld [vmem:[%s11266_s1 + $0x920] sm:$0xff]  ;;  %2834 = vmatprep.mubr.bf16.mxu0 %v9415_v27  ;;  %v327_v24 = vld [vmem:[%s11266_s1 + $0x28] sm:$0xff] }
  0x5f   : > { %v8243_v39 = vcombine.high %v610_v32, %v614_v33  ;;  %v602_v41 = vld [vmem:[%s11266_s1 + $0x8c0] sm:$0xff]  ;;  %v8242_v45 = vcombine.low %v610_v32, %v614_v33  ;;  %v443_v33 = vld [vmem:[%s11266_s1 + $0x3c8] sm:$0xff] }
  0x60   : > { %2805 = vmatpush1.bf16.msra.mxu0 %v8258_v28  ;;  %v606_v42 = vld [vmem:[%s11266_s1 + $0x8e0] sm:$0xff]  ;;  %v407_v13 = vld [vmem:[%s11266_s1 + $0x2a8] sm:$0xff] }
  0x61   : > { %2806 = vmatprep.subr.bf16.mxu0 %v8251_v29  ;;  %v8235_v47 = vcombine.high %v602_v41, %v606_v42  ;;  %v594_v49 = vld [vmem:[%s11266_s1 + $0x880] sm:$0xff]  ;;  %v8234_v53 = vcombine.low %v602_v41, %v606_v42  ;;  %v7957_v29 = vcombine.high %v323_v23, %v327_v24  ;;  %v435_v42 = vld [vmem:[%s11266_s1 + $0x388] sm:$0xff] }
  0x62   : > { %8346 = vmatmul.mubr.msk.bf16.vlgmr.msra.gmra.mxu1 %vm2716_vm0, %v9435_v37  ;;  %v598_v50 = vld [vmem:[%s11266_s1 + $0x8a0] sm:$0xff] }
  0x63   : > { %2885 = vmatpush1.bf16.msra.mxu1 %v8012_v38  ;;  %2916 = vmatprep.mubr.bf16.mxu1 %v9263_v58  ;;  %v8227_v55 = vcombine.high %v594_v49, %v598_v50  ;;  %v586_v57 = vld [vmem:[%s11266_s1 + $0x840] sm:$0xff]  ;;  %v8226_v63 = vcombine.low %v594_v49, %v598_v50  ;;  %v427_v50 = vld [vmem:[%s11266_s1 + $0x348] sm:$0xff] }
  0x64   : > { %2807 = vmatpush1.bf16.msra.mxu0 %v8250_v36  ;;  %2886 = vmatprep.subr.bf16.mxu1 %v8005_v40  ;;  %v590_v60 = vld [vmem:[%s11266_s1 + $0x860] sm:$0xff]  ;;  %v7956_v36 = vcombine.low %v323_v23, %v327_v24  ;;  %v399_v23 = vld [vmem:[%s11266_s1 + $0x268] sm:$0xff] }
  0x65   : > { %2808 = vmatprep.subr.bf16.mxu0 %v8243_v39  ;;  %v8219_v1 = vcombine.high %v586_v57, %v590_v60  ;;  %v578_v3 = vld [vmem:[%s11266_s1 + $0x800] sm:$0xff]  ;;  %v8218_v7 = vcombine.low %v586_v57, %v590_v60  ;;  %v8077_v39 = vcombine.high %v443_v33, %v447_v34  ;;  %v419_v60 = vld [vmem:[%s11266_s1 + $0x308] sm:$0xff] }
  0x66   : > { %v582_v4 = vld [vmem:[%s11266_s1 + $0x820] sm:$0xff] }
  0x67   : > { %2887 = vmatpush1.bf16.msra.mxu1 %v8004_v46  ;;  %v8211_v9 = vcombine.high %v578_v3, %v582_v4  ;;  %v698_v11 = vld [vmem:[%s11266_s1 + $0xbc0] sm:$0xff]  ;;  %v8210_v15 = vcombine.low %v578_v3, %v582_v4  ;;  %v411_v4 = vld [vmem:[%s11266_s1 + $0x2c8] sm:$0xff] }
  0x68   : > { %2809 = vmatpush1.bf16.msra.mxu0 %v8242_v45  ;;  %2888 = vmatprep.subr.bf16.mxu1 %v7997_v48  ;;  %v702_v12 = vld [vmem:[%s11266_s1 + $0xbe0] sm:$0xff]  ;;  %v8076_v45 = vcombine.low %v443_v33, %v447_v34  ;;  %v387_v34 = vld [vmem:[%s11266_s1 + $0x208] sm:$0xff] }
  0x69   : > { %2810 = vmatprep.subr.bf16.mxu0 %v8235_v47  ;;  %v8331_v18 = vcombine.high %v698_v11, %v702_v12  ;;  %v690_v21 = vld [vmem:[%s11266_s1 + $0xb80] sm:$0xff]  ;;  %v8330_v25 = vcombine.low %v698_v11, %v702_v12  ;;  %v8069_v47 = vcombine.high %v435_v42, %v439_v43  ;;  %v403_v12 = vld [vmem:[%s11266_s1 + $0x288] sm:$0xff] }
  0x6a   : > { %v694_v22 = vld [vmem:[%s11266_s1 + $0xba0] sm:$0xff] }
  0x6b   : > { %2889 = vmatpush1.bf16.msra.mxu1 %v7996_v54  ;;  %v8323_v28 = vcombine.high %v690_v21, %v694_v22  ;;  %v682_v30 = vld [vmem:[%s11266_s1 + $0xb40] sm:$0xff]  ;;  %v8322_v35 = vcombine.low %v690_v21, %v694_v22  ;;  %v511_v21 = vld [vmem:[%s11266_s1 + $0x5e8] sm:$0xff] }
  0x6c   : > { %2811 = vmatpush1.bf16.msra.mxu0 %v8234_v53  ;;  %2890 = vmatprep.subr.bf16.mxu1 %v7989_v56  ;;  %v686_v32 = vld [vmem:[%s11266_s1 + $0xb60] sm:$0xff]  ;;  %v8068_v53 = vcombine.low %v435_v42, %v439_v43  ;;  %v395_v22 = vld [vmem:[%s11266_s1 + $0x248] sm:$0xff] }
  0x6d   : > { %2812 = vmatprep.subr.bf16.mxu0 %v8227_v55  ;;  %v8315_v38 = vcombine.high %v682_v30, %v686_v32  ;;  %v674_v40 = vld [vmem:[%s11266_s1 + $0xb00] sm:$0xff]  ;;  %v8314_v44 = vcombine.low %v682_v30, %v686_v32  ;;  %v8061_v55 = vcombine.high %v427_v50, %v431_v51  ;;  %v499_v30 = vld [vmem:[%s11266_s1 + $0x588] sm:$0xff] }
  0x6e   : > { %v678_v41 = vld [vmem:[%s11266_s1 + $0xb20] sm:$0xff]  ;;  %v503_v32 = vld [vmem:[%s11266_s1 + $0x5a8] sm:$0xff] }
  0x6f   : > { %2891 = vmatpush1.bf16.msra.mxu1 %v7988_v0  ;;  %v8307_v46 = vcombine.high %v674_v40, %v678_v41  ;;  %v666_v48 = vld [vmem:[%s11266_s1 + $0xac0] sm:$0xff]  ;;  %v8306_v52 = vcombine.low %v674_v40, %v678_v41  ;;  %v491_v41 = vld [vmem:[%s11266_s1 + $0x548] sm:$0xff] }
  0x70   : > { %2813 = vmatpush1.bf16.msra.mxu0 %v8226_v63  ;;  %2892 = vmatprep.subr.bf16.mxu1 %v7981_v2  ;;  %v670_v49 = vld [vmem:[%s11266_s1 + $0xae0] sm:$0xff]  ;;  %v8060_v63 = vcombine.low %v427_v50, %v431_v51  ;;  %v495_v42 = vld [vmem:[%s11266_s1 + $0x568] sm:$0xff] }
  0x71   : > { %2814 = vmatprep.subr.bf16.mxu0 %v8219_v1  ;;  %v8299_v54 = vcombine.high %v666_v48, %v670_v49  ;;  %v658_v56 = vld [vmem:[%s11266_s1 + $0xa80] sm:$0xff]  ;;  %v8298_v62 = vcombine.low %v666_v48, %v670_v49  ;;  %v8053_v1 = vcombine.high %v419_v60, %v423_v61  ;;  %v635_v43 = vld [vmem:[%s11266_s1 + $0x9c8] sm:$0xff] }
  0x72   : > { %v662_v57 = vld [vmem:[%s11266_s1 + $0xaa0] sm:$0xff]  ;;  %v483_v49 = vld [vmem:[%s11266_s1 + $0x508] sm:$0xff] }
  0x73   : > { %2893 = vmatpush1.bf16.msra.mxu1 %v7980_v8  ;;  %v8291_v0 = vcombine.high %v658_v56, %v662_v57  ;;  %v650_v2 = vld [vmem:[%s11266_s1 + $0xa40] sm:$0xff]  ;;  %v8290_v6 = vcombine.low %v658_v56, %v662_v57  ;;  %v487_v50 = vld [vmem:[%s11266_s1 + $0x528] sm:$0xff] }
  0x74   : > { %2815 = vmatpush1.bf16.msra.mxu0 %v8218_v7  ;;  %2894 = vmatprep.subr.bf16.mxu1 %v7973_v10  ;;  %v654_v3 = vld [vmem:[%s11266_s1 + $0xa60] sm:$0xff]  ;;  %v8052_v7 = vcombine.low %v419_v60, %v423_v61  ;;  %v627_v51 = vld [vmem:[%s11266_s1 + $0x988] sm:$0xff] }
  0x75   : > { %2816 = vmatprep.subr.bf16.mxu0 %v8211_v9  ;;  %v8283_v8 = vcombine.high %v650_v2, %v654_v3  ;;  %v8045_v9 = vcombine.high %v411_v4, %v415_v5  ;;  %v642_v10 = vld [vmem:[%s11266_s1 + $0xa00] sm:$0xff]  ;;  %v8282_v14 = vcombine.low %v650_v2, %v654_v3  ;;  %v475_v57 = vld [vmem:[%s11266_s1 + $0x4c8] sm:$0xff] }
  0x76   : > { %v646_v11 = vld [vmem:[%s11266_s1 + $0xa20] sm:$0xff]  ;;  %v479_v60 = vld [vmem:[%s11266_s1 + $0x4e8] sm:$0xff] }
  0x77   : > { %2895 = vmatpush1.bf16.msra.mxu1 %v7972_v17  ;;  %v8275_v17 = vcombine.high %v642_v10, %v646_v11  ;;  %v8274_v24 = vcombine.low %v642_v10, %v646_v11  ;;  %v619_v61 = vld [vmem:[%s11266_s1 + $0x948] sm:$0xff] }
  0x78   : > { %2817 = vmatpush1.bf16.msra.mxu0 %v8210_v15  ;;  %2896 = vmatprep.subr.bf16.mxu1 %v7965_v20  ;;  %v8044_v15 = vcombine.low %v411_v4, %v415_v5  ;;  %v507_v20 = vld [vmem:[%s11266_s1 + $0x5c8] sm:$0xff] }
  0x79   : > { %2818 = vmatprep.subr.bf16.mxu0 %v8331_v18  ;;  %v8037_v18 = vcombine.high %v403_v12, %v407_v13  ;;  %v467_v3 = vld [vmem:[%s11266_s1 + $0x488] sm:$0xff] }
  0x7a   : > { %v471_v4 = vld [vmem:[%s11266_s1 + $0x4a8] sm:$0xff] }
  0x7b   : > { %2897 = vmatpush1.bf16.msra.mxu1 %v7964_v26  ;;  %v8036_v26 = vcombine.low %v403_v12, %v407_v13  ;;  %v611_v5 = vld [vmem:[%s11266_s1 + $0x908] sm:$0xff] }
  0x7c   : > { %2819 = vmatpush2.bf16.msra.mxu0 %v8330_v25  ;;  %2898 = vmatprep.subr.bf16.mxu1 %v7957_v29  ;;  %v312_v25 = vld [vmem:[%s11265_s0 + $0x20] sm:$0xff]  ;;  %v8029_v29 = vcombine.high %v395_v22, %v399_v23  ;;  %v459_v11 = vld [vmem:[%s11266_s1 + $0x448] sm:$0xff] }
  0x7d   : > { %2820 = vmatprep.subr.bf16.mxu0 %v8323_v28  ;;  %v8141_v28 = vcombine.high %v507_v20, %v511_v21  ;;  %v9605_v33 = vpack.c.bf16 %v312_v25, %v312_v25  ;;  %v463_v12 = vld [vmem:[%s11266_s1 + $0x468] sm:$0xff] }
  0x7e   : > { %v603_v13 = vld [vmem:[%s11266_s1 + $0x8c8] sm:$0xff]  ;;  %v8092_v25 = vcombine.low %v459_v11, %v463_v12 }
  0x7f   : > { %2899 = vmatpush1.bf16.msra.mxu1 %v7956_v36  ;;  %v8140_v36 = vcombine.low %v507_v20, %v511_v21  ;;  %v451_v21 = vld [vmem:[%s11266_s1 + $0x408] sm:$0xff] }
  0x80   : > { %2821 = vmatpush2.bf16.msra.mxu0 %v8322_v35  ;;  %2900 = vmatprep.subr.bf16.mxu1 %v8077_v39  ;;  %v391_v35 = vld [vmem:[%s11266_s1 + $0x228] sm:$0xff]  ;;  %v8133_v39 = vcombine.high %v499_v30, %v503_v32 }
  0x81   : > { %2822 = vmatprep.subr.bf16.mxu0 %v8315_v38  ;;  %v8028_v38 = vcombine.low %v395_v22, %v399_v23  ;;  %v8021_v40 = vcombine.high %v387_v34, %v391_v35  ;;  %v455_v22 = vld [vmem:[%s11266_s1 + $0x428] sm:$0xff] }
  0x82   : > { %v595_v23 = vld [vmem:[%s11266_s1 + $0x888] sm:$0xff] }
  0x83   : > { %2901 = vmatpush2.bf16.msra.mxu1 %v8076_v45  ;;  %v8132_v45 = vcombine.low %v499_v30, %v503_v32  ;;  %v571_v30 = vld [vmem:[%s11266_s1 + $0x7c8] sm:$0xff] }
  0x84   : > { %2823 = vmatpush2.bf16.msra.mxu0 %v8314_v44  ;;  %2902 = vmatprep.subr.bf16.mxu1 %v8069_v47  ;;  %v639_v44 = vld [vmem:[%s11266_s1 + $0x9e8] sm:$0xff]  ;;  %v8125_v47 = vcombine.high %v491_v41, %v495_v42 }
  0x85   : > { %2824 = vmatprep.subr.bf16.mxu0 %v8307_v46  ;;  %v8020_v46 = vcombine.low %v387_v34, %v391_v35  ;;  %v8269_v48 = vcombine.high %v635_v43, %v639_v44  ;;  %v575_v32 = vld [vmem:[%s11266_s1 + $0x7e8] sm:$0xff] }
  0x86   : > { %v587_v34 = vld [vmem:[%s11266_s1 + $0x848] sm:$0xff] }
  0x87   : > { %2903 = vmatpush2.bf16.msra.mxu1 %v8068_v53  ;;  %v8124_v53 = vcombine.low %v491_v41, %v495_v42  ;;  %v591_v35 = vld [vmem:[%s11266_s1 + $0x868] sm:$0xff] }
  0x88   : > { %2825 = vmatpush2.bf16.msra.mxu0 %v8306_v52  ;;  %2904 = vmatprep.subr.bf16.mxu1 %v8061_v55  ;;  %v631_v52 = vld [vmem:[%s11266_s1 + $0x9a8] sm:$0xff]  ;;  %v8117_v55 = vcombine.high %v483_v49, %v487_v50 }
  0x89   : > { %2826 = vmatprep.subr.bf16.mxu0 %v8299_v54  ;;  %v8268_v54 = vcombine.low %v635_v43, %v639_v44  ;;  %v8261_v56 = vcombine.high %v627_v51, %v631_v52  ;;  %v563_v41 = vld [vmem:[%s11266_s1 + $0x788] sm:$0xff] }
  0x8a   : > { %v567_v42 = vld [vmem:[%s11266_s1 + $0x7a8] sm:$0xff] }
  0x8b   : > { %2905 = vmatpush2.bf16.msra.mxu1 %v8060_v63  ;;  %v8116_v63 = vcombine.low %v483_v49, %v487_v50  ;;  %v579_v43 = vld [vmem:[%s11266_s1 + $0x808] sm:$0xff] }
  0x8c   : > { %2827 = vmatpush2.bf16.msra.mxu0 %v8298_v62  ;;  %2906 = vmatprep.subr.bf16.mxu1 %v8053_v1  ;;  %v623_v62 = vld [vmem:[%s11266_s1 + $0x968] sm:$0xff]  ;;  %v8109_v1 = vcombine.high %v475_v57, %v479_v60 }
  0x8d   : > { %2828 = vmatprep.subr.bf16.mxu0 %v8291_v0  ;;  %v8260_v0 = vcombine.low %v627_v51, %v631_v52  ;;  %v8253_v2 = vcombine.high %v619_v61, %v623_v62  ;;  %v583_v44 = vld [vmem:[%s11266_s1 + $0x828] sm:$0xff] }
  0x8e   : > { %v555_v49 = vld [vmem:[%s11266_s1 + $0x748] sm:$0xff] }
  0x8f   : > { %2907 = vmatpush2.bf16.msra.mxu1 %v8052_v7  ;;  %v8108_v7 = vcombine.low %v475_v57, %v479_v60  ;;  %v559_v50 = vld [vmem:[%s11266_s1 + $0x768] sm:$0xff] }
  0x90   : > { %2829 = vmatpush2.bf16.msra.mxu0 %v8290_v6  ;;  %2908 = vmatprep.subr.bf16.mxu1 %v8045_v9  ;;  %v615_v6 = vld [vmem:[%s11266_s1 + $0x928] sm:$0xff]  ;;  %v8101_v9 = vcombine.high %v467_v3, %v471_v4 }
  0x91   : > { %2830 = vmatprep.subr.bf16.mxu0 %v8283_v8  ;;  %v8252_v8 = vcombine.low %v619_v61, %v623_v62  ;;  %v8245_v10 = vcombine.high %v611_v5, %v615_v6  ;;  %v699_v51 = vld [vmem:[%s11266_s1 + $0xbc8] sm:$0xff] }
  0x92   : > { %v703_v52 = vld [vmem:[%s11266_s1 + $0xbe8] sm:$0xff] }
  0x93   : > { %2909 = vmatpush2.bf16.msra.mxu1 %v8044_v15  ;;  %v8100_v15 = vcombine.low %v467_v3, %v471_v4  ;;  %v547_v57 = vld [vmem:[%s11266_s1 + $0x708] sm:$0xff] }
  0x94   : > { %2831 = vmatpush2.bf16.msra.mxu0 %v8282_v14  ;;  %2910 = vmatprep.subr.bf16.mxu1 %v8037_v18  ;;  %v607_v14 = vld [vmem:[%s11266_s1 + $0x8e8] sm:$0xff]  ;;  %v8093_v18 = vcombine.high %v459_v11, %v463_v12 }
  0x95   : > { %2832 = vmatprep.subr.bf16.mxu0 %v8275_v17  ;;  %v8244_v17 = vcombine.low %v611_v5, %v615_v6  ;;  %v8237_v20 = vcombine.high %v603_v13, %v607_v14  ;;  %v551_v60 = vld [vmem:[%s11266_s1 + $0x728] sm:$0xff] }
  0x96   : > { %v691_v61 = vld [vmem:[%s11266_s1 + $0xb88] sm:$0xff] }
  0x97   : > { %2911 = vmatpush2.bf16.msra.mxu1 %v8036_v26  ;;  %v8236_v26 = vcombine.low %v603_v13, %v607_v14  ;;  %v695_v62 = vld [vmem:[%s11266_s1 + $0xba8] sm:$0xff] }
  0x98   : > { %2833 = vmatpush2.bf16.msra.mxu0 %v8274_v24  ;;  %2912 = vmatprep.subr.bf16.mxu1 %v8029_v29  ;;  %v599_v24 = vld [vmem:[%s11266_s1 + $0x8a8] sm:$0xff] }
  0x99   : > { %2925 = vmatprep.subr.bf16.mxu0 %v8141_v28  ;;  %v8085_v28 = vcombine.high %v451_v21, %v455_v22  ;;  %v8229_v29 = vcombine.high %v595_v23, %v599_v24  ;;  %v539_v3 = vld [vmem:[%s11266_s1 + $0x6c8] sm:$0xff] }
  0x9a   : > { %v543_v4 = vld [vmem:[%s11266_s1 + $0x6e8] sm:$0xff] }
  0x9b   : > { %2835 = vmatmul.mubr.bf16.vlgmr.msra.gmra.mxu0 %v9605_v33  ;;  %2913 = vmatpush2.bf16.msra.mxu1 %v8028_v38  ;;  %v8228_v38 = vcombine.low %v595_v23, %v599_v24  ;;  %v683_v5 = vld [vmem:[%s11266_s1 + $0xb48] sm:$0xff] }
  0x9c   : > { %2926 = vmatpush1.bf16.msra.mxu0 %v8140_v36  ;;  %2957 = vmatprep.mubr.bf16.mxu0 %v9265_v59  ;;  %v8084_v36 = vcombine.low %v451_v21, %v455_v22  ;;  %v687_v6 = vld [vmem:[%s11266_s1 + $0xb68] sm:$0xff] }
  0x9d   : > { %2927 = vmatprep.subr.bf16.mxu0 %v8133_v39  ;;  %2914 = vmatprep.subr.bf16.mxu1 %v8021_v40  ;;  %v8205_v39 = vcombine.high %v571_v30, %v575_v32  ;;  %v8221_v40 = vcombine.high %v587_v34, %v591_v35  ;;  %v531_v11 = vld [vmem:[%s11266_s1 + $0x688] sm:$0xff] }
  0x9e   : > { %v535_v12 = vld [vmem:[%s11266_s1 + $0x6a8] sm:$0xff] }
  0x9f   : > { %2915 = vmatpush2.bf16.msra.mxu1 %v8020_v46  ;;  %v8220_v46 = vcombine.low %v587_v34, %v591_v35  ;;  %v675_v13 = vld [vmem:[%s11266_s1 + $0xb08] sm:$0xff] }
  0xa0   : > { %2928 = vmatpush1.bf16.msra.mxu0 %v8132_v45  ;;  %2966 = vmatprep.subr.bf16.mxu1 %v8269_v48  ;;  %v8204_v45 = vcombine.low %v571_v30, %v575_v32  ;;  %v8213_v48 = vcombine.high %v579_v43, %v583_v44  ;;  %v679_v14 = vld [vmem:[%s11266_s1 + $0xb28] sm:$0xff] }
  0xa1   : > { %2929 = vmatprep.subr.bf16.mxu0 %v8125_v47  ;;  %v8197_v47 = vcombine.high %v563_v41, %v567_v42  ;;  %v523_v21 = vld [vmem:[%s11266_s1 + $0x648] sm:$0xff] }
  0xa2   : > { %2917 = vmatmul.mubr.bf16.vlgmr.msra.gmra.mxu1 %v9395_v16  ;;  %v527_v22 = vld [vmem:[%s11266_s1 + $0x668] sm:$0xff] }
  0xa3   : > { %2967 = vmatpush1.bf16.msra.mxu1 %v8268_v54  ;;  %2998 = vmatprep.mubr.bf16.mxu1 %v9415_v27  ;;  %v8212_v54 = vcombine.low %v579_v43, %v583_v44  ;;  %v667_v23 = vld [vmem:[%s11266_s1 + $0xac8] sm:$0xff] }
  0xa4   : > { %2930 = vmatpush1.bf16.msra.mxu0 %v8124_v53  ;;  %2968 = vmatprep.subr.bf16.mxu1 %v8261_v56  ;;  %v8196_v53 = vcombine.low %v563_v41, %v567_v42  ;;  %v8333_v56 = vcombine.high %v699_v51, %v703_v52  ;;  %v671_v24 = vld [vmem:[%s11266_s1 + $0xae8] sm:$0xff] }
  0xa5   : > { %2931 = vmatprep.subr.bf16.mxu0 %v8117_v55  ;;  %v8189_v55 = vcombine.high %v555_v49, %v559_v50  ;;  %v515_v30 = vld [vmem:[%s11266_s1 + $0x608] sm:$0xff] }
  0xa6   : > { %v519_v32 = vld [vmem:[%s11266_s1 + $0x628] sm:$0xff] }
  0xa7   : > { %2969 = vmatpush1.bf16.msra.mxu1 %v8260_v0  ;;  %v8332_v0 = vcombine.low %v699_v51, %v703_v52  ;;  %v659_v34 = vld [vmem:[%s11266_s1 + $0xa88] sm:$0xff] }
  0xa8   : > { %2932 = vmatpush1.bf16.msra.mxu0 %v8116_v63  ;;  %2970 = vmatprep.subr.bf16.mxu1 %v8253_v2  ;;  %v8188_v63 = vcombine.low %v555_v49, %v559_v50  ;;  %v8325_v2 = vcombine.high %v691_v61, %v695_v62  ;;  %v663_v35 = vld [vmem:[%s11266_s1 + $0xaa8] sm:$0xff]  ;;  %v380_v49 = vld [vmem:[%s11266_s1 + $0x1d0] sm:$0xff] }
  0xa9   : > { %2933 = vmatprep.subr.bf16.mxu0 %v8109_v1  ;;  %v8181_v1 = vcombine.high %v547_v57, %v551_v60  ;;  %v707_v41 = vld [vmem:[%s11266_s1 + $0xc08] sm:$0xff]  ;;  %v384_v50 = vld [vmem:[%s11266_s1 + $0x1f0] sm:$0xff] }
  0xaa   : > { %v711_v42 = vld [vmem:[%s11266_s1 + $0xc28] sm:$0xff] }
  0xab   : > { %2971 = vmatpush1.bf16.msra.mxu1 %v8252_v8  ;;  %v8324_v8 = vcombine.low %v691_v61, %v695_v62  ;;  %v651_v43 = vld [vmem:[%s11266_s1 + $0xa48] sm:$0xff] }
  0xac   : > { %2934 = vmatpush1.bf16.msra.mxu0 %v8108_v7  ;;  %2972 = vmatprep.subr.bf16.mxu1 %v8245_v10  ;;  %v8180_v7 = vcombine.low %v547_v57, %v551_v60  ;;  %v8317_v10 = vcombine.high %v683_v5, %v687_v6  ;;  %v655_v44 = vld [vmem:[%s11266_s1 + $0xa68] sm:$0xff]  ;;  %v508_v57 = vld [vmem:[%s11266_s1 + $0x5d0] sm:$0xff] }
  0xad   : > { %2935 = vmatprep.subr.bf16.mxu0 %v8101_v9  ;;  %v8173_v9 = vcombine.high %v539_v3, %v543_v4  ;;  %v643_v51 = vld [vmem:[%s11266_s1 + $0xa08] sm:$0xff]  ;;  %v512_v60 = vld [vmem:[%s11266_s1 + $0x5f0] sm:$0xff] }
  0xae   : > { %v647_v52 = vld [vmem:[%s11266_s1 + $0xa28] sm:$0xff]  ;;  %v8143_v62 = vcombine.high %v508_v57, %v512_v60 }
  0xaf   : > { %2973 = vmatpush1.bf16.msra.mxu1 %v8244_v17  ;;  %v8316_v17 = vcombine.low %v683_v5, %v687_v6  ;;  %v8276_v61 = vcombine.low %v643_v51, %v647_v52 }
  0xb0   : > { %2936 = vmatpush1.bf16.msra.mxu0 %v8100_v15  ;;  %2974 = vmatprep.subr.bf16.mxu1 %v8237_v20  ;;  %v8172_v15 = vcombine.low %v539_v3, %v543_v4  ;;  %v8309_v20 = vcombine.high %v675_v13, %v679_v14  ;;  %v8014_v3 = vcombine.low %v380_v49, %v384_v50 }
  0xb1   : > { %2937 = vmatprep.subr.bf16.mxu0 %v8093_v18  ;;  %v8165_v18 = vcombine.high %v531_v11, %v535_v12  ;;  %v8142_v4 = vcombine.low %v508_v57, %v512_v60 }
  0xb3   : > { %2975 = vmatpush1.bf16.msra.mxu1 %v8236_v26  ;;  %v8308_v26 = vcombine.low %v675_v13, %v679_v14 }
  0xb4   : > { %2938 = vmatpush1.bf16.msra.mxu0 %v8092_v25  ;;  %2976 = vmatprep.subr.bf16.mxu1 %v8229_v29  ;;  %v8164_v25 = vcombine.low %v531_v11, %v535_v12  ;;  %v8301_v29 = vcombine.high %v667_v23, %v671_v24 }
  0xb5   : > { %2939 = vmatprep.subr.bf16.mxu0 %v8085_v28  ;;  %v8157_v28 = vcombine.high %v523_v21, %v527_v22 }
  0xb7   : > { %2977 = vmatpush1.bf16.msra.mxu1 %v8228_v38  ;;  %v8300_v38 = vcombine.low %v667_v23, %v671_v24 }
  0xb8   : > { %2940 = vmatpush1.bf16.msra.mxu0 %v8084_v36  ;;  %2978 = vmatprep.subr.bf16.mxu1 %v8221_v40  ;;  %v8156_v36 = vcombine.low %v523_v21, %v527_v22  ;;  %v8293_v40 = vcombine.high %v659_v34, %v663_v35 }
  0xb9   : > { %2941 = vmatprep.subr.bf16.mxu0 %v8205_v39  ;;  %v8149_v39 = vcombine.high %v515_v30, %v519_v32 }
  0xbb   : > { %2979 = vmatpush1.bf16.msra.mxu1 %v8220_v46  ;;  %v8292_v46 = vcombine.low %v659_v34, %v663_v35 }
  0xbc   : > { %2942 = vmatpush2.bf16.msra.mxu0 %v8204_v45  ;;  %2980 = vmatprep.subr.bf16.mxu1 %v8213_v48  ;;  %v8148_v45 = vcombine.low %v515_v30, %v519_v32  ;;  %v8285_v48 = vcombine.high %v651_v43, %v655_v44 }
  0xbd   : > { %2943 = vmatprep.subr.bf16.mxu0 %v8197_v47  ;;  %v8341_v47 = vcombine.high %v707_v41, %v711_v42 }
  0xbf   : > { %2981 = vmatpush1.bf16.msra.mxu1 %v8212_v54  ;;  %v8284_v54 = vcombine.low %v651_v43, %v655_v44 }
  0xc0   : > { %2944 = vmatpush2.bf16.msra.mxu0 %v8196_v53  ;;  %2982 = vmatprep.subr.bf16.mxu1 %v8333_v56  ;;  %v8340_v53 = vcombine.low %v707_v41, %v711_v42  ;;  %v8277_v56 = vcombine.high %v643_v51, %v647_v52 }
  0xc1   : > { %2945 = vmatprep.subr.bf16.mxu0 %v8189_v55  ;;  %v8015_v55 = vcombine.high %v380_v49, %v384_v50 }
  0xc3   : > { %2983 = vmatpush2.bf16.msra.mxu1 %v8332_v0  ;;  %v376_v0 = vld [vmem:[%s11266_s1 + $0x1b0] sm:$0xff] }
  0xc4   : > { %2946 = vmatpush2.bf16.msra.mxu0 %v8188_v63  ;;  %2984 = vmatprep.subr.bf16.mxu1 %v8325_v2  ;;  %v372_v63 = vld [vmem:[%s11266_s1 + $0x190] sm:$0xff] }
  0xc5   : > { %2947 = vmatprep.subr.bf16.mxu0 %v8181_v1  ;;  %v500_v1 = vld [vmem:[%s11266_s1 + $0x590] sm:$0xff]  ;;  %v8007_v5 = vcombine.high %v372_v63, %v376_v0  ;;  %v8006_v11 = vcombine.low %v372_v63, %v376_v0 }
  0xc6   : > { %v504_v2 = vld [vmem:[%s11266_s1 + $0x5b0] sm:$0xff] }
  0xc7   : > { %2985 = vmatpush2.bf16.msra.mxu1 %v8324_v8  ;;  %v8135_v6 = vcombine.high %v500_v1, %v504_v2  ;;  %v368_v8 = vld [vmem:[%s11266_s1 + $0x170] sm:$0xff]  ;;  %v8134_v12 = vcombine.low %v500_v1, %v504_v2 }
  0xc8   : > { %2948 = vmatpush2.bf16.msra.mxu0 %v8180_v7  ;;  %2986 = vmatprep.subr.bf16.mxu1 %v8317_v10  ;;  %v364_v7 = vld [vmem:[%s11266_s1 + $0x150] sm:$0xff] }
  0xc9   : > { %2949 = vmatprep.subr.bf16.mxu0 %v8173_v9  ;;  %v492_v9 = vld [vmem:[%s11266_s1 + $0x550] sm:$0xff]  ;;  %v7999_v13 = vcombine.high %v364_v7, %v368_v8  ;;  %v7998_v21 = vcombine.low %v364_v7, %v368_v8 }
  0xca   : > { %v496_v10 = vld [vmem:[%s11266_s1 + $0x570] sm:$0xff] }
  0xcb   : > { %2987 = vmatpush2.bf16.msra.mxu1 %v8316_v17  ;;  %v8127_v14 = vcombine.high %v492_v9, %v496_v10  ;;  %v360_v17 = vld [vmem:[%s11266_s1 + $0x130] sm:$0xff]  ;;  %v8126_v22 = vcombine.low %v492_v9, %v496_v10 }
  0xcc   : > { %2950 = vmatpush2.bf16.msra.mxu0 %v8172_v15  ;;  %2988 = vmatprep.subr.bf16.mxu1 %v8309_v20  ;;  %v356_v15 = vld [vmem:[%s11266_s1 + $0x110] sm:$0xff] }
  0xcd   : > { %2951 = vmatprep.subr.bf16.mxu0 %v8165_v18  ;;  %v484_v18 = vld [vmem:[%s11266_s1 + $0x510] sm:$0xff]  ;;  %v7991_v23 = vcombine.high %v356_v15, %v360_v17  ;;  %v7990_v30 = vcombine.low %v356_v15, %v360_v17 }
  0xce   : > { %v488_v20 = vld [vmem:[%s11266_s1 + $0x530] sm:$0xff] }
  0xcf   : > { %2989 = vmatpush2.bf16.msra.mxu1 %v8308_v26  ;;  %v8119_v24 = vcombine.high %v484_v18, %v488_v20  ;;  %v352_v26 = vld [vmem:[%s11266_s1 + $0xf0] sm:$0xff]  ;;  %v8118_v32 = vcombine.low %v484_v18, %v488_v20 }
  0xd0   : > { %2952 = vmatpush2.bf16.msra.mxu0 %v8164_v25  ;;  %2990 = vmatprep.subr.bf16.mxu1 %v8301_v29  ;;  %v348_v25 = vld [vmem:[%s11266_s1 + $0xd0] sm:$0xff] }
  0xd1   : > { %2953 = vmatprep.subr.bf16.mxu0 %v8157_v28  ;;  %v476_v28 = vld [vmem:[%s11266_s1 + $0x4d0] sm:$0xff]  ;;  %v7983_v34 = vcombine.high %v348_v25, %v352_v26  ;;  %v7982_v41 = vcombine.low %v348_v25, %v352_v26 }
  0xd2   : > { %v480_v29 = vld [vmem:[%s11266_s1 + $0x4f0] sm:$0xff] }
  0xd3   : > { %2991 = vmatpush2.bf16.msra.mxu1 %v8300_v38  ;;  %v8111_v35 = vcombine.high %v476_v28, %v480_v29  ;;  %v344_v38 = vld [vmem:[%s11266_s1 + $0xb0] sm:$0xff]  ;;  %v8110_v42 = vcombine.low %v476_v28, %v480_v29 }
  0xd4   : > { %2954 = vmatpush2.bf16.msra.mxu0 %v8156_v36  ;;  %2992 = vmatprep.subr.bf16.mxu1 %v8293_v40  ;;  %v340_v36 = vld [vmem:[%s11266_s1 + $0x90] sm:$0xff] }
  0xd5   : > { %2955 = vmatprep.subr.bf16.mxu0 %v8149_v39  ;;  %v468_v39 = vld [vmem:[%s11266_s1 + $0x490] sm:$0xff]  ;;  %v7975_v43 = vcombine.high %v340_v36, %v344_v38  ;;  %v7974_v49 = vcombine.low %v340_v36, %v344_v38 }
  0xd6   : > { %v472_v40 = vld [vmem:[%s11266_s1 + $0x4b0] sm:$0xff] }
  0xd7   : > { %2993 = vmatpush2.bf16.msra.mxu1 %v8292_v46  ;;  %v8103_v44 = vcombine.high %v468_v39, %v472_v40  ;;  %v336_v46 = vld [vmem:[%s11266_s1 + $0x70] sm:$0xff]  ;;  %v8102_v50 = vcombine.low %v468_v39, %v472_v40 }
  0xd8   : > { %2956 = vmatpush2.bf16.msra.mxu0 %v8148_v45  ;;  %2994 = vmatprep.subr.bf16.mxu1 %v8285_v48  ;;  %v332_v45 = vld [vmem:[%s11266_s1 + $0x50] sm:$0xff] }
  0xd9   : > { %3021 = vmatprep.subr.bf16.mxu0 %v8341_v47  ;;  %v460_v47 = vld [vmem:[%s11266_s1 + $0x450] sm:$0xff]  ;;  %v7967_v51 = vcombine.high %v332_v45, %v336_v46  ;;  %v7966_v57 = vcombine.low %v332_v45, %v336_v46 }
  0xda   : > { %v464_v48 = vld [vmem:[%s11266_s1 + $0x470] sm:$0xff] }
  0xdb   : > { %2958 = vmatmul.mubr.bf16.vlgmr.msra.gmra.mxu0 %v9403_v19  ;;  %2995 = vmatpush2.bf16.msra.mxu1 %v8284_v54  ;;  %v8095_v52 = vcombine.high %v460_v47, %v464_v48  ;;  %v328_v54 = vld [vmem:[%s11266_s1 + $0x30] sm:$0xff]  ;;  %v8094_v60 = vcombine.low %v460_v47, %v464_v48 }
  0xdc   : > { %3022 = vmatpush1.bf16.msra.mxu0 %v8340_v53  ;;  %3039 = vmatprep.mubr.bf16.mxu0 %v9107_v31  ;;  %v324_v53 = vld [vmem:[%s11266_s1 + $0x10] sm:$0xff] }
  0xdd   : > { %3048 = vmatprep.subr.bf16.mxu0 %v8015_v55  ;;  %2996 = vmatprep.subr.bf16.mxu1 %v8277_v56  ;;  %v452_v55 = vld [vmem:[%s11266_s1 + $0x410] sm:$0xff] }
  0xde   : > { %v456_v56 = vld [vmem:[%s11266_s1 + $0x430] sm:$0xff] }
  0xdf   : > { %2997 = vmatpush2.bf16.msra.mxu1 %v8276_v61  ;;  %v7959_v61 = vcombine.high %v324_v53, %v328_v54  ;;  %v444_v63 = vld [vmem:[%s11266_s1 + $0x3d0] sm:$0xff] }
  0xe0   : > { %3089 = vmatprep.subr.bf16.mxu1 %v8143_v62  ;;  %v8087_v62 = vcombine.high %v452_v55, %v456_v56  ;;  %v448_v0 = vld [vmem:[%s11266_s1 + $0x3f0] sm:$0xff] }
  0xe1   : > { %v572_v1 = vld [vmem:[%s11266_s1 + $0x7d0] sm:$0xff] }
  0xe2   : > { %2999 = vmatmul.mubr.bf16.vlgmr.msra.gmra.mxu1 %v9605_v33  ;;  %v576_v2 = vld [vmem:[%s11266_s1 + $0x7f0] sm:$0xff] }
  0xe3   : > { %8347 = vmatmul.mubr.msk.bf16.vlgmr.msra.gmra.mxu0 %vm2716_vm0, %v9435_v37  ;;  %3090 = vmatpush1.bf16.msra.mxu1 %v8142_v4  ;;  %v8086_v4 = vcombine.low %v452_v55, %v456_v56  ;;  %v436_v7 = vld [vmem:[%s11266_s1 + $0x390] sm:$0xff] }
  0xe4   : > { %3049 = vmatpush1.bf16.msra.mxu0 %v8014_v3  ;;  %3091 = vmatprep.subr.bf16.mxu1 %v8135_v6  ;;  %v7958_v3 = vcombine.low %v324_v53, %v328_v54  ;;  %v8207_v6 = vcombine.high %v572_v1, %v576_v2  ;;  %v440_v8 = vld [vmem:[%s11266_s1 + $0x3b0] sm:$0xff] }
  0xe5   : > { %3050 = vmatprep.subr.bf16.mxu0 %v8007_v5  ;;  %3080 = vmatprep.mubr.bf16.mxu0 %v9263_v58  ;;  %v8079_v5 = vcombine.high %v444_v63, %v448_v0  ;;  %v564_v9 = vld [vmem:[%s11266_s1 + $0x790] sm:$0xff] }
  0xe6   : > { %3121 = vmatprep.mubr.bf16.mxu1 %v9265_v59  ;;  %v568_v10 = vld [vmem:[%s11266_s1 + $0x7b0] sm:$0xff] }
  0xe7   : > { %3092 = vmatpush1.bf16.msra.mxu1 %v8134_v12  ;;  %v8206_v12 = vcombine.low %v572_v1, %v576_v2  ;;  %v428_v15 = vld [vmem:[%s11266_s1 + $0x350] sm:$0xff] }
  0xe8   : > { %3051 = vmatpush1.bf16.msra.mxu0 %v8006_v11  ;;  %3093 = vmatprep.subr.bf16.mxu1 %v8127_v14  ;;  %v8078_v11 = vcombine.low %v444_v63, %v448_v0  ;;  %v8199_v14 = vcombine.high %v564_v9, %v568_v10  ;;  %v432_v17 = vld [vmem:[%s11266_s1 + $0x370] sm:$0xff] }
  0xe9   : > { %3052 = vmatprep.subr.bf16.mxu0 %v7999_v13  ;;  %v8071_v13 = vcombine.high %v436_v7, %v440_v8  ;;  %v556_v18 = vld [vmem:[%s11266_s1 + $0x750] sm:$0xff] }
  0xea   : > { %v560_v20 = vld [vmem:[%s11266_s1 + $0x770] sm:$0xff] }
  0xeb   : > { %3094 = vmatpush1.bf16.msra.mxu1 %v8126_v22  ;;  %v8198_v22 = vcombine.low %v564_v9, %v568_v10  ;;  %v420_v25 = vld [vmem:[%s11266_s1 + $0x310] sm:$0xff] }
  0xec   : > { %3053 = vmatpush1.bf16.msra.mxu0 %v7998_v21  ;;  %3095 = vmatprep.subr.bf16.mxu1 %v8119_v24  ;;  %v8070_v21 = vcombine.low %v436_v7, %v440_v8  ;;  %v8191_v24 = vcombine.high %v556_v18, %v560_v20  ;;  %v424_v26 = vld [vmem:[%s11266_s1 + $0x330] sm:$0xff] }
  0xed   : > { %3054 = vmatprep.subr.bf16.mxu0 %v7991_v23  ;;  %v8063_v23 = vcombine.high %v428_v15, %v432_v17  ;;  %v548_v28 = vld [vmem:[%s11266_s1 + $0x710] sm:$0xff] }
  0xee   : > { %v552_v29 = vld [vmem:[%s11266_s1 + $0x730] sm:$0xff] }
  0xef   : > { %3096 = vmatpush1.bf16.msra.mxu1 %v8118_v32  ;;  %v8190_v32 = vcombine.low %v556_v18, %v560_v20  ;;  %v412_v36 = vld [vmem:[%s11266_s1 + $0x2d0] sm:$0xff] }
  0xf0   : > { %3055 = vmatpush1.bf16.msra.mxu0 %v7990_v30  ;;  %3097 = vmatprep.subr.bf16.mxu1 %v8111_v35  ;;  %v8062_v30 = vcombine.low %v428_v15, %v432_v17  ;;  %v8183_v35 = vcombine.high %v548_v28, %v552_v29  ;;  %v416_v38 = vld [vmem:[%s11266_s1 + $0x2f0] sm:$0xff] }
  0xf1   : > { %3056 = vmatprep.subr.bf16.mxu0 %v7983_v34  ;;  %v8055_v34 = vcombine.high %v420_v25, %v424_v26  ;;  %v540_v39 = vld [vmem:[%s11266_s1 + $0x6d0] sm:$0xff] }
  0xf2   : > { %v544_v40 = vld [vmem:[%s11266_s1 + $0x6f0] sm:$0xff] }
  0xf3   : > { %3098 = vmatpush1.bf16.msra.mxu1 %v8110_v42  ;;  %v8182_v42 = vcombine.low %v548_v28, %v552_v29  ;;  %v404_v45 = vld [vmem:[%s11266_s1 + $0x290] sm:$0xff] }
  0xf4   : > { %3057 = vmatpush1.bf16.msra.mxu0 %v7982_v41  ;;  %3099 = vmatprep.subr.bf16.mxu1 %v8103_v44  ;;  %v8054_v41 = vcombine.low %v420_v25, %v424_v26  ;;  %v8175_v44 = vcombine.high %v540_v39, %v544_v40  ;;  %v408_v46 = vld [vmem:[%s11266_s1 + $0x2b0] sm:$0xff]  ;;  %v385_v25 = vld [vmem:[%s11266_s1 + $0x1f8] sm:$0xff] }
  0xf5   : > { %3058 = vmatprep.subr.bf16.mxu0 %v7975_v43  ;;  %v8047_v43 = vcombine.high %v412_v36, %v416_v38  ;;  %v532_v47 = vld [vmem:[%s11266_s1 + $0x690] sm:$0xff] }
  0xf6   : > { %v536_v48 = vld [vmem:[%s11266_s1 + $0x6b0] sm:$0xff] }
  0xf7   : > { %3100 = vmatpush1.bf16.msra.mxu1 %v8102_v50  ;;  %v8174_v50 = vcombine.low %v540_v39, %v544_v40  ;;  %v396_v53 = vld [vmem:[%s11266_s1 + $0x250] sm:$0xff] }
  0xf8   : > { %3059 = vmatpush1.bf16.msra.mxu0 %v7974_v49  ;;  %3101 = vmatprep.subr.bf16.mxu1 %v8095_v52  ;;  %v8046_v49 = vcombine.low %v412_v36, %v416_v38  ;;  %v8167_v52 = vcombine.high %v532_v47, %v536_v48  ;;  %v400_v54 = vld [vmem:[%s11266_s1 + $0x270] sm:$0xff] }
  0xf9   : > { %3060 = vmatprep.subr.bf16.mxu0 %v7967_v51  ;;  %v8039_v51 = vcombine.high %v404_v45, %v408_v46  ;;  %v524_v55 = vld [vmem:[%s11266_s1 + $0x650] sm:$0xff] }
  0xfa   : > { %v528_v56 = vld [vmem:[%s11266_s1 + $0x670] sm:$0xff] }
  0xfb   : > { %3102 = vmatpush1.bf16.msra.mxu1 %v8094_v60  ;;  %v8166_v60 = vcombine.low %v532_v47, %v536_v48  ;;  %v388_v63 = vld [vmem:[%s11266_s1 + $0x210] sm:$0xff] }
  0xfc   : > { %3061 = vmatpush1.bf16.msra.mxu0 %v7966_v57  ;;  %3103 = vmatprep.subr.bf16.mxu1 %v8087_v62  ;;  %v8038_v57 = vcombine.low %v404_v45, %v408_v46  ;;  %v8159_v62 = vcombine.high %v524_v55, %v528_v56  ;;  %v392_v0 = vld [vmem:[%s11266_s1 + $0x230] sm:$0xff]  ;;  %v373_v45 = vld [vmem:[%s11266_s1 + $0x198] sm:$0xff] }
  0xfd   : > { %3062 = vmatprep.subr.bf16.mxu0 %v7959_v61  ;;  %v8031_v61 = vcombine.high %v396_v53, %v400_v54  ;;  %v516_v1 = vld [vmem:[%s11266_s1 + $0x610] sm:$0xff]  ;;  %v377_v46 = vld [vmem:[%s11266_s1 + $0x1b8] sm:$0xff] }
  0xfe   : > { %v520_v2 = vld [vmem:[%s11266_s1 + $0x630] sm:$0xff] }
  0xff   : > { %3104 = vmatpush1.bf16.msra.mxu1 %v8086_v4  ;;  %v8158_v4 = vcombine.low %v524_v55, %v528_v56  ;;  %v636_v7 = vld [vmem:[%s11266_s1 + $0x9d0] sm:$0xff]  ;;  %v8150_v15 = vcombine.low %v516_v1, %v520_v2  ;;  %v365_v55 = vld [vmem:[%s11266_s1 + $0x158] sm:$0xff] }
 0x100   : > { %3063 = vmatpush1.bf16.msra.mxu0 %v7958_v3  ;;  %3105 = vmatprep.subr.bf16.mxu1 %v8207_v6  ;;  %v8030_v3 = vcombine.low %v396_v53, %v400_v54  ;;  %v8151_v6 = vcombine.high %v516_v1, %v520_v2  ;;  %v640_v8 = vld [vmem:[%s11266_s1 + $0x9f0] sm:$0xff]  ;;  %v369_v56 = vld [vmem:[%s11266_s1 + $0x178] sm:$0xff] }
 0x101   : > { %3064 = vmatprep.subr.bf16.mxu0 %v8079_v5  ;;  %v8023_v5 = vcombine.high %v388_v63, %v392_v0  ;;  %v708_v10 = vld [vmem:[%s11266_s1 + $0xc10] sm:$0xff]  ;;  %v8271_v17 = vcombine.high %v636_v7, %v640_v8  ;;  %v8270_v28 = vcombine.low %v636_v7, %v640_v8  ;;  %v357_v1 = vld [vmem:[%s11266_s1 + $0x118] sm:$0xff] }
 0x102   : > { %v620_v36 = vld [vmem:[%s11266_s1 + $0x950] sm:$0xff]  ;;  %v361_v2 = vld [vmem:[%s11266_s1 + $0x138] sm:$0xff] }
 0x103   : > { %3106 = vmatpush2.bf16.msra.mxu1 %v8206_v12  ;;  %v624_v38 = vld [vmem:[%s11266_s1 + $0x970] sm:$0xff]  ;;  %v349_v8 = vld [vmem:[%s11266_s1 + $0xd8] sm:$0xff] }
 0x104   : > { %3065 = vmatpush2.bf16.msra.mxu0 %v8078_v11  ;;  %3107 = vmatprep.subr.bf16.mxu1 %v8199_v14  ;;  %v712_v11 = vld [vmem:[%s11266_s1 + $0xc30] sm:$0xff]  ;;  %v8254_v48 = vcombine.low %v620_v36, %v624_v38 }
 0x105   : > { %3066 = vmatprep.subr.bf16.mxu0 %v8071_v13  ;;  %v8022_v13 = vcombine.low %v388_v63, %v392_v0  ;;  %v8343_v20 = vcombine.high %v708_v10, %v712_v11  ;;  %v604_v53 = vld [vmem:[%s11266_s1 + $0x8d0] sm:$0xff] }
 0x106   : > { %v608_v54 = vld [vmem:[%s11266_s1 + $0x8f0] sm:$0xff] }
 0x107   : > { %3108 = vmatpush2.bf16.msra.mxu1 %v8198_v22  ;;  %v632_v22 = vld [vmem:[%s11266_s1 + $0x9b0] sm:$0xff] }
 0x108   : > { %3067 = vmatpush2.bf16.msra.mxu0 %v8070_v21  ;;  %3109 = vmatprep.subr.bf16.mxu1 %v8191_v24  ;;  %v628_v21 = vld [vmem:[%s11266_s1 + $0x990] sm:$0xff]  ;;  %v381_v24 = vld [vmem:[%s11266_s1 + $0x1d8] sm:$0xff] }
 0x109   : > { %3068 = vmatprep.subr.bf16.mxu0 %v8063_v23  ;;  %v8262_v40 = vcombine.low %v628_v21, %v632_v22  ;;  %v596_v63 = vld [vmem:[%s11266_s1 + $0x890] sm:$0xff] }
 0x10a   : > { %v600_v0 = vld [vmem:[%s11266_s1 + $0x8b0] sm:$0xff] }
 0x10b   : > { %3110 = vmatpush2.bf16.msra.mxu1 %v8190_v32  ;;  %v8263_v32 = vcombine.high %v628_v21, %v632_v22  ;;  %v592_v7 = vld [vmem:[%s11266_s1 + $0x870] sm:$0xff]  ;;  %v341_v22 = vld [vmem:[%s11266_s1 + $0x98] sm:$0xff] }
 0x10c   : > { %3069 = vmatpush2.bf16.msra.mxu0 %v8062_v30  ;;  %3111 = vmatprep.subr.bf16.mxu1 %v8183_v35  ;;  %v8342_v30 = vcombine.low %v708_v10, %v712_v11  ;;  %v8017_v35 = vcombine.high %v381_v24, %v385_v25  ;;  %v353_v10 = vld [vmem:[%s11266_s1 + $0xf8] sm:$0xff]  ;;  %v8230_v11 = vcombine.low %v596_v63, %v600_v0  ;;  %v584_v21 = vld [vmem:[%s11266_s1 + $0x830] sm:$0xff] }
 0x10d   : > { %3070 = vmatprep.subr.bf16.mxu0 %v8055_v34 }
 0x10f   : > { %3112 = vmatpush2.bf16.msra.mxu1 %v8182_v42 }
 0x110   : > { %3071 = vmatpush2.bf16.msra.mxu0 %v8054_v41  ;;  %3113 = vmatprep.subr.bf16.mxu1 %v8175_v44  ;;  %v8255_v41 = vcombine.high %v620_v36, %v624_v38  ;;  %v616_v44 = vld [vmem:[%s11266_s1 + $0x930] sm:$0xff] }
 0x111   : > { %3072 = vmatprep.subr.bf16.mxu0 %v8047_v43  ;;  %v612_v43 = vld [vmem:[%s11266_s1 + $0x910] sm:$0xff] }
 0x113   : > { %3114 = vmatpush2.bf16.msra.mxu1 %v8174_v50  ;;  %v8247_v50 = vcombine.high %v612_v43, %v616_v44 }
 0x114   : > { %3073 = vmatpush2.bf16.msra.mxu0 %v8046_v49  ;;  %3115 = vmatprep.subr.bf16.mxu1 %v8167_v52  ;;  %v8016_v49 = vcombine.low %v381_v24, %v385_v25  ;;  %v8009_v52 = vcombine.high %v373_v45, %v377_v46  ;;  %v7984_v25 = vcombine.low %v349_v8, %v353_v10 }
 0x115   : > { %3074 = vmatprep.subr.bf16.mxu0 %v8039_v51 }
 0x117   : > { %3116 = vmatpush2.bf16.msra.mxu1 %v8166_v60  ;;  %v8008_v60 = vcombine.low %v373_v45, %v377_v46  ;;  %v329_v45 = vld [vmem:[%s11266_s1 + $0x38] sm:$0xff] }
 0x118   : > { %3075 = vmatpush2.bf16.msra.mxu0 %v8038_v57  ;;  %3117 = vmatprep.subr.bf16.mxu1 %v8159_v62  ;;  %v8246_v57 = vcombine.low %v612_v43, %v616_v44  ;;  %v8001_v62 = vcombine.high %v365_v55, %v369_v56  ;;  %v696_v43 = vld [vmem:[%s11266_s1 + $0xbb0] sm:$0xff]  ;;  %v325_v44 = vld [vmem:[%s11266_s1 + $0x18] sm:$0xff] }
 0x119   : > { %3076 = vmatprep.subr.bf16.mxu0 %v8031_v61  ;;  %v8239_v61 = vcombine.high %v604_v53, %v608_v54 }
 0x11a   : > { %v10016_v12 = vpop.f32.mrf.mxu1 }
 0x11b   : > { %v10008_v9 = vpop.f32.mrf.mxu0  ;;  %3118 = vmatpush2.bf16.msra.mxu1 %v8158_v4  ;;  %v8000_v4 = vcombine.low %v365_v55, %v369_v56  ;;  %v7960_v55 = vcombine.low %v325_v44, %v329_v45 }
 0x11c   : > { %3077 = vmatpush2.bf16.msra.mxu0 %v8030_v3  ;;  %v10020_v18 = vpop.f32.mrf.mxu1  ;;  %3119 = vmatprep.subr.bf16.mxu1 %v8151_v6  ;;  %v8238_v3 = vcombine.low %v604_v53, %v608_v54  ;;  %v7993_v6 = vcombine.high %v357_v1, %v361_v2  ;;  %v449_v53 = vld [vmem:[%s11266_s1 + $0x3f8] sm:$0xff] }
 0x11d   : > { %v10018_v14 = vpop.f32.mrf.mxu0  ;;  %3078 = vmatprep.subr.bf16.mxu0 %v8023_v5  ;;  %v8231_v5 = vcombine.high %v596_v63, %v600_v0  ;;  %v437_v63 = vld [vmem:[%s11266_s1 + $0x398] sm:$0xff] }
 0x11e   : > { %v2799_v26 = vpop.f32.mrf.mxu1  ;;  %v441_v0 = vld [vmem:[%s11266_s1 + $0x3b8] sm:$0xff] }
 0x11f   : > { %v2758_v23 = vpop.f32.mrf.mxu0  ;;  %3120 = vmatpush2.bf16.msra.mxu1 %v8150_v15 }
 0x120   : > { %3079 = vmatpush2.bf16.msra.mxu0 %v8022_v13  ;;  %v2800_v34 = vpop.f32.mrf.mxu1  ;;  %3185 = vmatprep.subr.bf16.mxu1 %v8343_v20  ;;  %v7992_v13 = vcombine.low %v357_v1, %v361_v2  ;;  %v580_v20 = vld [vmem:[%s11266_s1 + $0x810] sm:$0xff]  ;;  %v345_v23 = vld [vmem:[%s11266_s1 + $0xb8] sm:$0xff] }
 0x121   : > { %v2759_v29 = vpop.f32.mrf.mxu0  ;;  %3130 = vmatprep.subr.bf16.mxu0 %v8271_v17  ;;  %v7985_v17 = vcombine.high %v349_v8, %v353_v10  ;;  %v8215_v26 = vcombine.high %v580_v20, %v584_v21  ;;  %v337_v34 = vld [vmem:[%s11266_s1 + $0x78] sm:$0xff]  ;;  %v7976_v36 = vcombine.low %v341_v22, %v345_v23 }
 0x122   : > { %3122 = vmatmul.mubr.bf16.vlgmr.msra.gmra.mxu1 %v9403_v19  ;;  %v10042_v39 = vpop.f32.mrf.mxu1  ;;  %v700_v29 = vld [vmem:[%s11266_s1 + $0xbd0] sm:$0xff]  ;;  %v433_v8 = vld [vmem:[%s11266_s1 + $0x378] sm:$0xff] }
 0x123   : > { %3081 = vmatmul.mubr.bf16.vlgmr.msra.gmra.mxu0 %v9395_v16  ;;  %3186 = vmatpush1.bf16.msra.mxu1 %v8342_v30  ;;  %v704_v30 = vld [vmem:[%s11266_s1 + $0xbf0] sm:$0xff] }
 0x124   : > { %3131 = vmatpush1.bf16.msra.mxu0 %v8270_v28  ;;  %v10044_v42 = vpop.f32.mrf.mxu1  ;;  %3203 = vmatprep.mubr.bf16.mxu1 %v9107_v31  ;;  %v7977_v28 = vcombine.high %v341_v22, %v345_v23  ;;  %v8335_v38 = vcombine.high %v700_v29, %v704_v30  ;;  %v8334_v46 = vcombine.low %v700_v29, %v704_v30  ;;  %v10181_v22 = vld [vmem:[%s9159_s28] sm:$0xff]  ;;  %v421_v23 = vld [vmem:[%s11266_s1 + $0x318] sm:$0xff] }
 0x125   : > { %3132 = vmatprep.subr.bf16.mxu0 %v8263_v32  ;;  %3212 = vmatprep.subr.bf16.mxu1 %v8017_v35  ;;  %v333_v32 = vld [vmem:[%s11266_s1 + $0x58] sm:$0xff]  ;;  %v8214_v35 = vcombine.low %v580_v20, %v584_v21  ;;  %v660_v20 = vld [vmem:[%s11266_s1 + $0xa90] sm:$0xff] }
 0x126   : > { %3162 = vmatprep.mubr.bf16.mxu0 %v9415_v27  ;;  %v2881_v47 = vpop.f32.mrf.mxu1  ;;  %v664_v21 = vld [vmem:[%s11266_s1 + $0xab0] sm:$0xff] }
 0x127   : > { %v7968_v47 = vcombine.low %v333_v32, %v337_v34  ;;  %v8295_v29 = vcombine.high %v660_v20, %v664_v21 }
 0x128   : > { %3133 = vmatpush1.bf16.msra.mxu0 %v8262_v40  ;;  %v2882_v51 = vpop.f32.mrf.mxu1  ;;  %v7969_v40 = vcombine.high %v333_v32, %v337_v34  ;;  %v652_v34 = vld [vmem:[%s11266_s1 + $0xa50] sm:$0xff] }
 0x129   : > { %3134 = vmatprep.subr.bf16.mxu0 %v8255_v41  ;;  %v692_v41 = vld [vmem:[%s11266_s1 + $0xb90] sm:$0xff] }
 0x12a   : > { %8348 = vmatmul.mubr.msk.bf16.vlgmr.msra.gmra.mxu1 %vm2716_vm0, %v9435_v37  ;;  %v688_v51 = vld [vmem:[%s11266_s1 + $0xb70] sm:$0xff]  ;;  %v8326_v54 = vcombine.low %v692_v41, %v696_v43 }
 0x12b   : > { %3213 = vmatpush1.bf16.msra.mxu1 %v8016_v49  ;;  %3244 = vmatprep.mubr.bf16.mxu1 %v9263_v58  ;;  %v588_v58 = vld [vmem:[%s11266_s1 + $0x850] sm:$0xff]  ;;  %v7961_v49 = vcombine.high %v325_v44, %v329_v45 }
 0x12c   : > { %3135 = vmatpush1.bf16.msra.mxu0 %v8254_v48  ;;  %3214 = vmatprep.subr.bf16.mxu1 %v8009_v52  ;;  %v8223_v15 = vcombine.high %v588_v58, %v592_v7  ;;  %v8222_v24 = vcombine.low %v588_v58, %v592_v7  ;;  %v8327_v48 = vcombine.high %v692_v41, %v696_v43  ;;  %v445_v52 = vld [vmem:[%s11266_s1 + $0x3d8] sm:$0xff]  ;;  %v672_v58 = vld [vmem:[%s11266_s1 + $0xaf0] sm:$0xff] }
 0x12d   : > { %3136 = vmatprep.subr.bf16.mxu0 %v8247_v50  ;;  %v684_v50 = vld [vmem:[%s11266_s1 + $0xb50] sm:$0xff]  ;;  %v8080_v2 = vcombine.low %v445_v52, %v449_v53  ;;  %v429_v7 = vld [vmem:[%s11266_s1 + $0x358] sm:$0xff]  ;;  %v8294_v41 = vcombine.low %v660_v20, %v664_v21 }
 0x12e   : > { %v8319_v56 = vcombine.high %v684_v50, %v688_v51  ;;  %v8318_v1 = vcombine.low %v684_v50, %v688_v51  ;;  %v409_v50 = vld [vmem:[%s11266_s1 + $0x2b8] sm:$0xff] }
 0x12f   : > { %3215 = vmatpush1.bf16.msra.mxu1 %v8008_v60  ;;  %v8081_v60 = vcombine.high %v445_v52, %v449_v53  ;;  %v493_v21 = vld [vmem:[%s11266_s1 + $0x558] sm:$0xff] }
 0x130   : > { %3137 = vmatpush1.bf16.msra.mxu0 %v8246_v57  ;;  %3216 = vmatprep.subr.bf16.mxu1 %v8001_v62  ;;  %v716_v57 = vlaneseq  ;;  %v680_v62 = vld [vmem:[%s11266_s1 + $0xb30] sm:$0xff] }
 0x131   : > { %3138 = vmatprep.subr.bf16.mxu0 %v8239_v61  ;;  %v676_v61 = vld [vmem:[%s11266_s1 + $0xb10] sm:$0xff] }
 0x132   : > { %v8310_v10 = vcombine.low %v676_v61, %v680_v62 }
 0x133   : > { %3217 = vmatpush1.bf16.msra.mxu1 %v8000_v4  ;;  %v10159_v4 = vshrl.u32 %v716_v57, 7  ;;  %v513_v57 = vld [vmem:[%s11266_s1 + $0x5f8] sm:$0xff] }
 0x134   : > { %3139 = vmatpush1.bf16.msra.mxu0 %v8238_v3  ;;  %3218 = vmatprep.subr.bf16.mxu1 %v7993_v6  ;;  %v8311_v3 = vcombine.high %v676_v61, %v680_v62  ;;  %v668_v6 = vld [vmem:[%s11266_s1 + $0xad0] sm:$0xff]  ;;  %v401_v61 = vld [vmem:[%s11266_s1 + $0x278] sm:$0xff] }
 0x135   : > { %3140 = vmatprep.subr.bf16.mxu0 %v8231_v5  ;;  %v8073_v5 = vcombine.high %v437_v63, %v441_v0 }
 0x137   : > { %3219 = vmatpush1.bf16.msra.mxu1 %v7992_v13  ;;  %v8303_v13 = vcombine.high %v668_v6, %v672_v58 }
 0x138   : > { %3141 = vmatpush1.bf16.msra.mxu0 %v8230_v11  ;;  %3220 = vmatprep.subr.bf16.mxu1 %v7985_v17  ;;  %v8072_v11 = vcombine.low %v437_v63, %v441_v0  ;;  %v8065_v17 = vcombine.high %v429_v7, %v433_v8 }
 0x139   : > { %3142 = vmatprep.subr.bf16.mxu0 %v8223_v15  ;;  %v718_v15 = vsub.s32 0, %v10159_v4 }
 0x13b   : > { %3221 = vmatpush1.bf16.msra.mxu1 %v7984_v25  ;;  %v722_v25 = vsub.s32 1, %v10159_v4  ;;  %v719_v30 = vrot.slane %v10181_v22, %v718_v15 }
 0x13c   : > { %3143 = vmatpush1.bf16.msra.mxu0 %v8222_v24  ;;  %3222 = vmatprep.subr.bf16.mxu1 %v7977_v28  ;;  %v425_v24 = vld [vmem:[%s11266_s1 + $0x338] sm:$0xff]  ;;  %v8064_v28 = vcombine.low %v429_v7, %v433_v8 }
 0x13d   : > { %3144 = vmatprep.subr.bf16.mxu0 %v8215_v26  ;;  %v8302_v26 = vcombine.low %v668_v6, %v672_v58  ;;  %v8057_v32 = vcombine.high %v421_v23, %v425_v24  ;;  %v8056_v43 = vcombine.low %v421_v23, %v425_v24  ;;  %v2755_v45 = vadd.f32 %v10008_v9, %v719_v30  ;;  %v501_v58 = vld [vmem:[%s11266_s1 + $0x598] sm:$0xff] }
 0x13e   : > { %v389_v8 = vld [vmem:[%s11266_s1 + $0x218] sm:$0xff] }
 0x13f   : > { %3223 = vmatpush1.bf16.msra.mxu1 %v7976_v36  ;;  %v413_v36 = vld [vmem:[%s11266_s1 + $0x2d8] sm:$0xff] }
 0x140   : > { %3145 = vmatpush1.bf16.msra.mxu0 %v8214_v35  ;;  %3224 = vmatprep.subr.bf16.mxu1 %v7969_v40  ;;  %v656_v35 = vld [vmem:[%s11266_s1 + $0xa70] sm:$0xff]  ;;  %v723_v40 = vrot.slane %v10181_v22, %v722_v25  ;;  %v497_v23 = vld [vmem:[%s11266_s1 + $0x578] sm:$0xff] }
 0x141   : > { %3146 = vmatprep.subr.bf16.mxu0 %v8335_v38  ;;  %v417_v38 = vld [vmem:[%s11266_s1 + $0x2f8] sm:$0xff]  ;;  %v8287_v44 = vcombine.high %v652_v34, %v656_v35  ;;  %v8286_v51 = vcombine.low %v652_v34, %v656_v35 }
 0x142   : > { %v2757_v9 = vadd.f32 %v10018_v14, %v723_v40  ;;  %v8048_v52 = vcombine.low %v413_v36, %v417_v38  ;;  %v397_v14 = vld [vmem:[%s11266_s1 + $0x258] sm:$0xff]  ;;  %v8128_v40 = vcombine.low %v493_v21, %v497_v23 }
 0x143   : > { %3225 = vmatpush1.bf16.msra.mxu1 %v7968_v47  ;;  %v644_v47 = vld [vmem:[%s11266_s1 + $0xa10] sm:$0xff]  ;;  %v8033_v6 = vcombine.high %v397_v14, %v401_v61  ;;  %v8032_v15 = vcombine.low %v397_v14, %v401_v61  ;;  %v641_v24 = vld [vmem:[%s11266_s1 + $0x9f8] sm:$0xff] }
 0x144   : > { %3147 = vmatpush2.bf16.msra.mxu0 %v8334_v46  ;;  %3226 = vmatprep.subr.bf16.mxu1 %v7961_v49  ;;  %v8049_v46 = vcombine.high %v413_v36, %v417_v38  ;;  %v405_v49 = vld [vmem:[%s11266_s1 + $0x298] sm:$0xff] }
 0x145   : > { %3148 = vmatprep.subr.bf16.mxu0 %v8327_v48  ;;  %v648_v48 = vld [vmem:[%s11266_s1 + $0xa30] sm:$0xff]  ;;  %v485_v34 = vld [vmem:[%s11266_s1 + $0x518] sm:$0xff] }
 0x146   : > { %v8279_v53 = vcombine.high %v644_v47, %v648_v48  ;;  %v8278_v63 = vcombine.low %v644_v47, %v648_v48  ;;  %v489_v35 = vld [vmem:[%s11266_s1 + $0x538] sm:$0xff] }
 0x147   : > { %3227 = vmatpush1.bf16.msra.mxu1 %v7960_v55  ;;  %v8041_v55 = vcombine.high %v405_v49, %v409_v50  ;;  %v633_v36 = vld [vmem:[%s11266_s1 + $0x9b8] sm:$0xff] }
 0x148   : > { %3149 = vmatpush2.bf16.msra.mxu0 %v8326_v54  ;;  %3228 = vmatprep.subr.bf16.mxu1 %v8081_v60  ;;  %v2796_v54 = vadd.f32 %v10016_v12, %v2755_v45  ;;  %v2798_v12 = vadd.f32 %v10020_v18, %v2757_v9  ;;  %v505_v18 = vld [vmem:[%s11266_s1 + $0x5b8] sm:$0xff] }
 0x149   : > { %3150 = vmatprep.subr.bf16.mxu0 %v8319_v56  ;;  %v509_v56 = vld [vmem:[%s11266_s1 + $0x5d8] sm:$0xff] }
 0x14a   : > { %v481_v47 = vld [vmem:[%s11266_s1 + $0x4f8] sm:$0xff] }
 0x14b   : > { %3229 = vmatpush2.bf16.msra.mxu1 %v8080_v2  ;;  %v8145_v2 = vcombine.high %v509_v56, %v513_v57  ;;  %v621_v48 = vld [vmem:[%s11266_s1 + $0x958] sm:$0xff] }
 0x14c   : > { %3151 = vmatpush2.bf16.msra.mxu0 %v8318_v1  ;;  %3230 = vmatprep.subr.bf16.mxu1 %v8073_v5  ;;  %v8040_v1 = vcombine.low %v405_v49, %v409_v50  ;;  %v625_v49 = vld [vmem:[%s11266_s1 + $0x978] sm:$0xff]  ;;  %v8120_v50 = vcombine.low %v485_v34, %v489_v35 }
 0x14d   : > { %3152 = vmatprep.subr.bf16.mxu0 %v8311_v3  ;;  %v465_v61 = vld [vmem:[%s11266_s1 + $0x478] sm:$0xff] }
 0x14f   : > { %3231 = vmatpush2.bf16.msra.mxu1 %v8072_v11  ;;  %v8144_v11 = vcombine.low %v509_v56, %v513_v57  ;;  %v8256_v57 = vcombine.low %v621_v48, %v625_v49 }
 0x150   : > { %3153 = vmatpush2.bf16.msra.mxu0 %v8310_v10  ;;  %3232 = vmatprep.subr.bf16.mxu1 %v8065_v17  ;;  %v8137_v17 = vcombine.high %v501_v58, %v505_v18 }
 0x151   : > { %3154 = vmatprep.subr.bf16.mxu0 %v8303_v13 }
 0x153   : > { %3233 = vmatpush2.bf16.msra.mxu1 %v8064_v28 }
 0x154   : > { %3155 = vmatpush2.bf16.msra.mxu0 %v8302_v26  ;;  %3234 = vmatprep.subr.bf16.mxu1 %v8057_v32  ;;  %v8136_v26 = vcombine.low %v501_v58, %v505_v18  ;;  %v601_v58 = vld [vmem:[%s11266_s1 + $0x8b8] sm:$0xff] }
 0x155   : > { %3156 = vmatprep.subr.bf16.mxu0 %v8295_v29  ;;  %v8129_v29 = vcombine.high %v493_v21, %v497_v23 }
 0x157   : > { %3235 = vmatpush2.bf16.msra.mxu1 %v8056_v43  ;;  %v8121_v43 = vcombine.high %v485_v34, %v489_v35 }
 0x158   : > { %3157 = vmatpush2.bf16.msra.mxu0 %v8294_v41  ;;  %3236 = vmatprep.subr.bf16.mxu1 %v8049_v46  ;;  %v477_v46 = vld [vmem:[%s11266_s1 + $0x4d8] sm:$0xff] }
 0x159   : > { %3158 = vmatprep.subr.bf16.mxu0 %v8287_v44  ;;  %v8112_v56 = vcombine.low %v477_v46, %v481_v47 }
 0x15b   : > { %v2836_v60 = vpop.f32.mrf.mxu0  ;;  %3237 = vmatpush2.bf16.msra.mxu1 %v8048_v52  ;;  %v8257_v52 = vcombine.high %v621_v48, %v625_v49  ;;  %v693_v48 = vld [vmem:[%s11266_s1 + $0xb98] sm:$0xff] }
 0x15c   : > { %v2837_v62 = vadd.f32 %v2836_v60, %v2796_v54  ;;  %3159 = vmatpush2.bf16.msra.mxu0 %v8286_v51  ;;  %3238 = vmatprep.subr.bf16.mxu1 %v8041_v55  ;;  %v8113_v51 = vcombine.high %v477_v46, %v481_v47  ;;  %v473_v54 = vld [vmem:[%s11266_s1 + $0x4b8] sm:$0xff] }
 0x15d   : > { %v2838_v0 = vpop.f32.mrf.mxu0  ;;  %3160 = vmatprep.subr.bf16.mxu0 %v8279_v53  ;;  %v469_v53 = vld [vmem:[%s11266_s1 + $0x498] sm:$0xff] }
 0x15e   : > { %v2878_v3 = vadd.f32 %v10042_v39, %v2837_v62  ;;  %v2839_v5 = vadd.f32 %v2838_v0, %v2798_v12  ;;  %v393_v39 = vld [vmem:[%s11266_s1 + $0x238] sm:$0xff]  ;;  %v8105_v60 = vcombine.high %v469_v53, %v473_v54 }
 0x15f   : > { %v2840_v7 = vpop.f32.mrf.mxu0  ;;  %3239 = vmatpush2.bf16.msra.mxu1 %v8040_v1  ;;  %v8025_v20 = vcombine.high %v389_v8, %v393_v39  ;;  %v8024_v28 = vcombine.low %v389_v8, %v393_v39  ;;  %v617_v55 = vld [vmem:[%s11266_s1 + $0x938] sm:$0xff] }
 0x160   : > { %3376 = vst [vmem:[#allocation2 + $0x30] sm:$0xff] %v2878_v3  ;;  %v2880_v10 = vadd.f32 %v10044_v42, %v2839_v5  ;;  %3161 = vmatpush2.bf16.msra.mxu0 %v8278_v63  ;;  %3240 = vmatprep.subr.bf16.mxu1 %v8033_v6  ;;  %v637_v42 = vld [vmem:[%s11266_s1 + $0x9d8] sm:$0xff]  ;;  %v8104_v63 = vcombine.low %v469_v53, %v473_v54 }
 0x161   : > { %v2841_v13 = vpop.f32.mrf.mxu0  ;;  %3253 = vmatprep.subr.bf16.mxu0 %v8145_v2  ;;  %v8273_v32 = vcombine.high %v637_v42, %v641_v24  ;;  %v8272_v41 = vcombine.low %v637_v42, %v641_v24  ;;  %v605_v12 = vld [vmem:[%s11266_s1 + $0x8d8] sm:$0xff] }
 0x162   : > { %3377 = vst [vmem:[#allocation2] sm:$0xff] %v2880_v10  ;;  %v10259_v25 = vpop.f32.mrf.mxu1  ;;  %v609_v62 = vld [vmem:[%s11266_s1 + $0x8f8] sm:$0xff] }
 0x163   : > { %3163 = vmatmul.mubr.bf16.vlgmr.msra.gmra.mxu0 %v9605_v33  ;;  %3241 = vmatpush2.bf16.msra.mxu1 %v8032_v15  ;;  %v8241_v2 = vcombine.high %v605_v12, %v609_v62  ;;  %v453_v3 = vld [vmem:[%s11266_s1 + $0x418] sm:$0xff]  ;;  %v8240_v7 = vcombine.low %v605_v12, %v609_v62 }
 0x164   : > { %3254 = vmatpush1.bf16.msra.mxu0 %v8144_v11  ;;  %3285 = vmatprep.mubr.bf16.mxu0 %v9265_v59  ;;  %v10262_v30 = vpop.f32.mrf.mxu1  ;;  %v629_v59 = vld [vmem:[%s11266_s1 + $0x998] sm:$0xff] }
 0x165   : > { %3255 = vmatprep.subr.bf16.mxu0 %v8137_v17  ;;  %3242 = vmatprep.subr.bf16.mxu1 %v8025_v20  ;;  %v8265_v45 = vcombine.high %v629_v59, %v633_v36  ;;  %v8264_v9 = vcombine.low %v629_v59, %v633_v36  ;;  %v457_v5 = vld [vmem:[%s11266_s1 + $0x438] sm:$0xff] }
 0x166   : > { %v2922_v38 = vpop.f32.mrf.mxu1  ;;  %v597_v6 = vld [vmem:[%s11266_s1 + $0x898] sm:$0xff]  ;;  %v8089_v8 = vcombine.high %v453_v3, %v457_v5  ;;  %v8088_v17 = vcombine.low %v453_v3, %v457_v5 }
 0x167   : > { %3243 = vmatpush2.bf16.msra.mxu1 %v8024_v28  ;;  %v8233_v39 = vcombine.high %v597_v6, %v601_v58  ;;  %v573_v10 = vld [vmem:[%s11266_s1 + $0x7d8] sm:$0xff]  ;;  %v8232_v20 = vcombine.low %v597_v6, %v601_v58 }
 0x168   : > { %3256 = vmatpush1.bf16.msra.mxu0 %v8136_v26  ;;  %v2923_v44 = vpop.f32.mrf.mxu1  ;;  %3294 = vmatprep.subr.bf16.mxu1 %v8273_v32  ;;  %v577_v11 = vld [vmem:[%s11266_s1 + $0x7f8] sm:$0xff] }
 0x169   : > { %3257 = vmatprep.subr.bf16.mxu0 %v8129_v29  ;;  %v589_v13 = vld [vmem:[%s11266_s1 + $0x858] sm:$0xff]  ;;  %v8209_v21 = vcombine.high %v573_v10, %v577_v11  ;;  %v8208_v29 = vcombine.low %v573_v10, %v577_v11 }
 0x16a   : > { %3245 = vmatmul.mubr.bf16.vlgmr.msra.gmra.mxu1 %v9395_v16  ;;  %v613_v16 = vld [vmem:[%s11266_s1 + $0x918] sm:$0xff] }
 0x16b   : > { %3295 = vmatpush1.bf16.msra.mxu1 %v8272_v41  ;;  %3326 = vmatprep.mubr.bf16.mxu1 %v9415_v27  ;;  %v8249_v14 = vcombine.high %v613_v16, %v617_v55  ;;  %v461_v27 = vld [vmem:[%s11266_s1 + $0x458] sm:$0xff]  ;;  %v8248_v0 = vcombine.low %v613_v16, %v617_v55 }
 0x16c   : > { %3258 = vmatpush1.bf16.msra.mxu0 %v8128_v40  ;;  %3296 = vmatprep.subr.bf16.mxu1 %v8265_v45  ;;  %v8097_v1 = vcombine.high %v461_v27, %v465_v61  ;;  %v8096_v18 = vcombine.low %v461_v27, %v465_v61  ;;  %v593_v15 = vld [vmem:[%s11266_s1 + $0x878] sm:$0xff] }
 0x16d   : > { %3259 = vmatprep.subr.bf16.mxu0 %v8121_v43  ;;  %v8225_v23 = vcombine.high %v589_v13, %v593_v15  ;;  %v565_v42 = vld [vmem:[%s11266_s1 + $0x798] sm:$0xff]  ;;  %v8224_v32 = vcombine.low %v589_v13, %v593_v15 }
 0x16e   : > { %v569_v24 = vld [vmem:[%s11266_s1 + $0x7b8] sm:$0xff] }
 0x16f   : > { %3297 = vmatpush1.bf16.msra.mxu1 %v8264_v9  ;;  %v581_v26 = vld [vmem:[%s11266_s1 + $0x818] sm:$0xff]  ;;  %v8201_v34 = vcombine.high %v565_v42, %v569_v24  ;;  %v8200_v41 = vcombine.low %v565_v42, %v569_v24 }
 0x170   : > { %3260 = vmatpush1.bf16.msra.mxu0 %v8120_v50  ;;  %3298 = vmatprep.subr.bf16.mxu1 %v8257_v52  ;;  %v585_v28 = vld [vmem:[%s11266_s1 + $0x838] sm:$0xff] }
 0x171   : > { %3261 = vmatprep.subr.bf16.mxu0 %v8113_v51  ;;  %v8217_v35 = vcombine.high %v581_v26, %v585_v28  ;;  %v557_v59 = vld [vmem:[%s11266_s1 + $0x758] sm:$0xff]  ;;  %v8216_v43 = vcombine.low %v581_v26, %v585_v28  ;;  %v730_v28 = vsub.s32 3, %v10159_v4 }
 0x172   : > { %v561_v36 = vld [vmem:[%s11266_s1 + $0x778] sm:$0xff] }
 0x173   : > { %3299 = vmatpush1.bf16.msra.mxu1 %v8256_v57  ;;  %v701_v38 = vld [vmem:[%s11266_s1 + $0xbd8] sm:$0xff]  ;;  %v8193_v44 = vcombine.high %v557_v59, %v561_v36  ;;  %v8192_v50 = vcombine.low %v557_v59, %v561_v36 }
 0x174   : > { %3262 = vmatpush1.bf16.msra.mxu0 %v8112_v56  ;;  %3300 = vmatprep.subr.bf16.mxu1 %v8249_v14  ;;  %v705_v40 = vld [vmem:[%s11266_s1 + $0xbf8] sm:$0xff] }
 0x175   : > { %3263 = vmatprep.subr.bf16.mxu0 %v8105_v60  ;;  %v8337_v45 = vcombine.high %v701_v38, %v705_v40  ;;  %v549_v46 = vld [vmem:[%s11266_s1 + $0x718] sm:$0xff]  ;;  %v8336_v9 = vcombine.low %v701_v38, %v705_v40 }
 0x176   : > { %v553_v47 = vld [vmem:[%s11266_s1 + $0x738] sm:$0xff] }
 0x177   : > { %3301 = vmatpush1.bf16.msra.mxu1 %v8248_v0  ;;  %v697_v49 = vld [vmem:[%s11266_s1 + $0xbb8] sm:$0xff]  ;;  %v8185_v51 = vcombine.high %v549_v46, %v553_v47  ;;  %v8184_v56 = vcombine.low %v549_v46, %v553_v47 }
 0x178   : > { %3264 = vmatpush1.bf16.msra.mxu0 %v8104_v63  ;;  %3302 = vmatprep.subr.bf16.mxu1 %v8241_v2  ;;  %v8329_v52 = vcombine.high %v693_v48, %v697_v49  ;;  %v541_v53 = vld [vmem:[%s11266_s1 + $0x6d8] sm:$0xff]  ;;  %v8328_v57 = vcombine.low %v693_v48, %v697_v49 }
 0x179   : > { %3265 = vmatprep.subr.bf16.mxu0 %v8097_v1  ;;  %v545_v54 = vld [vmem:[%s11266_s1 + $0x6f8] sm:$0xff] }
 0x17a   : > { %v685_v16 = vld [vmem:[%s11266_s1 + $0xb58] sm:$0xff]  ;;  %v8177_v60 = vcombine.high %v541_v53, %v545_v54  ;;  %v8176_v63 = vcombine.low %v541_v53, %v545_v54 }
 0x17b   : > { %3303 = vmatpush1.bf16.msra.mxu1 %v8240_v7  ;;  %v689_v55 = vld [vmem:[%s11266_s1 + $0xb78] sm:$0xff] }
 0x17c   : > { %3266 = vmatpush1.bf16.msra.mxu0 %v8096_v18  ;;  %3304 = vmatprep.subr.bf16.mxu1 %v8233_v39  ;;  %v8321_v14 = vcombine.high %v685_v16, %v689_v55  ;;  %v533_v27 = vld [vmem:[%s11266_s1 + $0x698] sm:$0xff]  ;;  %v8320_v0 = vcombine.low %v685_v16, %v689_v55 }
 0x17d   : > { %3267 = vmatprep.subr.bf16.mxu0 %v8089_v8  ;;  %v537_v61 = vld [vmem:[%s11266_s1 + $0x6b8] sm:$0xff] }
 0x17e   : > { %v677_v12 = vld [vmem:[%s11266_s1 + $0xb18] sm:$0xff]  ;;  %v8169_v1 = vcombine.high %v533_v27, %v537_v61  ;;  %v8168_v18 = vcombine.low %v533_v27, %v537_v61 }
 0x17f   : > { %3305 = vmatpush1.bf16.msra.mxu1 %v8232_v20  ;;  %v681_v62 = vld [vmem:[%s11266_s1 + $0xb38] sm:$0xff]  ;;  %v726_v20 = vsub.s32 2, %v10159_v4 }
 0x180   : > { %3268 = vmatpush1.bf16.msra.mxu0 %v8088_v17  ;;  %3306 = vmatprep.subr.bf16.mxu1 %v8225_v23  ;;  %v8313_v2 = vcombine.high %v677_v12, %v681_v62  ;;  %v525_v3 = vld [vmem:[%s11266_s1 + $0x658] sm:$0xff]  ;;  %v8312_v7 = vcombine.low %v677_v12, %v681_v62 }
 0x181   : > { %3269 = vmatprep.subr.bf16.mxu0 %v8209_v21  ;;  %v529_v5 = vld [vmem:[%s11266_s1 + $0x678] sm:$0xff]  ;;  %v727_v59 = vrot.slane %v10181_v22, %v726_v20 }
 0x182   : > { %v669_v6 = vld [vmem:[%s11266_s1 + $0xad8] sm:$0xff]  ;;  %v8161_v8 = vcombine.high %v525_v3, %v529_v5  ;;  %v8160_v17 = vcombine.low %v525_v3, %v529_v5 }
 0x183   : > { %3307 = vmatpush1.bf16.msra.mxu1 %v8224_v32  ;;  %v673_v58 = vld [vmem:[%s11266_s1 + $0xaf8] sm:$0xff]  ;;  %v2919_v48 = vadd.f32 %v10259_v25, %v727_v59  ;;  %v742_v59 = vsub.s32 6, %v10159_v4 }
 0x184   : > { %3270 = vmatpush2.bf16.msra.mxu0 %v8208_v29  ;;  %3308 = vmatprep.subr.bf16.mxu1 %v8217_v35  ;;  %v8305_v39 = vcombine.high %v669_v6, %v673_v58  ;;  %v517_v10 = vld [vmem:[%s11266_s1 + $0x618] sm:$0xff]  ;;  %v8304_v21 = vcombine.low %v669_v6, %v673_v58 }
 0x185   : > { %3271 = vmatprep.subr.bf16.mxu0 %v8201_v34  ;;  %v521_v11 = vld [vmem:[%s11266_s1 + $0x638] sm:$0xff] }
 0x186   : > { %v661_v13 = vld [vmem:[%s11266_s1 + $0xa98] sm:$0xff]  ;;  %v8153_v23 = vcombine.high %v517_v10, %v521_v11  ;;  %v8152_v35 = vcombine.low %v517_v10, %v521_v11 }
 0x187   : > { %3309 = vmatpush1.bf16.msra.mxu1 %v8216_v43  ;;  %v665_v15 = vld [vmem:[%s11266_s1 + $0xab8] sm:$0xff]  ;;  %v731_v43 = vrot.slane %v10181_v22, %v730_v28 }
 0x188   : > { %3272 = vmatpush2.bf16.msra.mxu0 %v8200_v41  ;;  %3310 = vmatprep.subr.bf16.mxu1 %v8337_v45  ;;  %v8297_v42 = vcombine.high %v661_v13, %v665_v15  ;;  %v709_v24 = vld [vmem:[%s11266_s1 + $0xc18] sm:$0xff]  ;;  %v8296_v38 = vcombine.low %v661_v13, %v665_v15 }
 0x189   : > { %3273 = vmatprep.subr.bf16.mxu0 %v8193_v44  ;;  %v713_v26 = vld [vmem:[%s11266_s1 + $0xc38] sm:$0xff] }
 0x18a   : > { %v653_v32 = vld [vmem:[%s11266_s1 + $0xa58] sm:$0xff]  ;;  %v8345_v40 = vcombine.high %v709_v24, %v713_v26  ;;  %v8344_v47 = vcombine.low %v709_v24, %v713_v26 }
 0x18b   : > { %3311 = vmatpush2.bf16.msra.mxu1 %v8336_v9  ;;  %v657_v34 = vld [vmem:[%s11266_s1 + $0xa78] sm:$0xff] }
 0x18c   : > { %3274 = vmatpush2.bf16.msra.mxu0 %v8192_v50  ;;  %3312 = vmatprep.subr.bf16.mxu1 %v8329_v52  ;;  %v8289_v41 = vcombine.high %v653_v32, %v657_v34  ;;  %v645_v45 = vld [vmem:[%s11266_s1 + $0xa18] sm:$0xff]  ;;  %v8288_v50 = vcombine.low %v653_v32, %v657_v34 }
 0x18d   : > { %3275 = vmatprep.subr.bf16.mxu0 %v8185_v51  ;;  %v649_v46 = vld [vmem:[%s11266_s1 + $0xa38] sm:$0xff]  ;;  %v2921_v51 = vadd.f32 %v10262_v30, %v731_v43 }
 0x18e   : > { %v8281_v9 = vcombine.high %v645_v45, %v649_v46 }
 0x18f   : > { %3313 = vmatpush2.bf16.msra.mxu1 %v8328_v57 }
 0x190   : > { %3276 = vmatpush2.bf16.msra.mxu0 %v8184_v56  ;;  %3314 = vmatprep.subr.bf16.mxu1 %v8321_v14  ;;  %v8280_v56 = vcombine.low %v645_v45, %v649_v46 }
 0x191   : > { %3277 = vmatprep.subr.bf16.mxu0 %v8177_v60 }
 0x193   : > { %3315 = vmatpush2.bf16.msra.mxu1 %v8320_v0 }
 0x194   : > { %3278 = vmatpush2.bf16.msra.mxu0 %v8176_v63  ;;  %3316 = vmatprep.subr.bf16.mxu1 %v8313_v2 }
 0x195   : > { %3279 = vmatprep.subr.bf16.mxu0 %v8169_v1 }
 0x197   : > { %3317 = vmatpush2.bf16.msra.mxu1 %v8312_v7 }
 0x198   : > { %3280 = vmatpush2.bf16.msra.mxu0 %v8168_v18  ;;  %3318 = vmatprep.subr.bf16.mxu1 %v8305_v39  ;;  %v738_v39 = vsub.s32 5, %v10159_v4 }
 0x199   : > { %3281 = vmatprep.subr.bf16.mxu0 %v8161_v8  ;;  %v734_v8 = vsub.s32 4, %v10159_v4 }
 0x19b   : > { %v2959_v29 = vpop.f32.mrf.mxu0  ;;  %3319 = vmatpush2.bf16.msra.mxu1 %v8304_v21 }
 0x19c   : > { %3282 = vmatpush2.bf16.msra.mxu0 %v8160_v17  ;;  %3320 = vmatprep.subr.bf16.mxu1 %v8297_v42  ;;  %v2960_v52 = vadd.f32 %v2959_v29, %v2919_v48 }
 0x19d   : > { %v2961_v36 = vpop.f32.mrf.mxu0  ;;  %3283 = vmatprep.subr.bf16.mxu0 %v8153_v23 }
 0x19e   : > { %v2962_v16 = vadd.f32 %v2961_v36, %v2921_v51  ;;  %v746_v36 = vsub.s32 7, %v10159_v4 }
 0x19f   : > { %v2963_v44 = vpop.f32.mrf.mxu0  ;;  %3321 = vmatpush2.bf16.msra.mxu1 %v8296_v38 }
 0x1a0   : > { %3284 = vmatpush2.bf16.msra.mxu0 %v8152_v35  ;;  %3322 = vmatprep.subr.bf16.mxu1 %v8289_v41  ;;  %v747_v43 = vrot.slane %v10181_v22, %v746_v36 }
 0x1a1   : > { %v2964_v49 = vpop.f32.mrf.mxu0  ;;  %3349 = vmatprep.subr.bf16.mxu0 %v8345_v40  ;;  %v743_v40 = vrot.slane %v10181_v22, %v742_v59 }
 0x1a2   : > { %v3000_v54 = vpop.f32.mrf.mxu1 }
 0x1a3   : > { %3286 = vmatmul.mubr.bf16.vlgmr.msra.gmra.mxu0 %v9403_v19  ;;  %v3041_v53 = vpop.f32.mrf.mxu0  ;;  %v3001_v55 = vadd.f32 %v3000_v54, %v2960_v52  ;;  %3323 = vmatpush2.bf16.msra.mxu1 %v8288_v50 }
 0x1a4   : > { %3350 = vmatpush1.bf16.msra.mxu0 %v8344_v47  ;;  %3367 = vmatprep.mubr.bf16.mxu0 %v9107_v31  ;;  %v3002_v57 = vpop.f32.mrf.mxu1 }
 0x1a5   : > { %v3043_v25 = vpop.f32.mrf.mxu0  ;;  %3324 = vmatprep.subr.bf16.mxu1 %v8281_v9  ;;  %v3042_v60 = vadd.f32 %v3041_v53, %v3001_v55  ;;  %v3003_v14 = vadd.f32 %v3002_v57, %v2962_v16 }
 0x1a6   : > { %v3004_v61 = vpop.f32.mrf.mxu1 }
 0x1a7   : > { %v3045_v27 = vpop.f32.mrf.mxu0  ;;  %3378 = vst [vmem:[#allocation2 + $0x18] sm:$0xff] %v3042_v60  ;;  %v3044_v30 = vadd.f32 %v3043_v25, %v3003_v14  ;;  %3325 = vmatpush2.bf16.msra.mxu1 %v8280_v56 }
 0x1a8   : > { %v3005_v12 = vpop.f32.mrf.mxu1 }
 0x1a9   : > { %v3046_v19 = vpop.f32.mrf.mxu0  ;;  %3379 = vst [vmem:[#allocation2 + $0x10] sm:$0xff] %v3044_v30 }
 0x1aa   : > { %3327 = vmatmul.mubr.bf16.vlgmr.msra.gmra.mxu1 %v9605_v33  ;;  %v739_v33 = vrot.slane %v10181_v22, %v738_v39 }
 0x1ab   : > { %8349 = vmatmul.mubr.msk.bf16.vlgmr.msra.gmra.mxu0 %vm2716_vm0, %v9435_v37  ;;  %v735_v37 = vrot.slane %v10181_v22, %v734_v8 }
 0x1e2   : > { %v3123_v62 = vpop.f32.mrf.mxu1 }
 0x1e3   : > { %v3082_v31 = vpop.f32.mrf.mxu0 }
 0x1e4   : > { %v3125_v0 = vpop.f32.mrf.mxu1  ;;  %v3083_v10 = vadd.f32 %v3082_v31, %v735_v37 }
 0x1e5   : > { %v3084_v63 = vpop.f32.mrf.mxu0 }
 0x1e6   : > { %v3127_v2 = vpop.f32.mrf.mxu1  ;;  %v3085_v11 = vadd.f32 %v3084_v63, %v739_v33  ;;  %v3124_v13 = vadd.f32 %v3123_v62, %v3083_v10 }
 0x1e7   : > { %v3086_v1 = vpop.f32.mrf.mxu0 }
 0x1e8   : > { %v3128_v5 = vpop.f32.mrf.mxu1  ;;  %v3126_v17 = vadd.f32 %v3125_v0, %v3085_v11 }
 0x1e9   : > { %v3087_v3 = vpop.f32.mrf.mxu0 }
 0x1ea   : > { %v3205_v6 = vpop.f32.mrf.mxu1 }
 0x1ec   : > { %v3207_v58 = vpop.f32.mrf.mxu1 }
 0x1ee   : > { %v3209_v18 = vpop.f32.mrf.mxu1 }
 0x1f0   : > { %v3210_v7 = vpop.f32.mrf.mxu1 }
 0x223   : > { %v3164_v15 = vpop.f32.mrf.mxu0 }
 0x224   : > { %v3165_v20 = vadd.f32 %v3164_v15, %v3124_v13 }
 0x225   : > { %v3166_v21 = vpop.f32.mrf.mxu0 }
 0x226   : > { %v3206_v23 = vadd.f32 %v3205_v6, %v3165_v20  ;;  %v3167_v42 = vadd.f32 %v3166_v21, %v3126_v17 }
 0x227   : > { %v3168_v24 = vpop.f32.mrf.mxu0 }
 0x228   : > { %3380 = vst [vmem:[#allocation2 + $0x8] sm:$0xff] %v3206_v23  ;;  %v3208_v26 = vadd.f32 %v3207_v58, %v3167_v42 }
 0x229   : > { %v3169_v28 = vpop.f32.mrf.mxu0 }
 0x22a   : > { %3381 = vst [vmem:[#allocation2 + $0x20] sm:$0xff] %v3208_v26  ;;  %v3246_v29 = vpop.f32.mrf.mxu1 }
 0x22b   : > { %v3247_v45 = vadd.f32 %v3246_v29, %v743_v40 }
 0x22c   : > { %v3248_v32 = vpop.f32.mrf.mxu1 }
 0x22d   : > { %v3249_v47 = vadd.f32 %v3248_v32, %v747_v43 }
 0x22e   : > { %v3250_v34 = vpop.f32.mrf.mxu1 }
 0x230   : > { %v3251_v35 = vpop.f32.mrf.mxu1 }
 0x263   : > { %v3287_v38 = vpop.f32.mrf.mxu0 }
 0x264   : > { %v3288_v48 = vadd.f32 %v3287_v38, %v3247_v45 }
 0x265   : > { %v3289_v41 = vpop.f32.mrf.mxu0 }
 0x266   : > { %v3290_v9 = vadd.f32 %v3289_v41, %v3249_v47 }
 0x267   : > { %v3291_v44 = vpop.f32.mrf.mxu0 }
 0x269   : > { %v3292_v46 = vpop.f32.mrf.mxu0 }
 0x26a   : > { %v3328_v50 = vpop.f32.mrf.mxu1 }
 0x26b   : > { %v3369_v49 = vpop.f32.mrf.mxu0  ;;  %v3329_v51 = vadd.f32 %v3328_v50, %v3288_v48 }
 0x26c   : > { %v3330_v53 = vpop.f32.mrf.mxu1 }
 0x26d   : > { %v3371_v52 = vpop.f32.mrf.mxu0  ;;  %v3370_v54 = vadd.f32 %v3369_v49, %v3329_v51  ;;  %v3331_v16 = vadd.f32 %v3330_v53, %v3290_v9 }
 0x26e   : > { %v3332_v55 = vpop.f32.mrf.mxu1 }
 0x26f   : > { %v3373_v4 = vpop.f32.mrf.mxu0  ;;  %3382 = vst [vmem:[#allocation2 + $0x28] sm:$0xff] %v3370_v54  ;;  %v3372_v25 = vadd.f32 %v3371_v52, %v3331_v16 }
 0x270   : > { %v3333_v57 = vpop.f32.mrf.mxu1 }
 0x271   : > { %v3374_v56 = vpop.f32.mrf.mxu0  ;;  %3383 = vst [vmem:[#allocation2 + $0x38] sm:$0xff] %v3372_v25 }
 0x272 PF: > { %p3384_p8 = scmp.gt.s32.totalorder %s9149_s22, 0  ;;  %p3385_p9 = scmp.lt.s32.totalorder %s9149_s22, 7 }
 0x274   : > { %p3386_p10 = pnand %p3385_p9, %p3384_p8 }
 0x276   : > { %3389 = sbr.rel (%p3386_p10) target bundleno = 1354 (0x54a), region = 52 }
 0x27b   : > { %v3462_v22 = vld [vmem:[%s9164_s8 + $0x1c0] sm:$0xff]  ;;  %v3393_v51 = vld [vmem:[#allocation2 + $0x10] sm:$0xff] }
 0x27c   : > { %v3466_v60 = vld [vmem:[%s9164_s8 + $0x1e0] sm:$0xff]  ;;  %v10493_v4 = vpack.c.bf16 %v3393_v51, %v3393_v51 }
 0x27d   : > { %v3590_v14 = vld [vmem:[%s9164_s8 + $0x5c0] sm:$0xff]  ;;  %v8407_v27 = vcombine.high %v3462_v22, %v3466_v60  ;;  %v8406_v30 = vcombine.low %v3462_v22, %v3466_v60 }
 0x27e   : > { %v3594_v61 = vld [vmem:[%s9164_s8 + $0x5e0] sm:$0xff]  ;;  %6593 = vmatprep.mubr.bf16.mxu1 %v10493_v4 }
 0x27f   : > { %v3454_v19 = vld [vmem:[%s9164_s8 + $0x180] sm:$0xff]  ;;  %v8535_v31 = vcombine.high %v3590_v14, %v3594_v61  ;;  %v8534_v62 = vcombine.low %v3590_v14, %v3594_v61  ;;  %6520 = vmatprep.subr.bf16.mxu0 %v8407_v27 }
 0x280   : > { %v3458_v12 = vld [vmem:[%s9164_s8 + $0x1a0] sm:$0xff]  ;;  %6521 = vmatpush1.bf16.msra.mxu0 %v8406_v30 }
 0x281   : > { %v8399_v63 = vcombine.high %v3454_v19, %v3458_v12  ;;  %v3582_v0 = vld [vmem:[%s9164_s8 + $0x580] sm:$0xff]  ;;  %6561 = vmatprep.subr.bf16.mxu1 %v8535_v31  ;;  %v8398_v18 = vcombine.low %v3454_v19, %v3458_v12 }
 0x282   : > { %v3586_v1 = vld [vmem:[%s9164_s8 + $0x5a0] sm:$0xff]  ;;  %6562 = vmatpush1.bf16.msra.mxu1 %v8534_v62 }
 0x283   : > { %v3446_v2 = vld [vmem:[%s9164_s8 + $0x140] sm:$0xff]  ;;  %v8527_v3 = vcombine.high %v3582_v0, %v3586_v1  ;;  %6522 = vmatprep.subr.bf16.mxu0 %v8399_v63  ;;  %v8526_v7 = vcombine.low %v3582_v0, %v3586_v1 }
 0x284   : > { %v3450_v5 = vld [vmem:[%s9164_s8 + $0x160] sm:$0xff]  ;;  %6523 = vmatpush1.bf16.msra.mxu0 %v8398_v18 }
 0x285   : > { %v3574_v6 = vld [vmem:[%s9164_s8 + $0x540] sm:$0xff]  ;;  %v8391_v8 = vcombine.high %v3446_v2, %v3450_v5  ;;  %6563 = vmatprep.subr.bf16.mxu1 %v8527_v3  ;;  %v8390_v13 = vcombine.low %v3446_v2, %v3450_v5 }
 0x286   : > { %v3578_v58 = vld [vmem:[%s9164_s8 + $0x560] sm:$0xff]  ;;  %6564 = vmatpush1.bf16.msra.mxu1 %v8526_v7 }
 0x287   : > { %v8519_v39 = vcombine.high %v3574_v6, %v3578_v58  ;;  %v3438_v37 = vld [vmem:[%s9164_s8 + $0x100] sm:$0xff]  ;;  %6524 = vmatprep.subr.bf16.mxu0 %v8391_v8  ;;  %v8518_v15 = vcombine.low %v3574_v6, %v3578_v58 }
 0x288   : > { %v3442_v33 = vld [vmem:[%s9164_s8 + $0x120] sm:$0xff]  ;;  %6525 = vmatpush1.bf16.msra.mxu0 %v8390_v13 }
 0x289   : > { %v3566_v10 = vld [vmem:[%s9164_s8 + $0x500] sm:$0xff]  ;;  %v8383_v17 = vcombine.high %v3438_v37, %v3442_v33  ;;  %6565 = vmatprep.subr.bf16.mxu1 %v8519_v39  ;;  %v8382_v26 = vcombine.low %v3438_v37, %v3442_v33 }
 0x28a   : > { %v3570_v11 = vld [vmem:[%s9164_s8 + $0x520] sm:$0xff]  ;;  %6566 = vmatpush1.bf16.msra.mxu1 %v8518_v15 }
 0x28b   : > { %v8511_v20 = vcombine.high %v3566_v10, %v3570_v11  ;;  %v3430_v21 = vld [vmem:[%s9164_s8 + $0xc0] sm:$0xff]  ;;  %6526 = vmatprep.subr.bf16.mxu0 %v8383_v17  ;;  %v8510_v28 = vcombine.low %v3566_v10, %v3570_v11 }
 0x28c   : > { %v3434_v23 = vld [vmem:[%s9164_s8 + $0xe0] sm:$0xff]  ;;  %6527 = vmatpush1.bf16.msra.mxu0 %v8382_v26 }
 0x28d   : > { %v3558_v42 = vld [vmem:[%s9164_s8 + $0x4c0] sm:$0xff]  ;;  %v8375_v29 = vcombine.high %v3430_v21, %v3434_v23  ;;  %6567 = vmatprep.subr.bf16.mxu1 %v8511_v20  ;;  %v8374_v38 = vcombine.low %v3430_v21, %v3434_v23 }
 0x28e   : > { %v3562_v24 = vld [vmem:[%s9164_s8 + $0x4e0] sm:$0xff]  ;;  %6568 = vmatpush1.bf16.msra.mxu1 %v8510_v28 }
 0x28f   : > { %v8503_v32 = vcombine.high %v3558_v42, %v3562_v24  ;;  %v3422_v34 = vld [vmem:[%s9164_s8 + $0x80] sm:$0xff]  ;;  %6528 = vmatprep.subr.bf16.mxu0 %v8375_v29  ;;  %v8502_v40 = vcombine.low %v3558_v42, %v3562_v24 }
 0x290   : > { %v3426_v35 = vld [vmem:[%s9164_s8 + $0xa0] sm:$0xff]  ;;  %6529 = vmatpush1.bf16.msra.mxu0 %v8374_v38 }
 0x291   : > { %v3550_v59 = vld [vmem:[%s9164_s8 + $0x480] sm:$0xff]  ;;  %v8367_v41 = vcombine.high %v3422_v34, %v3426_v35  ;;  %6569 = vmatprep.subr.bf16.mxu1 %v8503_v32  ;;  %v8366_v48 = vcombine.low %v3422_v34, %v3426_v35 }
 0x292   : > { %v3554_v36 = vld [vmem:[%s9164_s8 + $0x4a0] sm:$0xff]  ;;  %6570 = vmatpush1.bf16.msra.mxu1 %v8502_v40 }
 0x293   : > { %v8495_v43 = vcombine.high %v3550_v59, %v3554_v36  ;;  %v3414_v44 = vld [vmem:[%s9164_s8 + $0x40] sm:$0xff]  ;;  %6530 = vmatprep.subr.bf16.mxu0 %v8367_v41  ;;  %v8494_v49 = vcombine.low %v3550_v59, %v3554_v36 }
 0x294   : > { %v3418_v45 = vld [vmem:[%s9164_s8 + $0x60] sm:$0xff]  ;;  %6531 = vmatpush1.bf16.msra.mxu0 %v8366_v48 }
 0x295   : > { %v3542_v46 = vld [vmem:[%s9164_s8 + $0x440] sm:$0xff]  ;;  %v8359_v50 = vcombine.high %v3414_v44, %v3418_v45  ;;  %6571 = vmatprep.subr.bf16.mxu1 %v8495_v43  ;;  %v8358_v56 = vcombine.low %v3414_v44, %v3418_v45 }
 0x296   : > { %v3546_v47 = vld [vmem:[%s9164_s8 + $0x460] sm:$0xff]  ;;  %6572 = vmatpush1.bf16.msra.mxu1 %v8494_v49 }
 0x297   : > { %v3391_v9 = vld [vmem:[#allocation2] sm:$0xff]  ;;  %v8487_v52 = vcombine.high %v3542_v46, %v3546_v47  ;;  %6532 = vmatprep.subr.bf16.mxu0 %v8359_v50  ;;  %v8486_v57 = vcombine.low %v3542_v46, %v3546_v47 }
 0x298   : > { %v3406_v53 = vld [vmem:[%s9164_s8] sm:$0xff]  ;;  %v10491_v16 = vpack.c.bf16 %v3391_v9, %v3391_v9  ;;  %6533 = vmatpush1.bf16.msra.mxu0 %v8358_v56 }
 0x299   : > { %v3410_v54 = vld [vmem:[%s9164_s8 + $0x20] sm:$0xff]  ;;  %6573 = vmatprep.subr.bf16.mxu1 %v8487_v52 }
 0x29a   : > { %v3534_v55 = vld [vmem:[%s9164_s8 + $0x400] sm:$0xff]  ;;  %6552 = vmatprep.mubr.bf16.mxu0 %v10491_v16  ;;  %v8351_v22 = vcombine.high %v3406_v53, %v3410_v54  ;;  %v8350_v19 = vcombine.low %v3406_v53, %v3410_v54  ;;  %6574 = vmatpush1.bf16.msra.mxu1 %v8486_v57 }
 0x29b   : > { %v3538_v25 = vld [vmem:[%s9164_s8 + $0x420] sm:$0xff] }
 0x29c   : > { %v8479_v60 = vcombine.high %v3534_v55, %v3538_v25  ;;  %v3526_v14 = vld [vmem:[%s9164_s8 + $0x3c0] sm:$0xff]  ;;  %6534 = vmatprep.subr.bf16.mxu0 %v8351_v22  ;;  %v8478_v12 = vcombine.low %v3534_v55, %v3538_v25 }
 0x29d   : > { %v3530_v27 = vld [vmem:[%s9164_s8 + $0x3e0] sm:$0xff]  ;;  %6535 = vmatpush1.bf16.msra.mxu0 %v8350_v19 }
 0x29e   : > { %v3654_v61 = vld [vmem:[%s9164_s8 + $0x7c0] sm:$0xff]  ;;  %v8471_v31 = vcombine.high %v3526_v14, %v3530_v27  ;;  %6575 = vmatprep.subr.bf16.mxu1 %v8479_v60  ;;  %v8470_v3 = vcombine.low %v3526_v14, %v3530_v27 }
 0x29f   : > { %v3658_v30 = vld [vmem:[%s9164_s8 + $0x7e0] sm:$0xff]  ;;  %6576 = vmatpush1.bf16.msra.mxu1 %v8478_v12 }
 0x2a0   : > { %v8599_v62 = vcombine.high %v3654_v61, %v3658_v30  ;;  %v3518_v63 = vld [vmem:[%s9164_s8 + $0x380] sm:$0xff]  ;;  %6536 = vmatprep.subr.bf16.mxu0 %v8471_v31  ;;  %v8598_v5 = vcombine.low %v3654_v61, %v3658_v30 }
 0x2a1   : > { %v3522_v0 = vld [vmem:[%s9164_s8 + $0x3a0] sm:$0xff]  ;;  %6537 = vmatpush2.bf16.msra.mxu0 %v8470_v3 }
 0x2a2   : > { %v3646_v1 = vld [vmem:[%s9164_s8 + $0x780] sm:$0xff]  ;;  %v8463_v6 = vcombine.high %v3518_v63, %v3522_v0  ;;  %6577 = vmatprep.subr.bf16.mxu1 %v8599_v62  ;;  %v8462_v37 = vcombine.low %v3518_v63, %v3522_v0  ;;  %v3390_v62 = vld [vmem:[#allocation2 + $0x30] sm:$0xff]  ;;  %v3392_v0 = vld [vmem:[#allocation2 + $0x18] sm:$0xff] }
 0x2a3   : > { %v3650_v2 = vld [vmem:[%s9164_s8 + $0x7a0] sm:$0xff]  ;;  %6578 = vmatpush2.bf16.msra.mxu1 %v8598_v5 }
 0x2a4   : > { %v8591_v58 = vcombine.high %v3646_v1, %v3650_v2  ;;  %v3510_v18 = vld [vmem:[%s9164_s8 + $0x340] sm:$0xff]  ;;  %6538 = vmatprep.subr.bf16.mxu0 %v8463_v6  ;;  %v8590_v33 = vcombine.low %v3646_v1, %v3650_v2  ;;  %v10537_v6 = vpack.c.bf16 %v3390_v62, %v3390_v62 }
 0x2a5   : > { %v3514_v7 = vld [vmem:[%s9164_s8 + $0x360] sm:$0xff]  ;;  %6539 = vmatpush2.bf16.msra.mxu0 %v8462_v37  ;;  %v3397_v37 = vld [vmem:[#allocation2 + $0x38] sm:$0xff] }
 0x2a6   : > { %v3638_v8 = vld [vmem:[%s9164_s8 + $0x740] sm:$0xff]  ;;  %v8455_v10 = vcombine.high %v3510_v18, %v3514_v7  ;;  %6579 = vmatprep.subr.bf16.mxu1 %v8591_v58  ;;  %v8454_v21 = vcombine.low %v3510_v18, %v3514_v7 }
 0x2a7   : > { %v3642_v39 = vld [vmem:[%s9164_s8 + $0x760] sm:$0xff]  ;;  %6580 = vmatpush2.bf16.msra.mxu1 %v8590_v33 }
 0x2a8   : > { %v8583_v11 = vcombine.high %v3638_v8, %v3642_v39  ;;  %v3502_v13 = vld [vmem:[%s9164_s8 + $0x300] sm:$0xff]  ;;  %6540 = vmatprep.subr.bf16.mxu0 %v8455_v10  ;;  %v8582_v23 = vcombine.low %v3638_v8, %v3642_v39  ;;  %v10541_v8 = vpack.c.bf16 %v3392_v0, %v3392_v0 }
 0x2a9   : > { %v3506_v15 = vld [vmem:[%s9164_s8 + $0x320] sm:$0xff]  ;;  %6541 = vmatpush2.bf16.msra.mxu0 %v8454_v21 }
 0x2aa   : > { %v3630_v17 = vld [vmem:[%s9164_s8 + $0x700] sm:$0xff]  ;;  %v8447_v42 = vcombine.high %v3502_v13, %v3506_v15  ;;  %6581 = vmatprep.subr.bf16.mxu1 %v8583_v11  ;;  %v8446_v34 = vcombine.low %v3502_v13, %v3506_v15 }
 0x2ab   : > { %v3634_v20 = vld [vmem:[%s9164_s8 + $0x720] sm:$0xff]  ;;  %6582 = vmatpush2.bf16.msra.mxu1 %v8582_v23  ;;  %v10550_v23 = vpack.c.bf16 %v3397_v37, %v3397_v37 }
 0x2ac   : > { %v8575_v24 = vcombine.high %v3630_v17, %v3634_v20  ;;  %v3494_v26 = vld [vmem:[%s9164_s8 + $0x2c0] sm:$0xff]  ;;  %6542 = vmatprep.subr.bf16.mxu0 %v8447_v42  ;;  %v8574_v35 = vcombine.low %v3630_v17, %v3634_v20 }
 0x2ad   : > { %v3498_v28 = vld [vmem:[%s9164_s8 + $0x2e0] sm:$0xff]  ;;  %6543 = vmatpush2.bf16.msra.mxu0 %v8446_v34 }
 0x2ae   : > { %v3622_v29 = vld [vmem:[%s9164_s8 + $0x6c0] sm:$0xff]  ;;  %v8439_v59 = vcombine.high %v3494_v26, %v3498_v28  ;;  %6583 = vmatprep.subr.bf16.mxu1 %v8575_v24  ;;  %v8438_v44 = vcombine.low %v3494_v26, %v3498_v28 }
 0x2af   : > { %v3626_v32 = vld [vmem:[%s9164_s8 + $0x6e0] sm:$0xff]  ;;  %6584 = vmatpush2.bf16.msra.mxu1 %v8574_v35 }
 0x2b0   : > { %v8567_v36 = vcombine.high %v3622_v29, %v3626_v32  ;;  %v3486_v38 = vld [vmem:[%s9164_s8 + $0x280] sm:$0xff]  ;;  %6544 = vmatprep.subr.bf16.mxu0 %v8439_v59  ;;  %v8566_v45 = vcombine.low %v3622_v29, %v3626_v32 }
 0x2b1   : > { %v3490_v40 = vld [vmem:[%s9164_s8 + $0x2a0] sm:$0xff]  ;;  %6545 = vmatpush2.bf16.msra.mxu0 %v8438_v44 }
 0x2b2   : > { %v3614_v41 = vld [vmem:[%s9164_s8 + $0x680] sm:$0xff]  ;;  %v8431_v46 = vcombine.high %v3486_v38, %v3490_v40  ;;  %6585 = vmatprep.subr.bf16.mxu1 %v8567_v36  ;;  %v8430_v51 = vcombine.low %v3486_v38, %v3490_v40 }
 0x2b3   : > { %v3618_v43 = vld [vmem:[%s9164_s8 + $0x6a0] sm:$0xff]  ;;  %6586 = vmatpush2.bf16.msra.mxu1 %v8566_v45 }
 0x2b4   : > { %v8559_v47 = vcombine.high %v3614_v41, %v3618_v43  ;;  %v3478_v48 = vld [vmem:[%s9164_s8 + $0x240] sm:$0xff]  ;;  %6546 = vmatprep.subr.bf16.mxu0 %v8431_v46  ;;  %v8558_v52 = vcombine.low %v3614_v41, %v3618_v43 }
 0x2b5   : > { %v3482_v49 = vld [vmem:[%s9164_s8 + $0x260] sm:$0xff]  ;;  %6547 = vmatpush2.bf16.msra.mxu0 %v8430_v51 }
 0x2b6   : > { %v3606_v50 = vld [vmem:[%s9164_s8 + $0x640] sm:$0xff]  ;;  %v8423_v53 = vcombine.high %v3478_v48, %v3482_v49  ;;  %6587 = vmatprep.subr.bf16.mxu1 %v8559_v47  ;;  %v8422_v22 = vcombine.low %v3478_v48, %v3482_v49 }
 0x2b7   : > { %v3610_v9 = vld [vmem:[%s9164_s8 + $0x660] sm:$0xff]  ;;  %6588 = vmatpush2.bf16.msra.mxu1 %v8558_v52 }
 0x2b8   : > { %v8551_v54 = vcombine.high %v3606_v50, %v3610_v9  ;;  %v3470_v55 = vld [vmem:[%s9164_s8 + $0x200] sm:$0xff]  ;;  %6548 = vmatprep.subr.bf16.mxu0 %v8423_v53  ;;  %v8550_v60 = vcombine.low %v3606_v50, %v3610_v9 }
 0x2b9   : > { %v3474_v25 = vld [vmem:[%s9164_s8 + $0x220] sm:$0xff]  ;;  %6549 = vmatpush2.bf16.msra.mxu0 %v8422_v22 }
 0x2ba   : > { %v3598_v56 = vld [vmem:[%s9164_s8 + $0x600] sm:$0xff]  ;;  %v8415_v14 = vcombine.high %v3470_v55, %v3474_v25  ;;  %6589 = vmatprep.subr.bf16.mxu1 %v8551_v54  ;;  %v8414_v31 = vcombine.low %v3470_v55, %v3474_v25 }
 0x2bb   : > { %v3602_v57 = vld [vmem:[%s9164_s8 + $0x620] sm:$0xff]  ;;  %6590 = vmatpush2.bf16.msra.mxu1 %v8550_v60 }
 0x2bc   : > { %v8543_v27 = vcombine.high %v3598_v56, %v3602_v57  ;;  %v3718_v61 = vld [vmem:[%s9164_s8 + $0x9c0] sm:$0xff]  ;;  %6550 = vmatprep.subr.bf16.mxu0 %v8415_v14  ;;  %v8542_v63 = vcombine.low %v3598_v56, %v3602_v57 }
 0x2bd   : > { %v3722_v30 = vld [vmem:[%s9164_s8 + $0x9e0] sm:$0xff]  ;;  %6551 = vmatpush2.bf16.msra.mxu0 %v8414_v31 }
 0x2be   : > { %v3846_v19 = vld [vmem:[%s9164_s8 + $0xdc0] sm:$0xff]  ;;  %v8663_v1 = vcombine.high %v3718_v61, %v3722_v30  ;;  %6591 = vmatprep.subr.bf16.mxu1 %v8543_v27  ;;  %v8662_v39 = vcombine.low %v3718_v61, %v3722_v30 }
 0x2bf   : > { %v3850_v12 = vld [vmem:[%s9164_s8 + $0xde0] sm:$0xff]  ;;  %6592 = vmatpush2.bf16.msra.mxu1 %v8542_v63 }
 0x2c0   : > { %v8791_v2 = vcombine.high %v3846_v19, %v3850_v12  ;;  %v3710_v3 = vld [vmem:[%s9164_s8 + $0x980] sm:$0xff]  ;;  %6602 = vmatprep.subr.bf16.mxu0 %v8663_v1  ;;  %v8790_v33 = vcombine.low %v3846_v19, %v3850_v12  ;;  %6553 = vmatmul.mubr.bf16.vlgmr.msra.gmra.mxu0 %v10537_v6 }
 0x2c1   : > { %v3714_v5 = vld [vmem:[%s9164_s8 + $0x9a0] sm:$0xff]  ;;  %6603 = vmatpush1.bf16.msra.mxu0 %v8662_v39 }
 0x2c2   : > { %v3838_v58 = vld [vmem:[%s9164_s8 + $0xd80] sm:$0xff]  ;;  %v8655_v10 = vcombine.high %v3710_v3, %v3714_v5  ;;  %6643 = vmatprep.subr.bf16.mxu1 %v8791_v2  ;;  %6594 = vmatmul.mubr.bf16.vlgmr.msra.gmra.mxu1 %v10541_v8  ;;  %v8654_v42 = vcombine.low %v3710_v3, %v3714_v5 }
 0x2c3   : > { %v3842_v18 = vld [vmem:[%s9164_s8 + $0xda0] sm:$0xff]  ;;  %6644 = vmatpush1.bf16.msra.mxu1 %v8790_v33  ;;  %6675 = vmatprep.mubr.bf16.mxu1 %v10550_v23 }
 0x2c4   : > { %v3395_v7 = vld [vmem:[#allocation2 + $0x20] sm:$0xff]  ;;  %v8783_v11 = vcombine.high %v3838_v58, %v3842_v18  ;;  %6604 = vmatprep.subr.bf16.mxu0 %v8655_v10  ;;  %v8782_v24 = vcombine.low %v3838_v58, %v3842_v18 }
 0x2c5   : > { %v3702_v13 = vld [vmem:[%s9164_s8 + $0x940] sm:$0xff]  ;;  %v10545_v17 = vpack.c.bf16 %v3395_v7, %v3395_v7  ;;  %6605 = vmatpush1.bf16.msra.mxu0 %v8654_v42 }
 0x2c6   : > { %v3706_v15 = vld [vmem:[%s9164_s8 + $0x960] sm:$0xff]  ;;  %6645 = vmatprep.subr.bf16.mxu1 %v8783_v11 }
 0x2c7   : > { %v3830_v20 = vld [vmem:[%s9164_s8 + $0xd40] sm:$0xff]  ;;  %v8647_v26 = vcombine.high %v3702_v13, %v3706_v15  ;;  %6634 = vmatprep.mubr.bf16.mxu0 %v10545_v17  ;;  %v8646_v59 = vcombine.low %v3702_v13, %v3706_v15  ;;  %6646 = vmatpush1.bf16.msra.mxu1 %v8782_v24 }
 0x2c8   : > { %v3834_v21 = vld [vmem:[%s9164_s8 + $0xd60] sm:$0xff] }
 0x2c9   : > { %v8775_v28 = vcombine.high %v3830_v20, %v3834_v21  ;;  %v3694_v29 = vld [vmem:[%s9164_s8 + $0x900] sm:$0xff]  ;;  %6606 = vmatprep.subr.bf16.mxu0 %v8647_v26  ;;  %v8774_v36 = vcombine.low %v3830_v20, %v3834_v21 }
 0x2ca   : > { %v3698_v32 = vld [vmem:[%s9164_s8 + $0x920] sm:$0xff]  ;;  %6607 = vmatpush1.bf16.msra.mxu0 %v8646_v59 }
 0x2cb   : > { %v3822_v34 = vld [vmem:[%s9164_s8 + $0xd00] sm:$0xff]  ;;  %v8639_v38 = vcombine.high %v3694_v29, %v3698_v32  ;;  %6647 = vmatprep.subr.bf16.mxu1 %v8775_v28  ;;  %v8638_v46 = vcombine.low %v3694_v29, %v3698_v32 }
 0x2cc   : > { %v3826_v35 = vld [vmem:[%s9164_s8 + $0xd20] sm:$0xff]  ;;  %6648 = vmatpush1.bf16.msra.mxu1 %v8774_v36 }
 0x2cd   : > { %v8767_v40 = vcombine.high %v3822_v34, %v3826_v35  ;;  %v3686_v41 = vld [vmem:[%s9164_s8 + $0x8c0] sm:$0xff]  ;;  %6608 = vmatprep.subr.bf16.mxu0 %v8639_v38  ;;  %v8766_v47 = vcombine.low %v3822_v34, %v3826_v35 }
 0x2ce   : > { %v3690_v43 = vld [vmem:[%s9164_s8 + $0x8e0] sm:$0xff]  ;;  %6609 = vmatpush1.bf16.msra.mxu0 %v8638_v46 }
 0x2cf   : > { %v3814_v44 = vld [vmem:[%s9164_s8 + $0xcc0] sm:$0xff]  ;;  %v8631_v48 = vcombine.high %v3686_v41, %v3690_v43  ;;  %6649 = vmatprep.subr.bf16.mxu1 %v8767_v40  ;;  %v8630_v53 = vcombine.low %v3686_v41, %v3690_v43 }
 0x2d0   : > { %v3818_v45 = vld [vmem:[%s9164_s8 + $0xce0] sm:$0xff]  ;;  %6650 = vmatpush1.bf16.msra.mxu1 %v8766_v47 }
 0x2d1   : > { %v8759_v49 = vcombine.high %v3814_v44, %v3818_v45  ;;  %v3678_v50 = vld [vmem:[%s9164_s8 + $0x880] sm:$0xff]  ;;  %6610 = vmatprep.subr.bf16.mxu0 %v8631_v48  ;;  %v8758_v54 = vcombine.low %v3814_v44, %v3818_v45 }
 0x2d2   : > { %v3682_v9 = vld [vmem:[%s9164_s8 + $0x8a0] sm:$0xff]  ;;  %6611 = vmatpush1.bf16.msra.mxu0 %v8630_v53 }
 0x2d3   : > { %v3806_v51 = vld [vmem:[%s9164_s8 + $0xc80] sm:$0xff]  ;;  %v8623_v55 = vcombine.high %v3678_v50, %v3682_v9  ;;  %6651 = vmatprep.subr.bf16.mxu1 %v8759_v49  ;;  %v8622_v14 = vcombine.low %v3678_v50, %v3682_v9 }
 0x2d4   : > { %v3810_v52 = vld [vmem:[%s9164_s8 + $0xca0] sm:$0xff]  ;;  %6652 = vmatpush1.bf16.msra.mxu1 %v8758_v54 }
 0x2d5   : > { %v8751_v25 = vcombine.high %v3806_v51, %v3810_v52  ;;  %v3670_v56 = vld [vmem:[%s9164_s8 + $0x840] sm:$0xff]  ;;  %6612 = vmatprep.subr.bf16.mxu0 %v8623_v55  ;;  %v8750_v27 = vcombine.low %v3806_v51, %v3810_v52 }
 0x2d6   : > { %v3674_v57 = vld [vmem:[%s9164_s8 + $0x860] sm:$0xff]  ;;  %6613 = vmatpush1.bf16.msra.mxu0 %v8622_v14 }
 0x2d7   : > { %v3798_v22 = vld [vmem:[%s9164_s8 + $0xc40] sm:$0xff]  ;;  %v8615_v61 = vcombine.high %v3670_v56, %v3674_v57  ;;  %6653 = vmatprep.subr.bf16.mxu1 %v8751_v25  ;;  %v8614_v63 = vcombine.low %v3670_v56, %v3674_v57 }
 0x2d8   : > { %v3802_v60 = vld [vmem:[%s9164_s8 + $0xc60] sm:$0xff]  ;;  %6654 = vmatpush1.bf16.msra.mxu1 %v8750_v27 }
 0x2d9   : > { %v8743_v30 = vcombine.high %v3798_v22, %v3802_v60  ;;  %v3662_v19 = vld [vmem:[%s9164_s8 + $0x800] sm:$0xff]  ;;  %6614 = vmatprep.subr.bf16.mxu0 %v8615_v61  ;;  %v8742_v0 = vcombine.low %v3798_v22, %v3802_v60 }
 0x2da   : > { %v3666_v12 = vld [vmem:[%s9164_s8 + $0x820] sm:$0xff]  ;;  %6615 = vmatpush1.bf16.msra.mxu0 %v8614_v63 }
 0x2db   : > { %v3790_v31 = vld [vmem:[%s9164_s8 + $0xc00] sm:$0xff]  ;;  %v8607_v1 = vcombine.high %v3662_v19, %v3666_v12  ;;  %6655 = vmatprep.subr.bf16.mxu1 %v8743_v30  ;;  %v8606_v7 = vcombine.low %v3662_v19, %v3666_v12 }
 0x2dc   : > { %v3794_v62 = vld [vmem:[%s9164_s8 + $0xc20] sm:$0xff]  ;;  %6656 = vmatpush1.bf16.msra.mxu1 %v8742_v0 }
 0x2dd   : > { %v8735_v2 = vcombine.high %v3790_v31, %v3794_v62  ;;  %v3782_v3 = vld [vmem:[%s9164_s8 + $0xbc0] sm:$0xff]  ;;  %6616 = vmatprep.subr.bf16.mxu0 %v8607_v1  ;;  %v8734_v39 = vcombine.low %v3790_v31, %v3794_v62 }
 0x2de   : > { %v3786_v5 = vld [vmem:[%s9164_s8 + $0xbe0] sm:$0xff]  ;;  %6617 = vmatpush1.bf16.msra.mxu0 %v8606_v7 }
 0x2df   : > { %v3910_v58 = vld [vmem:[%s9164_s8 + $0xfc0] sm:$0xff]  ;;  %v8727_v37 = vcombine.high %v3782_v3, %v3786_v5  ;;  %6657 = vmatprep.subr.bf16.mxu1 %v8735_v2  ;;  %v8726_v20 = vcombine.low %v3782_v3, %v3786_v5 }
 0x2e0   : > { %v3914_v18 = vld [vmem:[%s9164_s8 + $0xfe0] sm:$0xff]  ;;  %6658 = vmatpush1.bf16.msra.mxu1 %v8734_v39 }
 0x2e1   : > { %v8855_v33 = vcombine.high %v3910_v58, %v3914_v18  ;;  %v3774_v10 = vld [vmem:[%s9164_s8 + $0xb80] sm:$0xff]  ;;  %6618 = vmatprep.subr.bf16.mxu0 %v8727_v37  ;;  %v8854_v21 = vcombine.low %v3910_v58, %v3914_v18  ;;  %v3463_v37 = vld [vmem:[%s9164_s8 + $0x1c8] sm:$0xff] }
 0x2e2   : > { %v3778_v11 = vld [vmem:[%s9164_s8 + $0xba0] sm:$0xff]  ;;  %6619 = vmatpush2.bf16.msra.mxu0 %v8726_v20 }
 0x2e3   : > { %v3902_v13 = vld [vmem:[%s9164_s8 + $0xf80] sm:$0xff]  ;;  %v8719_v42 = vcombine.high %v3774_v10, %v3778_v11  ;;  %6659 = vmatprep.subr.bf16.mxu1 %v8855_v33  ;;  %v8718_v34 = vcombine.low %v3774_v10, %v3778_v11  ;;  %v3467_v33 = vld [vmem:[%s9164_s8 + $0x1e8] sm:$0xff] }
 0x2e4   : > { %v3906_v15 = vld [vmem:[%s9164_s8 + $0xfa0] sm:$0xff]  ;;  %6660 = vmatpush2.bf16.msra.mxu1 %v8854_v21  ;;  %v3591_v10 = vld [vmem:[%s9164_s8 + $0x5c8] sm:$0xff] }
 0x2e5   : > { %v8847_v24 = vcombine.high %v3902_v13, %v3906_v15  ;;  %v3766_v26 = vld [vmem:[%s9164_s8 + $0xb40] sm:$0xff]  ;;  %6620 = vmatprep.subr.bf16.mxu0 %v8719_v42  ;;  %v8846_v35 = vcombine.low %v3902_v13, %v3906_v15  ;;  %v3595_v11 = vld [vmem:[%s9164_s8 + $0x5e8] sm:$0xff]  ;;  %v8409_v42 = vcombine.high %v3463_v37, %v3467_v33 }
 0x2e6   : > { %v3770_v28 = vld [vmem:[%s9164_s8 + $0xb60] sm:$0xff]  ;;  %6621 = vmatpush2.bf16.msra.mxu0 %v8718_v34  ;;  %v3394_v15 = vld [vmem:[#allocation2 + $0x8] sm:$0xff] }
 0x2e7   : > { %v3894_v29 = vld [vmem:[%s9164_s8 + $0xf40] sm:$0xff]  ;;  %v8711_v59 = vcombine.high %v3766_v26, %v3770_v28  ;;  %6661 = vmatprep.subr.bf16.mxu1 %v8847_v24  ;;  %v8710_v44 = vcombine.low %v3766_v26, %v3770_v28  ;;  %v3396_v21 = vld [vmem:[#allocation2 + $0x28] sm:$0xff]  ;;  %v8537_v24 = vcombine.high %v3591_v10, %v3595_v11 }
 0x2e8   : > { %v3898_v32 = vld [vmem:[%s9164_s8 + $0xf60] sm:$0xff]  ;;  %6662 = vmatpush2.bf16.msra.mxu1 %v8846_v35  ;;  %v3455_v26 = vld [vmem:[%s9164_s8 + $0x188] sm:$0xff]  ;;  %v10617_v35 = vpack.c.bf16 %v3396_v21, %v3396_v21 }
 0x2e9   : > { %v8839_v36 = vcombine.high %v3894_v29, %v3898_v32  ;;  %v3758_v38 = vld [vmem:[%s9164_s8 + $0xb00] sm:$0xff]  ;;  %6622 = vmatprep.subr.bf16.mxu0 %v8711_v59  ;;  %v8838_v45 = vcombine.low %v3894_v29, %v3898_v32  ;;  %v3459_v28 = vld [vmem:[%s9164_s8 + $0x1a8] sm:$0xff]  ;;  %v10613_v29 = vpack.c.bf16 %v3394_v15, %v3394_v15  ;;  %v8408_v59 = vcombine.low %v3463_v37, %v3467_v33 }
 0x2ea   : > { %v3762_v40 = vld [vmem:[%s9164_s8 + $0xb20] sm:$0xff]  ;;  %6623 = vmatpush2.bf16.msra.mxu0 %v8710_v44  ;;  %v3583_v32 = vld [vmem:[%s9164_s8 + $0x588] sm:$0xff] }
 0x2eb   : > { %v3886_v41 = vld [vmem:[%s9164_s8 + $0xf00] sm:$0xff]  ;;  %v8703_v46 = vcombine.high %v3758_v38, %v3762_v40  ;;  %6663 = vmatprep.subr.bf16.mxu1 %v8839_v36  ;;  %v8702_v51 = vcombine.low %v3758_v38, %v3762_v40  ;;  %v3587_v34 = vld [vmem:[%s9164_s8 + $0x5a8] sm:$0xff]  ;;  %v8536_v36 = vcombine.low %v3591_v10, %v3595_v11  ;;  %v8401_v38 = vcombine.high %v3455_v26, %v3459_v28 }
 0x2ec   : > { %v3890_v43 = vld [vmem:[%s9164_s8 + $0xf20] sm:$0xff]  ;;  %6664 = vmatpush2.bf16.msra.mxu1 %v8838_v45  ;;  %v8529_v40 = vcombine.high %v3583_v32, %v3587_v34  ;;  %v3575_v44 = vld [vmem:[%s9164_s8 + $0x548] sm:$0xff] }
 0x2ed   : > { %v8831_v47 = vcombine.high %v3886_v41, %v3890_v43  ;;  %v3750_v48 = vld [vmem:[%s9164_s8 + $0xac0] sm:$0xff]  ;;  %6624 = vmatprep.subr.bf16.mxu0 %v8703_v46  ;;  %v8830_v52 = vcombine.low %v3886_v41, %v3890_v43  ;;  %v3447_v41 = vld [vmem:[%s9164_s8 + $0x148] sm:$0xff]  ;;  %v8400_v46 = vcombine.low %v3455_v26, %v3459_v28 }
 0x2ee   : > { %v3754_v49 = vld [vmem:[%s9164_s8 + $0xae0] sm:$0xff]  ;;  %6625 = vmatpush2.bf16.msra.mxu0 %v8702_v51  ;;  %v3451_v43 = vld [vmem:[%s9164_s8 + $0x168] sm:$0xff] }
 0x2ef   : > { %v3878_v50 = vld [vmem:[%s9164_s8 + $0xec0] sm:$0xff]  ;;  %v8695_v53 = vcombine.high %v3750_v48, %v3754_v49  ;;  %6665 = vmatprep.subr.bf16.mxu1 %v8831_v47  ;;  %v8694_v22 = vcombine.low %v3750_v48, %v3754_v49  ;;  %v3579_v45 = vld [vmem:[%s9164_s8 + $0x568] sm:$0xff]  ;;  %v8528_v47 = vcombine.low %v3583_v32, %v3587_v34  ;;  %v8393_v48 = vcombine.high %v3447_v41, %v3451_v43 }
 0x2f0   : > { %v3882_v9 = vld [vmem:[%s9164_s8 + $0xee0] sm:$0xff]  ;;  %6666 = vmatpush2.bf16.msra.mxu1 %v8830_v52  ;;  %v8521_v49 = vcombine.high %v3575_v44, %v3579_v45  ;;  %v3567_v51 = vld [vmem:[%s9164_s8 + $0x508] sm:$0xff] }
 0x2f1   : > { %v8823_v54 = vcombine.high %v3878_v50, %v3882_v9  ;;  %v3742_v55 = vld [vmem:[%s9164_s8 + $0xa80] sm:$0xff]  ;;  %6626 = vmatprep.subr.bf16.mxu0 %v8695_v53  ;;  %v8822_v60 = vcombine.low %v3878_v50, %v3882_v9  ;;  %v3439_v50 = vld [vmem:[%s9164_s8 + $0x108] sm:$0xff]  ;;  %v8392_v53 = vcombine.low %v3447_v41, %v3451_v43 }
 0x2f2   : > { %v3746_v25 = vld [vmem:[%s9164_s8 + $0xaa0] sm:$0xff]  ;;  %6627 = vmatpush2.bf16.msra.mxu0 %v8694_v22  ;;  %v3443_v9 = vld [vmem:[%s9164_s8 + $0x128] sm:$0xff] }
 0x2f3   : > { %v3870_v56 = vld [vmem:[%s9164_s8 + $0xe80] sm:$0xff]  ;;  %v8687_v14 = vcombine.high %v3742_v55, %v3746_v25  ;;  %6667 = vmatprep.subr.bf16.mxu1 %v8823_v54  ;;  %v8686_v31 = vcombine.low %v3742_v55, %v3746_v25  ;;  %v3571_v52 = vld [vmem:[%s9164_s8 + $0x528] sm:$0xff]  ;;  %v8520_v54 = vcombine.low %v3575_v44, %v3579_v45  ;;  %v8385_v55 = vcombine.high %v3439_v50, %v3443_v9 }
 0x2f4   : > { %v3874_v57 = vld [vmem:[%s9164_s8 + $0xea0] sm:$0xff]  ;;  %6668 = vmatpush2.bf16.msra.mxu1 %v8822_v60  ;;  %v8513_v25 = vcombine.high %v3567_v51, %v3571_v52  ;;  %v3559_v22 = vld [vmem:[%s9164_s8 + $0x4c8] sm:$0xff] }
 0x2f5   : > { %v8815_v27 = vcombine.high %v3870_v56, %v3874_v57  ;;  %v3734_v61 = vld [vmem:[%s9164_s8 + $0xa40] sm:$0xff]  ;;  %6628 = vmatprep.subr.bf16.mxu0 %v8687_v14  ;;  %v8814_v62 = vcombine.low %v3870_v56, %v3874_v57  ;;  %v3431_v56 = vld [vmem:[%s9164_s8 + $0xc8] sm:$0xff]  ;;  %v8384_v14 = vcombine.low %v3439_v50, %v3443_v9 }
 0x2f6   : > { %v3738_v30 = vld [vmem:[%s9164_s8 + $0xa60] sm:$0xff]  ;;  %6629 = vmatpush2.bf16.msra.mxu0 %v8686_v31  ;;  %v3435_v57 = vld [vmem:[%s9164_s8 + $0xe8] sm:$0xff] }
 0x2f7   : > { %v3862_v19 = vld [vmem:[%s9164_s8 + $0xe40] sm:$0xff]  ;;  %v8679_v63 = vcombine.high %v3734_v61, %v3738_v30  ;;  %6669 = vmatprep.subr.bf16.mxu1 %v8815_v27  ;;  %v8678_v58 = vcombine.low %v3734_v61, %v3738_v30  ;;  %v3563_v60 = vld [vmem:[%s9164_s8 + $0x4e8] sm:$0xff]  ;;  %v8512_v27 = vcombine.low %v3567_v51, %v3571_v52  ;;  %v8377_v61 = vcombine.high %v3431_v56, %v3435_v57 }
 0x2f8   : > { %v3866_v12 = vld [vmem:[%s9164_s8 + $0xe60] sm:$0xff]  ;;  %6670 = vmatpush2.bf16.msra.mxu1 %v8814_v62  ;;  %v8505_v30 = vcombine.high %v3559_v22, %v3563_v60  ;;  %v3551_v31 = vld [vmem:[%s9164_s8 + $0x488] sm:$0xff] }
 0x2f9   : > { %v8807_v0 = vcombine.high %v3862_v19, %v3866_v12  ;;  %v3726_v1 = vld [vmem:[%s9164_s8 + $0xa00] sm:$0xff]  ;;  %6630 = vmatprep.subr.bf16.mxu0 %v8679_v63  ;;  %v8806_v18 = vcombine.low %v3862_v19, %v3866_v12  ;;  %v3423_v19 = vld [vmem:[%s9164_s8 + $0x88] sm:$0xff]  ;;  %v8376_v63 = vcombine.low %v3431_v56, %v3435_v57 }
 0x2fa   : > { %v3730_v2 = vld [vmem:[%s9164_s8 + $0xa20] sm:$0xff]  ;;  %6631 = vmatpush2.bf16.msra.mxu0 %v8678_v58  ;;  %v3427_v12 = vld [vmem:[%s9164_s8 + $0xa8] sm:$0xff] }
 0x2fb   : > { %v3854_v3 = vld [vmem:[%s9164_s8 + $0xe00] sm:$0xff]  ;;  %v8671_v7 = vcombine.high %v3726_v1, %v3730_v2  ;;  %6671 = vmatprep.subr.bf16.mxu1 %v8807_v0  ;;  %v8670_v13 = vcombine.low %v3726_v1, %v3730_v2  ;;  %v3555_v62 = vld [vmem:[%s9164_s8 + $0x4a8] sm:$0xff]  ;;  %v8504_v0 = vcombine.low %v3559_v22, %v3563_v60  ;;  %v8369_v1 = vcombine.high %v3423_v19, %v3427_v12 }
 0x2fc   : > { %v3858_v5 = vld [vmem:[%s9164_s8 + $0xe20] sm:$0xff]  ;;  %6672 = vmatpush2.bf16.msra.mxu1 %v8806_v18  ;;  %v8497_v2 = vcombine.high %v3551_v31, %v3555_v62  ;;  %v3543_v58 = vld [vmem:[%s9164_s8 + $0x448] sm:$0xff] }
 0x2fd   : > { %v8799_v39 = vcombine.high %v3854_v3, %v3858_v5  ;;  %6632 = vmatprep.subr.bf16.mxu0 %v8671_v7  ;;  %v8798_v20 = vcombine.low %v3854_v3, %v3858_v5  ;;  %v3415_v3 = vld [vmem:[%s9164_s8 + $0x48] sm:$0xff]  ;;  %v8368_v7 = vcombine.low %v3423_v19, %v3427_v12 }
 0x2fe   : > { %6633 = vmatpush2.bf16.msra.mxu0 %v8670_v13  ;;  %v3419_v5 = vld [vmem:[%s9164_s8 + $0x68] sm:$0xff] }
 0x2ff   : > { %6673 = vmatprep.subr.bf16.mxu1 %v8799_v39  ;;  %6684 = vmatprep.subr.bf16.mxu0 %v8409_v42  ;;  %v3547_v18 = vld [vmem:[%s9164_s8 + $0x468] sm:$0xff]  ;;  %v8496_v39 = vcombine.low %v3551_v31, %v3555_v62  ;;  %v8361_v37 = vcombine.high %v3415_v3, %v3419_v5 }
 0x300   : > { %6674 = vmatpush2.bf16.msra.mxu1 %v8798_v20  ;;  %v8489_v33 = vcombine.high %v3543_v58, %v3547_v18  ;;  %v3407_v10 = vld [vmem:[%s9164_s8 + $0x8] sm:$0xff]  ;;  %v8360_v20 = vcombine.low %v3415_v3, %v3419_v5  ;;  %v8488_v21 = vcombine.low %v3543_v58, %v3547_v18 }
 0x301   : > { %6725 = vmatprep.subr.bf16.mxu1 %v8537_v24  ;;  %6635 = vmatmul.mubr.bf16.vlgmr.msra.gmra.mxu0 %v10613_v29  ;;  %v3411_v11 = vld [vmem:[%s9164_s8 + $0x28] sm:$0xff] }
 0x302   : > { %6685 = vmatpush1.bf16.msra.mxu0 %v8408_v59  ;;  %6716 = vmatprep.mubr.bf16.mxu0 %v10491_v16  ;;  %v3535_v13 = vld [vmem:[%s9164_s8 + $0x408] sm:$0xff]  ;;  %v8353_v42 = vcombine.high %v3407_v10, %v3411_v11  ;;  %v8352_v59 = vcombine.low %v3407_v10, %v3411_v11 }
 0x303   : > { %6676 = vmatmul.mubr.bf16.vlgmr.msra.gmra.mxu1 %v10617_v35  ;;  %6686 = vmatprep.subr.bf16.mxu0 %v8401_v38  ;;  %v3539_v15 = vld [vmem:[%s9164_s8 + $0x428] sm:$0xff] }
 0x304   : > { %6726 = vmatpush1.bf16.msra.mxu1 %v8536_v36  ;;  %6757 = vmatprep.mubr.bf16.mxu1 %v10493_v4  ;;  %v8481_v24 = vcombine.high %v3535_v13, %v3539_v15  ;;  %v3527_v26 = vld [vmem:[%s9164_s8 + $0x3c8] sm:$0xff]  ;;  %v8480_v36 = vcombine.low %v3535_v13, %v3539_v15 }
 0x305   : > { %6727 = vmatprep.subr.bf16.mxu1 %v8529_v40  ;;  %v3531_v28 = vld [vmem:[%s9164_s8 + $0x3e8] sm:$0xff] }
 0x306   : > { %6687 = vmatpush1.bf16.msra.mxu0 %v8400_v46  ;;  %v3655_v32 = vld [vmem:[%s9164_s8 + $0x7c8] sm:$0xff]  ;;  %v8473_v38 = vcombine.high %v3527_v26, %v3531_v28  ;;  %v8472_v46 = vcombine.low %v3527_v26, %v3531_v28 }
 0x307   : > { %6688 = vmatprep.subr.bf16.mxu0 %v8393_v48  ;;  %v3659_v34 = vld [vmem:[%s9164_s8 + $0x7e8] sm:$0xff] }
 0x308   : > { %6728 = vmatpush1.bf16.msra.mxu1 %v8528_v47  ;;  %v8601_v40 = vcombine.high %v3655_v32, %v3659_v34  ;;  %v3519_v41 = vld [vmem:[%s9164_s8 + $0x388] sm:$0xff]  ;;  %v8600_v47 = vcombine.low %v3655_v32, %v3659_v34 }
 0x309   : > { %6729 = vmatprep.subr.bf16.mxu1 %v8521_v49  ;;  %v3523_v43 = vld [vmem:[%s9164_s8 + $0x3a8] sm:$0xff] }
 0x30a   : > { %6689 = vmatpush1.bf16.msra.mxu0 %v8392_v53  ;;  %v3647_v44 = vld [vmem:[%s9164_s8 + $0x788] sm:$0xff]  ;;  %v8465_v48 = vcombine.high %v3519_v41, %v3523_v43  ;;  %v8464_v53 = vcombine.low %v3519_v41, %v3523_v43 }
 0x30b   : > { %6690 = vmatprep.subr.bf16.mxu0 %v8385_v55  ;;  %v3651_v45 = vld [vmem:[%s9164_s8 + $0x7a8] sm:$0xff] }
 0x30c   : > { %6730 = vmatpush1.bf16.msra.mxu1 %v8520_v54  ;;  %v8593_v49 = vcombine.high %v3647_v44, %v3651_v45  ;;  %v3511_v50 = vld [vmem:[%s9164_s8 + $0x348] sm:$0xff]  ;;  %v8592_v54 = vcombine.low %v3647_v44, %v3651_v45 }
 0x30d   : > { %6731 = vmatprep.subr.bf16.mxu1 %v8513_v25  ;;  %v3515_v9 = vld [vmem:[%s9164_s8 + $0x368] sm:$0xff] }
 0x30e   : > { %6691 = vmatpush1.bf16.msra.mxu0 %v8384_v14  ;;  %v3639_v51 = vld [vmem:[%s9164_s8 + $0x748] sm:$0xff]  ;;  %v8457_v55 = vcombine.high %v3511_v50, %v3515_v9  ;;  %v8456_v14 = vcombine.low %v3511_v50, %v3515_v9 }
 0x30f   : > { %6692 = vmatprep.subr.bf16.mxu0 %v8377_v61  ;;  %v3643_v52 = vld [vmem:[%s9164_s8 + $0x768] sm:$0xff] }
 0x310   : > { %6732 = vmatpush1.bf16.msra.mxu1 %v8512_v27  ;;  %v8585_v25 = vcombine.high %v3639_v51, %v3643_v52  ;;  %v3503_v56 = vld [vmem:[%s9164_s8 + $0x308] sm:$0xff]  ;;  %v8584_v27 = vcombine.low %v3639_v51, %v3643_v52 }
 0x311   : > { %6733 = vmatprep.subr.bf16.mxu1 %v8505_v30  ;;  %v3507_v57 = vld [vmem:[%s9164_s8 + $0x328] sm:$0xff] }
 0x312   : > { %6693 = vmatpush1.bf16.msra.mxu0 %v8376_v63  ;;  %v3631_v22 = vld [vmem:[%s9164_s8 + $0x708] sm:$0xff]  ;;  %v8449_v61 = vcombine.high %v3503_v56, %v3507_v57  ;;  %v8448_v63 = vcombine.low %v3503_v56, %v3507_v57 }
 0x313   : > { %6694 = vmatprep.subr.bf16.mxu0 %v8369_v1  ;;  %v3635_v60 = vld [vmem:[%s9164_s8 + $0x728] sm:$0xff] }
 0x314   : > { %6734 = vmatpush1.bf16.msra.mxu1 %v8504_v0  ;;  %v8577_v30 = vcombine.high %v3631_v22, %v3635_v60  ;;  %v3495_v19 = vld [vmem:[%s9164_s8 + $0x2c8] sm:$0xff]  ;;  %v8576_v0 = vcombine.low %v3631_v22, %v3635_v60 }
 0x315   : > { %6735 = vmatprep.subr.bf16.mxu1 %v8497_v2  ;;  %v3499_v12 = vld [vmem:[%s9164_s8 + $0x2e8] sm:$0xff] }
 0x316   : > { %6695 = vmatpush1.bf16.msra.mxu0 %v8368_v7  ;;  %v3623_v31 = vld [vmem:[%s9164_s8 + $0x6c8] sm:$0xff]  ;;  %v8441_v1 = vcombine.high %v3495_v19, %v3499_v12  ;;  %v8440_v7 = vcombine.low %v3495_v19, %v3499_v12 }
 0x317   : > { %6696 = vmatprep.subr.bf16.mxu0 %v8361_v37  ;;  %v3627_v62 = vld [vmem:[%s9164_s8 + $0x6e8] sm:$0xff] }
 0x318   : > { %6736 = vmatpush1.bf16.msra.mxu1 %v8496_v39  ;;  %v8569_v2 = vcombine.high %v3623_v31, %v3627_v62  ;;  %v3487_v3 = vld [vmem:[%s9164_s8 + $0x288] sm:$0xff]  ;;  %v8568_v39 = vcombine.low %v3623_v31, %v3627_v62 }
 0x319   : > { %6737 = vmatprep.subr.bf16.mxu1 %v8489_v33  ;;  %v3491_v5 = vld [vmem:[%s9164_s8 + $0x2a8] sm:$0xff] }
 0x31a   : > { %6697 = vmatpush1.bf16.msra.mxu0 %v8360_v20  ;;  %v3615_v58 = vld [vmem:[%s9164_s8 + $0x688] sm:$0xff]  ;;  %v8433_v37 = vcombine.high %v3487_v3, %v3491_v5  ;;  %v8432_v20 = vcombine.low %v3487_v3, %v3491_v5 }
 0x31b   : > { %6698 = vmatprep.subr.bf16.mxu0 %v8353_v42  ;;  %v3619_v18 = vld [vmem:[%s9164_s8 + $0x6a8] sm:$0xff] }
 0x31c   : > { %6738 = vmatpush1.bf16.msra.mxu1 %v8488_v21  ;;  %v8561_v33 = vcombine.high %v3615_v58, %v3619_v18  ;;  %v3479_v10 = vld [vmem:[%s9164_s8 + $0x248] sm:$0xff]  ;;  %v8560_v21 = vcombine.low %v3615_v58, %v3619_v18 }
 0x31d   : > { %6739 = vmatprep.subr.bf16.mxu1 %v8481_v24  ;;  %v3483_v11 = vld [vmem:[%s9164_s8 + $0x268] sm:$0xff] }
 0x31e   : > { %6699 = vmatpush1.bf16.msra.mxu0 %v8352_v59  ;;  %v3607_v13 = vld [vmem:[%s9164_s8 + $0x648] sm:$0xff]  ;;  %v8425_v42 = vcombine.high %v3479_v10, %v3483_v11  ;;  %v8424_v59 = vcombine.low %v3479_v10, %v3483_v11 }
 0x31f   : > { %6700 = vmatprep.subr.bf16.mxu0 %v8473_v38  ;;  %v3611_v15 = vld [vmem:[%s9164_s8 + $0x668] sm:$0xff] }
 0x320   : > { %6740 = vmatpush1.bf16.msra.mxu1 %v8480_v36  ;;  %v8553_v24 = vcombine.high %v3607_v13, %v3611_v15  ;;  %v3471_v26 = vld [vmem:[%s9164_s8 + $0x208] sm:$0xff]  ;;  %v8552_v36 = vcombine.low %v3607_v13, %v3611_v15 }
 0x321   : > { %6741 = vmatprep.subr.bf16.mxu1 %v8601_v40  ;;  %v3475_v28 = vld [vmem:[%s9164_s8 + $0x228] sm:$0xff] }
 0x322   : > { %6701 = vmatpush2.bf16.msra.mxu0 %v8472_v46  ;;  %v3599_v32 = vld [vmem:[%s9164_s8 + $0x608] sm:$0xff]  ;;  %v8417_v38 = vcombine.high %v3471_v26, %v3475_v28  ;;  %v8416_v46 = vcombine.low %v3471_v26, %v3475_v28 }
 0x323   : > { %6702 = vmatprep.subr.bf16.mxu0 %v8465_v48  ;;  %v3603_v34 = vld [vmem:[%s9164_s8 + $0x628] sm:$0xff] }
 0x324   : > { %6742 = vmatpush2.bf16.msra.mxu1 %v8600_v47  ;;  %v8545_v40 = vcombine.high %v3599_v32, %v3603_v34  ;;  %v3719_v41 = vld [vmem:[%s9164_s8 + $0x9c8] sm:$0xff]  ;;  %v8544_v47 = vcombine.low %v3599_v32, %v3603_v34 }
 0x325   : > { %6743 = vmatprep.subr.bf16.mxu1 %v8593_v49  ;;  %v3723_v43 = vld [vmem:[%s9164_s8 + $0x9e8] sm:$0xff] }
 0x326   : > { %6703 = vmatpush2.bf16.msra.mxu0 %v8464_v53  ;;  %v3847_v44 = vld [vmem:[%s9164_s8 + $0xdc8] sm:$0xff]  ;;  %v8665_v48 = vcombine.high %v3719_v41, %v3723_v43  ;;  %v8664_v53 = vcombine.low %v3719_v41, %v3723_v43 }
 0x327   : > { %6704 = vmatprep.subr.bf16.mxu0 %v8457_v55  ;;  %v3851_v45 = vld [vmem:[%s9164_s8 + $0xde8] sm:$0xff] }
 0x328   : > { %6744 = vmatpush2.bf16.msra.mxu1 %v8592_v54  ;;  %v8793_v49 = vcombine.high %v3847_v44, %v3851_v45  ;;  %v3711_v50 = vld [vmem:[%s9164_s8 + $0x988] sm:$0xff]  ;;  %v8792_v54 = vcombine.low %v3847_v44, %v3851_v45 }
 0x329   : > { %6745 = vmatprep.subr.bf16.mxu1 %v8585_v25  ;;  %v3715_v9 = vld [vmem:[%s9164_s8 + $0x9a8] sm:$0xff] }
 0x32a   : > { %6705 = vmatpush2.bf16.msra.mxu0 %v8456_v14  ;;  %v3839_v51 = vld [vmem:[%s9164_s8 + $0xd88] sm:$0xff]  ;;  %v8657_v55 = vcombine.high %v3711_v50, %v3715_v9  ;;  %v8656_v14 = vcombine.low %v3711_v50, %v3715_v9 }
 0x32b   : > { %6706 = vmatprep.subr.bf16.mxu0 %v8449_v61  ;;  %v3843_v52 = vld [vmem:[%s9164_s8 + $0xda8] sm:$0xff] }
 0x32c   : > { %6746 = vmatpush2.bf16.msra.mxu1 %v8584_v27  ;;  %v8785_v25 = vcombine.high %v3839_v51, %v3843_v52  ;;  %v3703_v56 = vld [vmem:[%s9164_s8 + $0x948] sm:$0xff]  ;;  %v8784_v27 = vcombine.low %v3839_v51, %v3843_v52 }
 0x32d   : > { %6747 = vmatprep.subr.bf16.mxu1 %v8577_v30  ;;  %v3707_v57 = vld [vmem:[%s9164_s8 + $0x968] sm:$0xff] }
 0x32e   : > { %6707 = vmatpush2.bf16.msra.mxu0 %v8448_v63  ;;  %v3831_v22 = vld [vmem:[%s9164_s8 + $0xd48] sm:$0xff]  ;;  %v8649_v61 = vcombine.high %v3703_v56, %v3707_v57  ;;  %v8648_v63 = vcombine.low %v3703_v56, %v3707_v57 }
 0x32f   : > { %6708 = vmatprep.subr.bf16.mxu0 %v8441_v1  ;;  %v3835_v60 = vld [vmem:[%s9164_s8 + $0xd68] sm:$0xff] }
 0x330   : > { %6748 = vmatpush2.bf16.msra.mxu1 %v8576_v0  ;;  %v8777_v30 = vcombine.high %v3831_v22, %v3835_v60  ;;  %v3695_v19 = vld [vmem:[%s9164_s8 + $0x908] sm:$0xff]  ;;  %v8776_v0 = vcombine.low %v3831_v22, %v3835_v60 }
 0x331   : > { %6749 = vmatprep.subr.bf16.mxu1 %v8569_v2  ;;  %v3699_v12 = vld [vmem:[%s9164_s8 + $0x928] sm:$0xff] }
 0x332   : > { %6709 = vmatpush2.bf16.msra.mxu0 %v8440_v7  ;;  %v3823_v31 = vld [vmem:[%s9164_s8 + $0xd08] sm:$0xff]  ;;  %v8641_v1 = vcombine.high %v3695_v19, %v3699_v12  ;;  %v8640_v7 = vcombine.low %v3695_v19, %v3699_v12 }
 0x333   : > { %6710 = vmatprep.subr.bf16.mxu0 %v8433_v37  ;;  %v3827_v62 = vld [vmem:[%s9164_s8 + $0xd28] sm:$0xff] }
 0x334   : > { %6750 = vmatpush2.bf16.msra.mxu1 %v8568_v39  ;;  %v8769_v2 = vcombine.high %v3823_v31, %v3827_v62  ;;  %v3687_v3 = vld [vmem:[%s9164_s8 + $0x8c8] sm:$0xff]  ;;  %v8768_v39 = vcombine.low %v3823_v31, %v3827_v62 }
 0x335   : > { %6751 = vmatprep.subr.bf16.mxu1 %v8561_v33  ;;  %v3691_v5 = vld [vmem:[%s9164_s8 + $0x8e8] sm:$0xff] }
 0x336   : > { %6711 = vmatpush2.bf16.msra.mxu0 %v8432_v20  ;;  %v3815_v58 = vld [vmem:[%s9164_s8 + $0xcc8] sm:$0xff]  ;;  %v8633_v37 = vcombine.high %v3687_v3, %v3691_v5  ;;  %v8632_v20 = vcombine.low %v3687_v3, %v3691_v5 }
 0x337   : > { %6712 = vmatprep.subr.bf16.mxu0 %v8425_v42  ;;  %v3819_v18 = vld [vmem:[%s9164_s8 + $0xce8] sm:$0xff] }
 0x338   : > { %6752 = vmatpush2.bf16.msra.mxu1 %v8560_v21  ;;  %v8761_v33 = vcombine.high %v3815_v58, %v3819_v18  ;;  %v3679_v10 = vld [vmem:[%s9164_s8 + $0x888] sm:$0xff]  ;;  %v8760_v21 = vcombine.low %v3815_v58, %v3819_v18 }
 0x339   : > { %6753 = vmatprep.subr.bf16.mxu1 %v8553_v24  ;;  %v3683_v11 = vld [vmem:[%s9164_s8 + $0x8a8] sm:$0xff] }
 0x33a   : > { %6713 = vmatpush2.bf16.msra.mxu0 %v8424_v59  ;;  %v3807_v13 = vld [vmem:[%s9164_s8 + $0xc88] sm:$0xff]  ;;  %v8625_v42 = vcombine.high %v3679_v10, %v3683_v11  ;;  %v8624_v59 = vcombine.low %v3679_v10, %v3683_v11 }
 0x33b   : > { %6714 = vmatprep.subr.bf16.mxu0 %v8417_v38  ;;  %v3811_v15 = vld [vmem:[%s9164_s8 + $0xca8] sm:$0xff] }
 0x33c   : > { %6754 = vmatpush2.bf16.msra.mxu1 %v8552_v36  ;;  %v8753_v24 = vcombine.high %v3807_v13, %v3811_v15  ;;  %v3671_v26 = vld [vmem:[%s9164_s8 + $0x848] sm:$0xff]  ;;  %v8752_v36 = vcombine.low %v3807_v13, %v3811_v15 }
 0x33d   : > { %6755 = vmatprep.subr.bf16.mxu1 %v8545_v40  ;;  %v3675_v28 = vld [vmem:[%s9164_s8 + $0x868] sm:$0xff] }
 0x33e   : > { %6715 = vmatpush2.bf16.msra.mxu0 %v8416_v46  ;;  %v3799_v32 = vld [vmem:[%s9164_s8 + $0xc48] sm:$0xff]  ;;  %v8617_v38 = vcombine.high %v3671_v26, %v3675_v28  ;;  %v8616_v46 = vcombine.low %v3671_v26, %v3675_v28 }
 0x33f   : > { %6766 = vmatprep.subr.bf16.mxu0 %v8665_v48  ;;  %v3803_v34 = vld [vmem:[%s9164_s8 + $0xc68] sm:$0xff] }
 0x340   : > { %6756 = vmatpush2.bf16.msra.mxu1 %v8544_v47  ;;  %v8745_v40 = vcombine.high %v3799_v32, %v3803_v34  ;;  %v3663_v41 = vld [vmem:[%s9164_s8 + $0x808] sm:$0xff]  ;;  %v8744_v47 = vcombine.low %v3799_v32, %v3803_v34 }
 0x341   : > { %6807 = vmatprep.subr.bf16.mxu1 %v8793_v49  ;;  %6717 = vmatmul.mubr.bf16.vlgmr.msra.gmra.mxu0 %v10537_v6  ;;  %v3667_v43 = vld [vmem:[%s9164_s8 + $0x828] sm:$0xff] }
 0x342   : > { %6767 = vmatpush1.bf16.msra.mxu0 %v8664_v53  ;;  %6798 = vmatprep.mubr.bf16.mxu0 %v10545_v17  ;;  %v3791_v44 = vld [vmem:[%s9164_s8 + $0xc08] sm:$0xff]  ;;  %v8609_v48 = vcombine.high %v3663_v41, %v3667_v43  ;;  %v8608_v53 = vcombine.low %v3663_v41, %v3667_v43 }
 0x343   : > { %6758 = vmatmul.mubr.bf16.vlgmr.msra.gmra.mxu1 %v10541_v8  ;;  %6768 = vmatprep.subr.bf16.mxu0 %v8657_v55  ;;  %v3795_v45 = vld [vmem:[%s9164_s8 + $0xc28] sm:$0xff] }
 0x344   : > { %6808 = vmatpush1.bf16.msra.mxu1 %v8792_v54  ;;  %6839 = vmatprep.mubr.bf16.mxu1 %v10550_v23  ;;  %v8737_v49 = vcombine.high %v3791_v44, %v3795_v45  ;;  %v3783_v50 = vld [vmem:[%s9164_s8 + $0xbc8] sm:$0xff]  ;;  %v8736_v54 = vcombine.low %v3791_v44, %v3795_v45 }
 0x345   : > { %6809 = vmatprep.subr.bf16.mxu1 %v8785_v25  ;;  %v3787_v9 = vld [vmem:[%s9164_s8 + $0xbe8] sm:$0xff] }
 0x346   : > { %6769 = vmatpush1.bf16.msra.mxu0 %v8656_v14  ;;  %v3911_v51 = vld [vmem:[%s9164_s8 + $0xfc8] sm:$0xff]  ;;  %v8729_v55 = vcombine.high %v3783_v50, %v3787_v9  ;;  %v8728_v14 = vcombine.low %v3783_v50, %v3787_v9 }
 0x347   : > { %6770 = vmatprep.subr.bf16.mxu0 %v8649_v61  ;;  %v3915_v52 = vld [vmem:[%s9164_s8 + $0xfe8] sm:$0xff] }
 0x348   : > { %6810 = vmatpush1.bf16.msra.mxu1 %v8784_v27  ;;  %v8857_v25 = vcombine.high %v3911_v51, %v3915_v52  ;;  %v3775_v56 = vld [vmem:[%s9164_s8 + $0xb88] sm:$0xff]  ;;  %v8856_v27 = vcombine.low %v3911_v51, %v3915_v52 }
 0x349   : > { %6811 = vmatprep.subr.bf16.mxu1 %v8777_v30  ;;  %v3779_v57 = vld [vmem:[%s9164_s8 + $0xba8] sm:$0xff] }
 0x34a   : > { %6771 = vmatpush1.bf16.msra.mxu0 %v8648_v63  ;;  %v3903_v22 = vld [vmem:[%s9164_s8 + $0xf88] sm:$0xff]  ;;  %v8721_v61 = vcombine.high %v3775_v56, %v3779_v57  ;;  %v8720_v63 = vcombine.low %v3775_v56, %v3779_v57  ;;  %v3464_v56 = vld [vmem:[%s9164_s8 + $0x1d0] sm:$0xff] }
 0x34b   : > { %6772 = vmatprep.subr.bf16.mxu0 %v8641_v1  ;;  %v3907_v60 = vld [vmem:[%s9164_s8 + $0xfa8] sm:$0xff]  ;;  %v3468_v57 = vld [vmem:[%s9164_s8 + $0x1f0] sm:$0xff] }
 0x34c   : > { %6812 = vmatpush1.bf16.msra.mxu1 %v8776_v0  ;;  %v8849_v30 = vcombine.high %v3903_v22, %v3907_v60  ;;  %v3767_v19 = vld [vmem:[%s9164_s8 + $0xb48] sm:$0xff]  ;;  %v8848_v0 = vcombine.low %v3903_v22, %v3907_v60  ;;  %v3592_v22 = vld [vmem:[%s9164_s8 + $0x5d0] sm:$0xff] }
 0x34d   : > { %6813 = vmatprep.subr.bf16.mxu1 %v8769_v2  ;;  %v3771_v12 = vld [vmem:[%s9164_s8 + $0xb68] sm:$0xff]  ;;  %v3596_v60 = vld [vmem:[%s9164_s8 + $0x5f0] sm:$0xff] }
 0x34e   : > { %6773 = vmatpush1.bf16.msra.mxu0 %v8640_v7  ;;  %v3895_v31 = vld [vmem:[%s9164_s8 + $0xf48] sm:$0xff]  ;;  %v8713_v1 = vcombine.high %v3767_v19, %v3771_v12  ;;  %v8712_v7 = vcombine.low %v3767_v19, %v3771_v12  ;;  %v3456_v19 = vld [vmem:[%s9164_s8 + $0x190] sm:$0xff] }
 0x34f   : > { %6774 = vmatprep.subr.bf16.mxu0 %v8633_v37  ;;  %v3899_v62 = vld [vmem:[%s9164_s8 + $0xf68] sm:$0xff]  ;;  %v3460_v12 = vld [vmem:[%s9164_s8 + $0x1b0] sm:$0xff] }
 0x350   : > { %6814 = vmatpush1.bf16.msra.mxu1 %v8768_v39  ;;  %v8841_v2 = vcombine.high %v3895_v31, %v3899_v62  ;;  %v3759_v3 = vld [vmem:[%s9164_s8 + $0xb08] sm:$0xff]  ;;  %v8840_v39 = vcombine.low %v3895_v31, %v3899_v62  ;;  %v3584_v31 = vld [vmem:[%s9164_s8 + $0x590] sm:$0xff] }
 0x351   : > { %6815 = vmatprep.subr.bf16.mxu1 %v8761_v33  ;;  %v3763_v5 = vld [vmem:[%s9164_s8 + $0xb28] sm:$0xff]  ;;  %v3588_v62 = vld [vmem:[%s9164_s8 + $0x5b0] sm:$0xff] }
 0x352   : > { %6775 = vmatpush1.bf16.msra.mxu0 %v8632_v20  ;;  %v3887_v58 = vld [vmem:[%s9164_s8 + $0xf08] sm:$0xff]  ;;  %v8705_v37 = vcombine.high %v3759_v3, %v3763_v5  ;;  %v8704_v20 = vcombine.low %v3759_v3, %v3763_v5  ;;  %v3448_v3 = vld [vmem:[%s9164_s8 + $0x150] sm:$0xff] }
 0x353   : > { %6776 = vmatprep.subr.bf16.mxu0 %v8625_v42  ;;  %v3891_v18 = vld [vmem:[%s9164_s8 + $0xf28] sm:$0xff]  ;;  %v3452_v5 = vld [vmem:[%s9164_s8 + $0x170] sm:$0xff] }
 0x354   : > { %6816 = vmatpush1.bf16.msra.mxu1 %v8760_v21  ;;  %v8833_v33 = vcombine.high %v3887_v58, %v3891_v18  ;;  %v3751_v10 = vld [vmem:[%s9164_s8 + $0xac8] sm:$0xff]  ;;  %v8832_v21 = vcombine.low %v3887_v58, %v3891_v18  ;;  %v3576_v18 = vld [vmem:[%s9164_s8 + $0x550] sm:$0xff] }
 0x355   : > { %6817 = vmatprep.subr.bf16.mxu1 %v8753_v24  ;;  %v3755_v11 = vld [vmem:[%s9164_s8 + $0xae8] sm:$0xff] }
 0x356   : > { %6777 = vmatpush1.bf16.msra.mxu0 %v8624_v59  ;;  %v3879_v13 = vld [vmem:[%s9164_s8 + $0xec8] sm:$0xff]  ;;  %v8697_v42 = vcombine.high %v3751_v10, %v3755_v11  ;;  %v8696_v59 = vcombine.low %v3751_v10, %v3755_v11  ;;  %v8530_v10 = vcombine.low %v3584_v31, %v3588_v62  ;;  %v8395_v11 = vcombine.high %v3448_v3, %v3452_v5 }
 0x357   : > { %6778 = vmatprep.subr.bf16.mxu0 %v8617_v38  ;;  %v3883_v15 = vld [vmem:[%s9164_s8 + $0xee8] sm:$0xff] }
 0x358   : > { %6818 = vmatpush1.bf16.msra.mxu1 %v8752_v36  ;;  %v8825_v24 = vcombine.high %v3879_v13, %v3883_v15  ;;  %v3743_v26 = vld [vmem:[%s9164_s8 + $0xa88] sm:$0xff]  ;;  %v8824_v36 = vcombine.low %v3879_v13, %v3883_v15 }
 0x359   : > { %6819 = vmatprep.subr.bf16.mxu1 %v8745_v40  ;;  %v3747_v28 = vld [vmem:[%s9164_s8 + $0xaa8] sm:$0xff] }
 0x35a   : > { %6779 = vmatpush1.bf16.msra.mxu0 %v8616_v46  ;;  %v3871_v32 = vld [vmem:[%s9164_s8 + $0xe88] sm:$0xff]  ;;  %v8689_v38 = vcombine.high %v3743_v26, %v3747_v28  ;;  %v8688_v46 = vcombine.low %v3743_v26, %v3747_v28  ;;  %v3572_v26 = vld [vmem:[%s9164_s8 + $0x530] sm:$0xff] }
 0x35b   : > { %6780 = vmatprep.subr.bf16.mxu0 %v8609_v48  ;;  %v3875_v34 = vld [vmem:[%s9164_s8 + $0xea8] sm:$0xff] }
 0x35c   : > { %6820 = vmatpush1.bf16.msra.mxu1 %v8744_v47  ;;  %v8817_v40 = vcombine.high %v3871_v32, %v3875_v34  ;;  %v3735_v41 = vld [vmem:[%s9164_s8 + $0xa48] sm:$0xff]  ;;  %v8816_v47 = vcombine.low %v3871_v32, %v3875_v34  ;;  %v8394_v32 = vcombine.low %v3448_v3, %v3452_v5  ;;  %v3528_v3 = vld [vmem:[%s9164_s8 + $0x3d0] sm:$0xff] }
 0x35d   : > { %6821 = vmatprep.subr.bf16.mxu1 %v8737_v49  ;;  %v3739_v43 = vld [vmem:[%s9164_s8 + $0xa68] sm:$0xff]  ;;  %v3532_v5 = vld [vmem:[%s9164_s8 + $0x3f0] sm:$0xff] }
 0x35e   : > { %6781 = vmatpush1.bf16.msra.mxu0 %v8608_v53  ;;  %v3863_v44 = vld [vmem:[%s9164_s8 + $0xe48] sm:$0xff]  ;;  %v8681_v48 = vcombine.high %v3735_v41, %v3739_v43  ;;  %v8680_v53 = vcombine.low %v3735_v41, %v3739_v43  ;;  %v3432_v41 = vld [vmem:[%s9164_s8 + $0xd0] sm:$0xff] }
 0x35f   : > { %6782 = vmatprep.subr.bf16.mxu0 %v8729_v55  ;;  %v3867_v45 = vld [vmem:[%s9164_s8 + $0xe68] sm:$0xff]  ;;  %v3436_v43 = vld [vmem:[%s9164_s8 + $0xf0] sm:$0xff] }
 0x360   : > { %6822 = vmatpush1.bf16.msra.mxu1 %v8736_v54  ;;  %v8809_v49 = vcombine.high %v3863_v44, %v3867_v45  ;;  %v3727_v50 = vld [vmem:[%s9164_s8 + $0xa08] sm:$0xff]  ;;  %v8808_v54 = vcombine.low %v3863_v44, %v3867_v45  ;;  %v3560_v44 = vld [vmem:[%s9164_s8 + $0x4d0] sm:$0xff] }
 0x361   : > { %6823 = vmatprep.subr.bf16.mxu1 %v8857_v25  ;;  %v3731_v9 = vld [vmem:[%s9164_s8 + $0xa28] sm:$0xff]  ;;  %v3564_v45 = vld [vmem:[%s9164_s8 + $0x4f0] sm:$0xff] }
 0x362   : > { %6783 = vmatpush2.bf16.msra.mxu0 %v8728_v14  ;;  %v3855_v51 = vld [vmem:[%s9164_s8 + $0xe08] sm:$0xff]  ;;  %v8673_v55 = vcombine.high %v3727_v50, %v3731_v9  ;;  %v8672_v14 = vcombine.low %v3727_v50, %v3731_v9  ;;  %v3424_v50 = vld [vmem:[%s9164_s8 + $0x90] sm:$0xff] }
 0x363   : > { %6784 = vmatprep.subr.bf16.mxu0 %v8721_v61  ;;  %v3859_v52 = vld [vmem:[%s9164_s8 + $0xe28] sm:$0xff]  ;;  %v8411_v61 = vcombine.high %v3464_v56, %v3468_v57  ;;  %v3428_v9 = vld [vmem:[%s9164_s8 + $0xb0] sm:$0xff] }
 0x364   : > { %6824 = vmatpush2.bf16.msra.mxu1 %v8856_v27  ;;  %v8801_v25 = vcombine.high %v3855_v51, %v3859_v52  ;;  %v8800_v27 = vcombine.low %v3855_v51, %v3859_v52  ;;  %v3552_v51 = vld [vmem:[%s9164_s8 + $0x490] sm:$0xff] }
 0x365   : > { %6825 = vmatprep.subr.bf16.mxu1 %v8849_v30  ;;  %v8539_v30 = vcombine.high %v3592_v22, %v3596_v60  ;;  %v3556_v52 = vld [vmem:[%s9164_s8 + $0x4b0] sm:$0xff] }
 0x366   : > { %6785 = vmatpush2.bf16.msra.mxu0 %v8720_v63  ;;  %v8410_v63 = vcombine.low %v3464_v56, %v3468_v57  ;;  %v3416_v56 = vld [vmem:[%s9164_s8 + $0x50] sm:$0xff] }
 0x367   : > { %6786 = vmatprep.subr.bf16.mxu0 %v8713_v1  ;;  %v8403_v1 = vcombine.high %v3456_v19, %v3460_v12  ;;  %v3420_v57 = vld [vmem:[%s9164_s8 + $0x70] sm:$0xff] }
 0x368   : > { %6826 = vmatpush2.bf16.msra.mxu1 %v8848_v0  ;;  %v8538_v0 = vcombine.low %v3592_v22, %v3596_v60  ;;  %v3544_v22 = vld [vmem:[%s9164_s8 + $0x450] sm:$0xff] }
 0x369   : > { %6827 = vmatprep.subr.bf16.mxu1 %v8841_v2  ;;  %v8531_v2 = vcombine.high %v3584_v31, %v3588_v62  ;;  %v3548_v60 = vld [vmem:[%s9164_s8 + $0x470] sm:$0xff] }
 0x36a   : > { %6787 = vmatpush2.bf16.msra.mxu0 %v8712_v7  ;;  %v3580_v7 = vld [vmem:[%s9164_s8 + $0x570] sm:$0xff] }
 0x36b   : > { %6788 = vmatprep.subr.bf16.mxu0 %v8705_v37  ;;  %v8402_v37 = vcombine.low %v3456_v19, %v3460_v12  ;;  %v8523_v15 = vcombine.high %v3576_v18, %v3580_v7  ;;  %v3408_v19 = vld [vmem:[%s9164_s8 + $0x10] sm:$0xff] }
 0x36c   : > { %6828 = vmatpush2.bf16.msra.mxu1 %v8840_v39  ;;  %v3412_v12 = vld [vmem:[%s9164_s8 + $0x30] sm:$0xff] }
 0x36d   : > { %6829 = vmatprep.subr.bf16.mxu1 %v8833_v33  ;;  %v3536_v31 = vld [vmem:[%s9164_s8 + $0x410] sm:$0xff] }
 0x36e   : > { %6789 = vmatpush2.bf16.msra.mxu0 %v8704_v20  ;;  %v3440_v20 = vld [vmem:[%s9164_s8 + $0x110] sm:$0xff] }
 0x36f   : > { %6790 = vmatprep.subr.bf16.mxu0 %v8697_v42  ;;  %v3540_v62 = vld [vmem:[%s9164_s8 + $0x430] sm:$0xff] }
 0x370   : > { %6830 = vmatpush2.bf16.msra.mxu1 %v8832_v21  ;;  %v3444_v21 = vld [vmem:[%s9164_s8 + $0x130] sm:$0xff] }
 0x371   : > { %6831 = vmatprep.subr.bf16.mxu1 %v8825_v24  ;;  %v3568_v24 = vld [vmem:[%s9164_s8 + $0x510] sm:$0xff] }
 0x372   : > { %6791 = vmatpush2.bf16.msra.mxu0 %v8696_v59  ;;  %v8522_v59 = vcombine.low %v3576_v18, %v3580_v7  ;;  %v3656_v18 = vld [vmem:[%s9164_s8 + $0x7d0] sm:$0xff] }
 0x373   : > { %6792 = vmatprep.subr.bf16.mxu0 %v8689_v38  ;;  %v3660_v7 = vld [vmem:[%s9164_s8 + $0x7f0] sm:$0xff] }
 0x374   : > { %6832 = vmatpush2.bf16.msra.mxu1 %v8824_v36  ;;  %v8387_v36 = vcombine.high %v3440_v20, %v3444_v21 }
 0x375   : > { %6833 = vmatprep.subr.bf16.mxu1 %v8817_v40  ;;  %v8515_v40 = vcombine.high %v3568_v24, %v3572_v26 }
 0x376   : > { %6793 = vmatpush2.bf16.msra.mxu0 %v8688_v46  ;;  %v8386_v46 = vcombine.low %v3440_v20, %v3444_v21  ;;  %v3520_v20 = vld [vmem:[%s9164_s8 + $0x390] sm:$0xff] }
 0x377   : > { %6794 = vmatprep.subr.bf16.mxu0 %v8681_v48  ;;  %v8379_v48 = vcombine.high %v3432_v41, %v3436_v43  ;;  %v3524_v21 = vld [vmem:[%s9164_s8 + $0x3b0] sm:$0xff] }
 0x378   : > { %6834 = vmatpush2.bf16.msra.mxu1 %v8816_v47  ;;  %v8514_v47 = vcombine.low %v3568_v24, %v3572_v26  ;;  %v3652_v24 = vld [vmem:[%s9164_s8 + $0x7b0] sm:$0xff]  ;;  %v8474_v26 = vcombine.low %v3528_v3, %v3532_v5 }
 0x379   : > { %6835 = vmatprep.subr.bf16.mxu1 %v8809_v49  ;;  %v8507_v49 = vcombine.high %v3560_v44, %v3564_v45 }
 0x37a   : > { %6795 = vmatpush2.bf16.msra.mxu0 %v8680_v53  ;;  %v8378_v53 = vcombine.low %v3432_v41, %v3436_v43  ;;  %v8466_v41 = vcombine.low %v3520_v20, %v3524_v21 }
 0x37b   : > { %6796 = vmatprep.subr.bf16.mxu0 %v8673_v55  ;;  %v8371_v55 = vcombine.high %v3424_v50, %v3428_v9 }
 0x37c   : > { %6836 = vmatpush2.bf16.msra.mxu1 %v8808_v54  ;;  %v8506_v54 = vcombine.low %v3560_v44, %v3564_v45 }
 0x37d   : > { %6837 = vmatprep.subr.bf16.mxu1 %v8801_v25  ;;  %v8499_v25 = vcombine.high %v3552_v51, %v3556_v52 }
 0x37e   : > { %6797 = vmatpush2.bf16.msra.mxu0 %v8672_v14  ;;  %v8370_v14 = vcombine.low %v3424_v50, %v3428_v9 }
 0x37f   : > { %6848 = vmatprep.subr.bf16.mxu0 %v8411_v61  ;;  %v8363_v61 = vcombine.high %v3416_v56, %v3420_v57 }
 0x380   : > { %6838 = vmatpush2.bf16.msra.mxu1 %v8800_v27  ;;  %v10757_v58 = vpop.f32.mrf.mxu0  ;;  %v8498_v27 = vcombine.low %v3552_v51, %v3556_v52 }
 0x381   : > { %6889 = vmatprep.subr.bf16.mxu1 %v8539_v30  ;;  %6799 = vmatmul.mubr.bf16.vlgmr.msra.gmra.mxu0 %v10613_v29  ;;  %v8491_v30 = vcombine.high %v3544_v22, %v3548_v60 }
 0x382   : > { %v10762_v39 = vpop.f32.mrf.mxu1  ;;  %6849 = vmatpush1.bf16.msra.mxu0 %v8410_v63  ;;  %v10765_v33 = vpop.f32.mrf.mxu0  ;;  %6880 = vmatprep.mubr.bf16.mxu0 %v10491_v16  ;;  %v8362_v63 = vcombine.low %v3416_v56, %v3420_v57 }
 0x383   : > { %6840 = vmatmul.mubr.bf16.vlgmr.msra.gmra.mxu1 %v10617_v35  ;;  %6850 = vmatprep.subr.bf16.mxu0 %v8403_v1  ;;  %v8355_v1 = vcombine.high %v3408_v19, %v3412_v12 }
 0x384   : > { %6890 = vmatpush1.bf16.msra.mxu1 %v8538_v0  ;;  %v10767_v13 = vpop.f32.mrf.mxu1  ;;  %v6558_v42 = vpop.f32.mrf.mxu0  ;;  %6921 = vmatprep.mubr.bf16.mxu1 %v10493_v4  ;;  %v8490_v0 = vcombine.low %v3544_v22, %v3548_v60  ;;  %v3920_v60 = vlaneseq }
 0x385   : > { %6891 = vmatprep.subr.bf16.mxu1 %v8531_v2  ;;  %v8483_v2 = vcombine.high %v3536_v31, %v3540_v62  ;;  %v3648_v42 = vld [vmem:[%s9164_s8 + $0x790] sm:$0xff] }
 0x386   : > { %v6599_v28 = vpop.f32.mrf.mxu1  ;;  %6851 = vmatpush1.bf16.msra.mxu0 %v8402_v37  ;;  %v6559_v34 = vpop.f32.mrf.mxu0  ;;  %v8354_v37 = vcombine.low %v3408_v19, %v3412_v12  ;;  %v8594_v43 = vcombine.low %v3648_v42, %v3652_v24  ;;  %v3620_v19 = vld [vmem:[%s9164_s8 + $0x6b0] sm:$0xff] }
 0x387   : > { %6852 = vmatprep.subr.bf16.mxu0 %v8395_v11  ;;  %v8475_v11 = vcombine.high %v3528_v3, %v3532_v5  ;;  %v8602_v28 = vcombine.low %v3656_v18, %v3660_v7  ;;  %v8595_v34 = vcombine.high %v3648_v42, %v3652_v24  ;;  %v3608_v3 = vld [vmem:[%s9164_s8 + $0x650] sm:$0xff] }
 0x388   : > { %6892 = vmatpush1.bf16.msra.mxu1 %v8530_v10  ;;  %v6600_v38 = vpop.f32.mrf.mxu1  ;;  %v8482_v10 = vcombine.low %v3536_v31, %v3540_v62  ;;  %v3612_v5 = vld [vmem:[%s9164_s8 + $0x670] sm:$0xff] }
 0x389   : > { %6893 = vmatprep.subr.bf16.mxu1 %v8523_v15  ;;  %v8603_v15 = vcombine.high %v3656_v18, %v3660_v7  ;;  %v3640_v38 = vld [vmem:[%s9164_s8 + $0x750] sm:$0xff] }
 0x38a   : > { %6853 = vmatpush1.bf16.msra.mxu0 %v8394_v32  ;;  %v8467_v32 = vcombine.high %v3520_v20, %v3524_v21  ;;  %v3476_v20 = vld [vmem:[%s9164_s8 + $0x230] sm:$0xff]  ;;  %v10825_v21 = vld [vmem:[%s9159_s28] sm:$0xff] }
 0x38b   : > { %6854 = vmatprep.subr.bf16.mxu0 %v8387_v36  ;;  %v3516_v36 = vld [vmem:[%s9164_s8 + $0x370] sm:$0xff] }
 0x38c   : > { %6894 = vmatpush1.bf16.msra.mxu1 %v8522_v59  ;;  %v3512_v59 = vld [vmem:[%s9164_s8 + $0x350] sm:$0xff] }
 0x38d   : > { %6895 = vmatprep.subr.bf16.mxu1 %v8515_v40  ;;  %v3644_v40 = vld [vmem:[%s9164_s8 + $0x770] sm:$0xff]  ;;  %v8459_v44 = vcombine.high %v3512_v59, %v3516_v36  ;;  %v8458_v50 = vcombine.low %v3512_v59, %v3516_v36 }
 0x38e   : > { %6855 = vmatpush1.bf16.msra.mxu0 %v8386_v46  ;;  %v8587_v45 = vcombine.high %v3640_v38, %v3644_v40  ;;  %v3504_v46 = vld [vmem:[%s9164_s8 + $0x310] sm:$0xff]  ;;  %v8586_v9 = vcombine.low %v3640_v38, %v3644_v40 }
 0x38f   : > { %6856 = vmatprep.subr.bf16.mxu0 %v8379_v48  ;;  %v3632_v48 = vld [vmem:[%s9164_s8 + $0x710] sm:$0xff] }
 0x390   : > { %6896 = vmatpush1.bf16.msra.mxu1 %v8514_v47  ;;  %v3508_v47 = vld [vmem:[%s9164_s8 + $0x330] sm:$0xff] }
 0x391   : > { %6897 = vmatprep.subr.bf16.mxu1 %v8507_v49  ;;  %v3636_v49 = vld [vmem:[%s9164_s8 + $0x730] sm:$0xff]  ;;  %v8451_v51 = vcombine.high %v3504_v46, %v3508_v47  ;;  %v8450_v56 = vcombine.low %v3504_v46, %v3508_v47 }
 0x392   : > { %6857 = vmatpush1.bf16.msra.mxu0 %v8378_v53  ;;  %v8579_v52 = vcombine.high %v3632_v48, %v3636_v49  ;;  %v3496_v53 = vld [vmem:[%s9164_s8 + $0x2d0] sm:$0xff]  ;;  %v8578_v57 = vcombine.low %v3632_v48, %v3636_v49 }
 0x393   : > { %6858 = vmatprep.subr.bf16.mxu0 %v8371_v55  ;;  %v3624_v55 = vld [vmem:[%s9164_s8 + $0x6d0] sm:$0xff] }
 0x394   : > { %6898 = vmatpush1.bf16.msra.mxu1 %v8506_v54  ;;  %v3500_v54 = vld [vmem:[%s9164_s8 + $0x2f0] sm:$0xff] }
 0x395   : > { %6899 = vmatprep.subr.bf16.mxu1 %v8499_v25  ;;  %v3628_v25 = vld [vmem:[%s9164_s8 + $0x6f0] sm:$0xff]  ;;  %v8443_v22 = vcombine.high %v3496_v53, %v3500_v54  ;;  %v8442_v12 = vcombine.low %v3496_v53, %v3500_v54 }
 0x396   : > { %6859 = vmatpush1.bf16.msra.mxu0 %v8370_v14  ;;  %v8571_v14 = vcombine.high %v3624_v55, %v3628_v25  ;;  %v8570_v31 = vcombine.low %v3624_v55, %v3628_v25  ;;  %v3600_v42 = vld [vmem:[%s9164_s8 + $0x610] sm:$0xff] }
 0x397   : > { %6860 = vmatprep.subr.bf16.mxu0 %v8363_v61  ;;  %v3492_v61 = vld [vmem:[%s9164_s8 + $0x2b0] sm:$0xff] }
 0x398   : > { %6900 = vmatpush1.bf16.msra.mxu1 %v8498_v27  ;;  %v3488_v27 = vld [vmem:[%s9164_s8 + $0x290] sm:$0xff] }
 0x399   : > { %6901 = vmatprep.subr.bf16.mxu1 %v8491_v30  ;;  %v3616_v30 = vld [vmem:[%s9164_s8 + $0x690] sm:$0xff]  ;;  %v8435_v62 = vcombine.high %v3488_v27, %v3492_v61  ;;  %v8434_v18 = vcombine.low %v3488_v27, %v3492_v61 }
 0x39a   : > { %6861 = vmatpush1.bf16.msra.mxu0 %v8362_v63  ;;  %v10815_v63 = vshrl.u32 %v3920_v60, 7  ;;  %v8562_v7 = vcombine.low %v3616_v30, %v3620_v19  ;;  %v3604_v24 = vld [vmem:[%s9164_s8 + $0x630] sm:$0xff] }
 0x39b   : > { %6862 = vmatprep.subr.bf16.mxu0 %v8355_v1  ;;  %v3480_v1 = vld [vmem:[%s9164_s8 + $0x250] sm:$0xff]  ;;  %v8547_v36 = vcombine.high %v3600_v42, %v3604_v24  ;;  %v8546_v46 = vcombine.low %v3600_v42, %v3604_v24 }
 0x39c   : > { %6902 = vmatpush1.bf16.msra.mxu1 %v8490_v0  ;;  %v8563_v0 = vcombine.high %v3616_v30, %v3620_v19  ;;  %v3720_v38 = vld [vmem:[%s9164_s8 + $0x9d0] sm:$0xff] }
 0x39d   : > { %6903 = vmatprep.subr.bf16.mxu1 %v8483_v2  ;;  %v3484_v2 = vld [vmem:[%s9164_s8 + $0x270] sm:$0xff] }
 0x39e   : > { %6863 = vmatpush1.bf16.msra.mxu0 %v8354_v37  ;;  %v8427_v37 = vcombine.high %v3480_v1, %v3484_v2  ;;  %v3724_v40 = vld [vmem:[%s9164_s8 + $0x9f0] sm:$0xff] }
 0x39f   : > { %6864 = vmatprep.subr.bf16.mxu0 %v8475_v11  ;;  %v8555_v11 = vcombine.high %v3608_v3, %v3612_v5  ;;  %v8667_v47 = vcombine.high %v3720_v38, %v3724_v40  ;;  %v8666_v54 = vcombine.low %v3720_v38, %v3724_v40  ;;  %v3836_v27 = vld [vmem:[%s9164_s8 + $0xd70] sm:$0xff] }
 0x3a0   : > { %6904 = vmatpush1.bf16.msra.mxu1 %v8482_v10  ;;  %v3922_v10 = vsub.s32 0, %v10815_v63 }
 0x3a1   : > { %6905 = vmatprep.subr.bf16.mxu1 %v8603_v15  ;;  %v3472_v15 = vld [vmem:[%s9164_s8 + $0x210] sm:$0xff] }
 0x3a2   : > { %6865 = vmatpush2.bf16.msra.mxu0 %v8474_v26  ;;  %v3926_v26 = vsub.s32 1, %v10815_v63  ;;  %v3923_v59 = vrot.slane %v10825_v21, %v3922_v10 }
 0x3a3   : > { %6866 = vmatprep.subr.bf16.mxu0 %v8467_v32  ;;  %v8554_v32 = vcombine.low %v3608_v3, %v3612_v5  ;;  %v3700_v3 = vld [vmem:[%s9164_s8 + $0x930] sm:$0xff] }
 0x3a4   : > { %6906 = vmatpush2.bf16.msra.mxu1 %v8602_v28  ;;  %v8426_v28 = vcombine.low %v3480_v1, %v3484_v2  ;;  %v6555_v48 = vadd.f32 %v10757_v58, %v3923_v59  ;;  %v3696_v2 = vld [vmem:[%s9164_s8 + $0x910] sm:$0xff] }
 0x3a5   : > { %6907 = vmatprep.subr.bf16.mxu1 %v8595_v34  ;;  %v8419_v34 = vcombine.high %v3472_v15, %v3476_v20  ;;  %v8643_v42 = vcombine.high %v3696_v2, %v3700_v3  ;;  %v3820_v59 = vld [vmem:[%s9164_s8 + $0xcf0] sm:$0xff] }
 0x3a6   : > { %6867 = vmatpush2.bf16.msra.mxu0 %v8466_v41  ;;  %v3848_v41 = vld [vmem:[%s9164_s8 + $0xdd0] sm:$0xff]  ;;  %v6596_v58 = vadd.f32 %v10762_v39, %v6555_v48 }
 0x3a7   : > { %6868 = vmatprep.subr.bf16.mxu0 %v8459_v44  ;;  %v3927_v44 = vrot.slane %v10825_v21, %v3926_v26 }
 0x3a8   : > { %6908 = vmatpush2.bf16.msra.mxu1 %v8594_v43  ;;  %v3852_v43 = vld [vmem:[%s9164_s8 + $0xdf0] sm:$0xff] }
 0x3a9   : > { %6909 = vmatprep.subr.bf16.mxu1 %v8587_v45  ;;  %v8418_v45 = vcombine.low %v3472_v15, %v3476_v20  ;;  %v8795_v49 = vcombine.high %v3848_v41, %v3852_v43  ;;  %v6557_v53 = vadd.f32 %v10765_v33, %v3927_v44  ;;  %v8794_v55 = vcombine.low %v3848_v41, %v3852_v43  ;;  %v3680_v43 = vld [vmem:[%s9164_s8 + $0x890] sm:$0xff] }
 0x3aa   : > { %6869 = vmatpush2.bf16.msra.mxu0 %v8458_v50  ;;  %v3712_v50 = vld [vmem:[%s9164_s8 + $0x990] sm:$0xff] }
 0x3ab   : > { %6870 = vmatprep.subr.bf16.mxu0 %v8451_v51  ;;  %v3840_v51 = vld [vmem:[%s9164_s8 + $0xd90] sm:$0xff]  ;;  %v6598_v61 = vadd.f32 %v10767_v13, %v6557_v53 }
 0x3ac   : > { %6910 = vmatpush2.bf16.msra.mxu1 %v8586_v9  ;;  %v3716_v9 = vld [vmem:[%s9164_s8 + $0x9b0] sm:$0xff] }
 0x3ad   : > { %6911 = vmatprep.subr.bf16.mxu1 %v8579_v52  ;;  %v3844_v52 = vld [vmem:[%s9164_s8 + $0xdb0] sm:$0xff]  ;;  %v8659_v25 = vcombine.high %v3712_v50, %v3716_v9  ;;  %v8658_v39 = vcombine.low %v3712_v50, %v3716_v9 }
 0x3ae   : > { %6871 = vmatpush2.bf16.msra.mxu0 %v8450_v56  ;;  %v8787_v56 = vcombine.high %v3840_v51, %v3844_v52  ;;  %v3684_v44 = vld [vmem:[%s9164_s8 + $0x8b0] sm:$0xff] }
 0x3af   : > { %6872 = vmatprep.subr.bf16.mxu0 %v8443_v22  ;;  %v3708_v22 = vld [vmem:[%s9164_s8 + $0x970] sm:$0xff] }
 0x3b0   : > { %6912 = vmatpush2.bf16.msra.mxu1 %v8578_v57  ;;  %v3704_v57 = vld [vmem:[%s9164_s8 + $0x950] sm:$0xff] }
 0x3b1   : > { %6913 = vmatprep.subr.bf16.mxu1 %v8571_v14  ;;  %v3832_v14 = vld [vmem:[%s9164_s8 + $0xd50] sm:$0xff] }
 0x3b2   : > { %6873 = vmatpush2.bf16.msra.mxu0 %v8442_v12  ;;  %v8786_v12 = vcombine.low %v3840_v51, %v3844_v52  ;;  %v8779_v13 = vcombine.high %v3832_v14, %v3836_v27  ;;  %v8778_v20 = vcombine.low %v3832_v14, %v3836_v27  ;;  %v3672_v9 = vld [vmem:[%s9164_s8 + $0x850] sm:$0xff] }
 0x3b3   : > { %6874 = vmatprep.subr.bf16.mxu0 %v8435_v62  ;;  %v3676_v51 = vld [vmem:[%s9164_s8 + $0x870] sm:$0xff] }
 0x3b4   : > { %6914 = vmatpush2.bf16.msra.mxu1 %v8570_v31  ;;  %v8651_v31 = vcombine.high %v3704_v57, %v3708_v22  ;;  %v3800_v52 = vld [vmem:[%s9164_s8 + $0xc50] sm:$0xff]  ;;  %v8618_v14 = vcombine.low %v3672_v9, %v3676_v51 }
 0x3b5   : > { %6915 = vmatprep.subr.bf16.mxu1 %v8563_v0  ;;  %v3804_v53 = vld [vmem:[%s9164_s8 + $0xc70] sm:$0xff] }
 0x3b6   : > { %6875 = vmatpush2.bf16.msra.mxu0 %v8434_v18  ;;  %v3824_v18 = vld [vmem:[%s9164_s8 + $0xd10] sm:$0xff]  ;;  %v8746_v27 = vcombine.low %v3800_v52, %v3804_v53 }
 0x3b7   : > { %6876 = vmatprep.subr.bf16.mxu0 %v8427_v37 }
 0x3b8   : > { %6916 = vmatpush2.bf16.msra.mxu1 %v8562_v7  ;;  %v3828_v7 = vld [vmem:[%s9164_s8 + $0xd30] sm:$0xff] }
 0x3b9   : > { %6917 = vmatprep.subr.bf16.mxu1 %v8555_v11  ;;  %v8650_v11 = vcombine.low %v3704_v57, %v3708_v22  ;;  %v8771_v26 = vcombine.high %v3824_v18, %v3828_v7  ;;  %v8770_v38 = vcombine.low %v3824_v18, %v3828_v7  ;;  %v3668_v57 = vld [vmem:[%s9164_s8 + $0x830] sm:$0xff] }
 0x3ba   : > { %6877 = vmatpush2.bf16.msra.mxu0 %v8426_v28  ;;  %v3688_v28 = vld [vmem:[%s9164_s8 + $0x8d0] sm:$0xff] }
 0x3bb   : > { %6878 = vmatprep.subr.bf16.mxu0 %v8419_v34  ;;  %v3816_v34 = vld [vmem:[%s9164_s8 + $0xcd0] sm:$0xff] }
 0x3bc   : > { %6918 = vmatpush2.bf16.msra.mxu1 %v8554_v32  ;;  %v3692_v32 = vld [vmem:[%s9164_s8 + $0x8f0] sm:$0xff]  ;;  %v8763_v41 = vcombine.high %v3816_v34, %v3820_v59  ;;  %v8762_v48 = vcombine.low %v3816_v34, %v3820_v59 }
 0x3bd   : > { %6919 = vmatprep.subr.bf16.mxu1 %v8547_v36  ;;  %v8642_v36 = vcombine.low %v3696_v2, %v3700_v3  ;;  %v8635_v40 = vcombine.high %v3688_v28, %v3692_v32  ;;  %v3792_v22 = vld [vmem:[%s9164_s8 + $0xc10] sm:$0xff] }
 0x3be   : > { %6879 = vmatpush2.bf16.msra.mxu0 %v8418_v45  ;;  %v3808_v45 = vld [vmem:[%s9164_s8 + $0xc90] sm:$0xff] }
 0x3bf   : > { %6930 = vmatprep.subr.bf16.mxu0 %v8667_v47  ;;  %v8634_v47 = vcombine.low %v3688_v28, %v3692_v32  ;;  %v3780_v2 = vld [vmem:[%s9164_s8 + $0xbb0] sm:$0xff] }
 0x3c0   : > { %6920 = vmatpush2.bf16.msra.mxu1 %v8546_v46  ;;  %v3812_v46 = vld [vmem:[%s9164_s8 + $0xcb0] sm:$0xff] }
 0x3c1   : > { %6971 = vmatprep.subr.bf16.mxu1 %v8795_v49  ;;  %v6636_v60 = vpop.f32.mrf.mxu0  ;;  %6881 = vmatmul.mubr.bf16.vlgmr.msra.gmra.mxu0 %v10537_v6  ;;  %v8627_v49 = vcombine.high %v3680_v43, %v3684_v44  ;;  %v8755_v50 = vcombine.high %v3808_v45, %v3812_v46  ;;  %v3904_v3 = vld [vmem:[%s9164_s8 + $0xf90] sm:$0xff] }
 0x3c2   : > { %v6637_v33 = vadd.f32 %v6636_v60, %v6596_v58  ;;  %6931 = vmatpush1.bf16.msra.mxu0 %v8666_v54  ;;  %6962 = vmatprep.mubr.bf16.mxu0 %v10545_v17  ;;  %v8626_v54 = vcombine.low %v3680_v43, %v3684_v44  ;;  %v8747_v58 = vcombine.high %v3800_v52, %v3804_v53  ;;  %v3796_v60 = vld [vmem:[%s9164_s8 + $0xc30] sm:$0xff] }
 0x3c3   : > { %v6677_v30 = vpop.f32.mrf.mxu1  ;;  %6922 = vmatmul.mubr.bf16.vlgmr.msra.gmra.mxu1 %v10541_v8  ;;  %v6638_v19 = vpop.f32.mrf.mxu0  ;;  %6932 = vmatprep.subr.bf16.mxu0 %v8659_v25  ;;  %v8619_v25 = vcombine.high %v3672_v9, %v3676_v51  ;;  %v3760_v34 = vld [vmem:[%s9164_s8 + $0xb10] sm:$0xff] }
 0x3c4   : > { %6972 = vmatpush1.bf16.msra.mxu1 %v8794_v55  ;;  %v6678_v62 = vadd.f32 %v6677_v30, %v6637_v33  ;;  %v6639_v0 = vadd.f32 %v6638_v19, %v6598_v61  ;;  %7003 = vmatprep.mubr.bf16.mxu1 %v10550_v23  ;;  %v8754_v55 = vcombine.low %v3808_v45, %v3812_v46  ;;  %v3784_v30 = vld [vmem:[%s9164_s8 + $0xbd0] sm:$0xff] }
 0x3c5   : > { %v6679_v1 = vpop.f32.mrf.mxu1  ;;  %6973 = vmatprep.subr.bf16.mxu1 %v8787_v56  ;;  %v6640_v5 = vpop.f32.mrf.mxu0  ;;  %v3664_v56 = vld [vmem:[%s9164_s8 + $0x810] sm:$0xff]  ;;  %v8739_v33 = vcombine.high %v3792_v22, %v3796_v60 }
 0x3c6   : > { %7176 = vst [vmem:[#allocation2 + $0x30] sm:$0xff] %v6678_v62  ;;  %v6680_v37 = vadd.f32 %v6679_v1, %v6639_v0  ;;  %6933 = vmatpush1.bf16.msra.mxu0 %v8658_v39  ;;  %v8611_v61 = vcombine.high %v3664_v56, %v3668_v57  ;;  %v3788_v39 = vld [vmem:[%s9164_s8 + $0xbf0] sm:$0xff]  ;;  %v8738_v62 = vcombine.low %v3792_v22, %v3796_v60 }
 0x3c7   : > { %v6681_v10 = vpop.f32.mrf.mxu1  ;;  %v6641_v15 = vpop.f32.mrf.mxu0  ;;  %6934 = vmatprep.subr.bf16.mxu0 %v8651_v31  ;;  %v3912_v19 = vld [vmem:[%s9164_s8 + $0xfd0] sm:$0xff]  ;;  %v8610_v31 = vcombine.low %v3664_v56, %v3668_v57  ;;  %v8731_v0 = vcombine.high %v3784_v30, %v3788_v39  ;;  %v8730_v18 = vcombine.low %v3784_v30, %v3788_v39 }
 0x3c8   : > { %6974 = vmatpush1.bf16.msra.mxu1 %v8786_v12  ;;  %7177 = vst [vmem:[#allocation2] sm:$0xff] %v6680_v37  ;;  %v3916_v12 = vld [vmem:[%s9164_s8 + $0xff0] sm:$0xff] }
 0x3c9   : > { %v6682_v24 = vpop.f32.mrf.mxu1  ;;  %6975 = vmatprep.subr.bf16.mxu1 %v8779_v13  ;;  %v8859_v1 = vcombine.high %v3912_v19, %v3916_v12  ;;  %v3776_v13 = vld [vmem:[%s9164_s8 + $0xb90] sm:$0xff]  ;;  %v8858_v7 = vcombine.low %v3912_v19, %v3916_v12 }
 0x3ca   : > { %6935 = vmatpush1.bf16.msra.mxu0 %v8650_v11  ;;  %v3908_v5 = vld [vmem:[%s9164_s8 + $0xfb0] sm:$0xff]  ;;  %v8723_v37 = vcombine.high %v3776_v13, %v3780_v2  ;;  %v8722_v24 = vcombine.low %v3776_v13, %v3780_v2 }
 0x3cb   : > { %6936 = vmatprep.subr.bf16.mxu0 %v8643_v42  ;;  %v8851_v10 = vcombine.high %v3904_v3, %v3908_v5  ;;  %v3768_v11 = vld [vmem:[%s9164_s8 + $0xb50] sm:$0xff] }
 0x3cc   : > { %6976 = vmatpush1.bf16.msra.mxu1 %v8778_v20  ;;  %v3772_v15 = vld [vmem:[%s9164_s8 + $0xb70] sm:$0xff] }
 0x3cd   : > { %6977 = vmatprep.subr.bf16.mxu1 %v8771_v26  ;;  %v3896_v20 = vld [vmem:[%s9164_s8 + $0xf50] sm:$0xff]  ;;  %v8850_v26 = vcombine.low %v3904_v3, %v3908_v5  ;;  %v8715_v28 = vcombine.high %v3768_v11, %v3772_v15  ;;  %v3465_v3 = vld [vmem:[%s9164_s8 + $0x1d8] sm:$0xff] }
 0x3ce   : > { %6937 = vmatpush1.bf16.msra.mxu0 %v8642_v36  ;;  %v3900_v42 = vld [vmem:[%s9164_s8 + $0xf70] sm:$0xff]  ;;  %v3469_v5 = vld [vmem:[%s9164_s8 + $0x1f8] sm:$0xff] }
 0x3cf   : > { %6938 = vmatprep.subr.bf16.mxu0 %v8635_v40  ;;  %v8843_v32 = vcombine.high %v3896_v20, %v3900_v42  ;;  %v3764_v59 = vld [vmem:[%s9164_s8 + $0xb30] sm:$0xff]  ;;  %v8714_v40 = vcombine.low %v3768_v11, %v3772_v15  ;;  %v8413_v11 = vcombine.high %v3465_v3, %v3469_v5 }
 0x3d0   : > { %6978 = vmatpush1.bf16.msra.mxu1 %v8770_v38  ;;  %v3888_v36 = vld [vmem:[%s9164_s8 + $0xf10] sm:$0xff]  ;;  %v8707_v43 = vcombine.high %v3760_v34, %v3764_v59 }
 0x3d1   : > { %6979 = vmatprep.subr.bf16.mxu1 %v8763_v41  ;;  %v3892_v38 = vld [vmem:[%s9164_s8 + $0xf30] sm:$0xff]  ;;  %v8842_v41 = vcombine.low %v3896_v20, %v3900_v42  ;;  %v3457_v20 = vld [vmem:[%s9164_s8 + $0x198] sm:$0xff] }
 0x3d2   : > { %6939 = vmatpush1.bf16.msra.mxu0 %v8634_v47  ;;  %v8835_v44 = vcombine.high %v3888_v36, %v3892_v38  ;;  %v3752_v45 = vld [vmem:[%s9164_s8 + $0xad0] sm:$0xff]  ;;  %v3461_v42 = vld [vmem:[%s9164_s8 + $0x1b8] sm:$0xff] }
 0x3d3   : > { %6940 = vmatprep.subr.bf16.mxu0 %v8627_v49  ;;  %v3756_v46 = vld [vmem:[%s9164_s8 + $0xaf0] sm:$0xff]  ;;  %v8706_v49 = vcombine.low %v3760_v34, %v3764_v59  ;;  %v8405_v34 = vcombine.high %v3457_v20, %v3461_v42 }
 0x3d4   : > { %6980 = vmatpush1.bf16.msra.mxu1 %v8762_v48  ;;  %v3880_v47 = vld [vmem:[%s9164_s8 + $0xed0] sm:$0xff]  ;;  %v8699_v9 = vcombine.high %v3752_v45, %v3756_v46 }
 0x3d5   : > { %6981 = vmatprep.subr.bf16.mxu1 %v8755_v50  ;;  %v3884_v48 = vld [vmem:[%s9164_s8 + $0xef0] sm:$0xff]  ;;  %v8834_v50 = vcombine.low %v3888_v36, %v3892_v38  ;;  %v3449_v36 = vld [vmem:[%s9164_s8 + $0x158] sm:$0xff] }
 0x3d6   : > { %6941 = vmatpush1.bf16.msra.mxu0 %v8626_v54  ;;  %v8827_v51 = vcombine.high %v3880_v47, %v3884_v48  ;;  %v3744_v52 = vld [vmem:[%s9164_s8 + $0xa90] sm:$0xff]  ;;  %v3453_v38 = vld [vmem:[%s9164_s8 + $0x178] sm:$0xff] }
 0x3d7   : > { %6942 = vmatprep.subr.bf16.mxu0 %v8619_v25  ;;  %v3748_v53 = vld [vmem:[%s9164_s8 + $0xab0] sm:$0xff]  ;;  %v8698_v25 = vcombine.low %v3752_v45, %v3756_v46  ;;  %v8404_v45 = vcombine.low %v3457_v20, %v3461_v42  ;;  %v3409_v20 = vld [vmem:[%s9164_s8 + $0x18] sm:$0xff] }
 0x3d8   : > { %6982 = vmatpush1.bf16.msra.mxu1 %v8754_v55  ;;  %v3872_v54 = vld [vmem:[%s9164_s8 + $0xe90] sm:$0xff]  ;;  %v8691_v56 = vcombine.high %v3744_v52, %v3748_v53  ;;  %v3413_v42 = vld [vmem:[%s9164_s8 + $0x38] sm:$0xff] }
 0x3d9   : > { %6983 = vmatprep.subr.bf16.mxu1 %v8747_v58  ;;  %v3876_v55 = vld [vmem:[%s9164_s8 + $0xeb0] sm:$0xff]  ;;  %v8826_v58 = vcombine.low %v3880_v47, %v3884_v48  ;;  %v8397_v48 = vcombine.high %v3449_v36, %v3453_v38 }
 0x3da   : > { %6943 = vmatpush1.bf16.msra.mxu0 %v8618_v14  ;;  %v8819_v57 = vcombine.high %v3872_v54, %v3876_v55  ;;  %v3736_v22 = vld [vmem:[%s9164_s8 + $0xa50] sm:$0xff] }
 0x3db   : > { %6944 = vmatprep.subr.bf16.mxu0 %v8611_v61  ;;  %v3740_v60 = vld [vmem:[%s9164_s8 + $0xa70] sm:$0xff]  ;;  %v8690_v61 = vcombine.low %v3744_v52, %v3748_v53  ;;  %v3569_v53 = vld [vmem:[%s9164_s8 + $0x518] sm:$0xff] }
 0x3dc   : > { %6984 = vmatpush1.bf16.msra.mxu1 %v8746_v27  ;;  %v3864_v14 = vld [vmem:[%s9164_s8 + $0xe50] sm:$0xff]  ;;  %v8683_v30 = vcombine.high %v3736_v22, %v3740_v60 }
 0x3dd   : > { %6985 = vmatprep.subr.bf16.mxu1 %v8739_v33  ;;  %v3868_v27 = vld [vmem:[%s9164_s8 + $0xe70] sm:$0xff]  ;;  %v8818_v33 = vcombine.low %v3872_v54, %v3876_v55  ;;  %v3573_v54 = vld [vmem:[%s9164_s8 + $0x538] sm:$0xff] }
 0x3de   : > { %6945 = vmatpush1.bf16.msra.mxu0 %v8610_v31  ;;  %v8811_v39 = vcombine.high %v3864_v14, %v3868_v27  ;;  %v3728_v19 = vld [vmem:[%s9164_s8 + $0xa10] sm:$0xff] }
 0x3df   : > { %6946 = vmatprep.subr.bf16.mxu0 %v8731_v0  ;;  %v3732_v12 = vld [vmem:[%s9164_s8 + $0xa30] sm:$0xff]  ;;  %v8682_v0 = vcombine.low %v3736_v22, %v3740_v60  ;;  %v3433_v60 = vld [vmem:[%s9164_s8 + $0xd8] sm:$0xff] }
 0x3e0   : > { %6986 = vmatpush1.bf16.msra.mxu1 %v8738_v62  ;;  %v3856_v31 = vld [vmem:[%s9164_s8 + $0xe10] sm:$0xff]  ;;  %v8675_v13 = vcombine.high %v3728_v19, %v3732_v12 }
 0x3e1   : > { %6987 = vmatprep.subr.bf16.mxu1 %v8859_v1  ;;  %v3860_v62 = vld [vmem:[%s9164_s8 + $0xe30] sm:$0xff]  ;;  %v8810_v1 = vcombine.low %v3864_v14, %v3868_v27  ;;  %v3437_v14 = vld [vmem:[%s9164_s8 + $0xf8] sm:$0xff] }
 0x3e2   : > { %6947 = vmatpush2.bf16.msra.mxu0 %v8730_v18  ;;  %v8803_v2 = vcombine.high %v3856_v31, %v3860_v62  ;;  %v3593_v18 = vld [vmem:[%s9164_s8 + $0x5d8] sm:$0xff] }
 0x3e3   : > { %6948 = vmatprep.subr.bf16.mxu0 %v8723_v37  ;;  %v8674_v37 = vcombine.low %v3728_v19, %v3732_v12  ;;  %v3561_v27 = vld [vmem:[%s9164_s8 + $0x4d8] sm:$0xff] }
 0x3e4   : > { %6988 = vmatpush2.bf16.msra.mxu1 %v8858_v7  ;;  %v3597_v7 = vld [vmem:[%s9164_s8 + $0x5f8] sm:$0xff] }
 0x3e5   : > { %6989 = vmatprep.subr.bf16.mxu1 %v8851_v10  ;;  %v8802_v10 = vcombine.low %v3856_v31, %v3860_v62  ;;  %v8541_v15 = vcombine.high %v3593_v18, %v3597_v7  ;;  %v3425_v19 = vld [vmem:[%s9164_s8 + $0x98] sm:$0xff] }
 0x3e6   : > { %6949 = vmatpush2.bf16.msra.mxu0 %v8722_v24  ;;  %v3585_v24 = vld [vmem:[%s9164_s8 + $0x598] sm:$0xff] }
 0x3e7   : > { %6950 = vmatprep.subr.bf16.mxu0 %v8715_v28  ;;  %v8412_v28 = vcombine.low %v3465_v3, %v3469_v5  ;;  %v3429_v12 = vld [vmem:[%s9164_s8 + $0xb8] sm:$0xff] }
 0x3e8   : > { %6990 = vmatpush2.bf16.msra.mxu1 %v8850_v26  ;;  %v3589_v26 = vld [vmem:[%s9164_s8 + $0x5b8] sm:$0xff] }
 0x3e9   : > { %6991 = vmatprep.subr.bf16.mxu1 %v8843_v32  ;;  %v8540_v32 = vcombine.low %v3593_v18, %v3597_v7  ;;  %v8533_v59 = vcombine.high %v3585_v24, %v3589_v26  ;;  %v8532_v47 = vcombine.low %v3585_v24, %v3589_v26  ;;  %v3553_v31 = vld [vmem:[%s9164_s8 + $0x498] sm:$0xff] }
 0x3ea   : > { %6951 = vmatpush2.bf16.msra.mxu0 %v8714_v40  ;;  %v3557_v62 = vld [vmem:[%s9164_s8 + $0x4b8] sm:$0xff] }
 0x3eb   : > { %6952 = vmatprep.subr.bf16.mxu0 %v8707_v43  ;;  %v3581_v43 = vld [vmem:[%s9164_s8 + $0x578] sm:$0xff] }
 0x3ec   : > { %6992 = vmatpush2.bf16.msra.mxu1 %v8842_v41  ;;  %v3577_v41 = vld [vmem:[%s9164_s8 + $0x558] sm:$0xff] }
 0x3ed   : > { %6993 = vmatprep.subr.bf16.mxu1 %v8835_v44  ;;  %v3417_v3 = vld [vmem:[%s9164_s8 + $0x58] sm:$0xff] }
 0x3ee   : > { %6953 = vmatpush2.bf16.msra.mxu0 %v8706_v49  ;;  %v3421_v5 = vld [vmem:[%s9164_s8 + $0x78] sm:$0xff] }
 0x3ef   : > { %6954 = vmatprep.subr.bf16.mxu0 %v8699_v9  ;;  %v3441_v9 = vld [vmem:[%s9164_s8 + $0x118] sm:$0xff] }
 0x3f0   : > { %6994 = vmatpush2.bf16.msra.mxu1 %v8834_v50  ;;  %v8525_v50 = vcombine.high %v3577_v41, %v3581_v43  ;;  %v3545_v18 = vld [vmem:[%s9164_s8 + $0x458] sm:$0xff] }
 0x3f1   : > { %6995 = vmatprep.subr.bf16.mxu1 %v8827_v51  ;;  %v3445_v51 = vld [vmem:[%s9164_s8 + $0x138] sm:$0xff] }
 0x3f2   : > { %6955 = vmatpush2.bf16.msra.mxu0 %v8698_v25  ;;  %v8396_v25 = vcombine.low %v3449_v36, %v3453_v38  ;;  %v3549_v7 = vld [vmem:[%s9164_s8 + $0x478] sm:$0xff] }
 0x3f3   : > { %6956 = vmatprep.subr.bf16.mxu0 %v8691_v56  ;;  %v8524_v56 = vcombine.low %v3577_v41, %v3581_v43  ;;  %v3537_v24 = vld [vmem:[%s9164_s8 + $0x418] sm:$0xff] }
 0x3f4   : > { %6996 = vmatpush2.bf16.msra.mxu1 %v8826_v58  ;;  %v3541_v26 = vld [vmem:[%s9164_s8 + $0x438] sm:$0xff] }
 0x3f5   : > { %6997 = vmatprep.subr.bf16.mxu1 %v8819_v57  ;;  %v8389_v57 = vcombine.high %v3441_v9, %v3445_v51  ;;  %v3529_v36 = vld [vmem:[%s9164_s8 + $0x3d8] sm:$0xff] }
 0x3f6   : > { %6957 = vmatpush2.bf16.msra.mxu0 %v8690_v61  ;;  %v3565_v61 = vld [vmem:[%s9164_s8 + $0x4f8] sm:$0xff] }
 0x3f7   : > { %6958 = vmatprep.subr.bf16.mxu0 %v8683_v30  ;;  %v8381_v30 = vcombine.high %v3433_v60, %v3437_v14  ;;  %v3533_v38 = vld [vmem:[%s9164_s8 + $0x3f8] sm:$0xff] }
 0x3f8   : > { %6998 = vmatpush2.bf16.msra.mxu1 %v8818_v33  ;;  %v8516_v33 = vcombine.low %v3569_v53, %v3573_v54  ;;  %v3657_v41 = vld [vmem:[%s9164_s8 + $0x7d8] sm:$0xff] }
 0x3f9   : > { %6999 = vmatprep.subr.bf16.mxu1 %v8811_v39  ;;  %v8509_v39 = vcombine.high %v3561_v27, %v3565_v61  ;;  %v3661_v43 = vld [vmem:[%s9164_s8 + $0x7f8] sm:$0xff] }
 0x3fa   : > { %6959 = vmatpush2.bf16.msra.mxu0 %v8682_v0  ;;  %v8380_v0 = vcombine.low %v3433_v60, %v3437_v14 }
 0x3fb   : > { %6960 = vmatprep.subr.bf16.mxu0 %v8675_v13  ;;  %v8373_v13 = vcombine.high %v3425_v19, %v3429_v12 }
 0x3fc   : > { %7000 = vmatpush2.bf16.msra.mxu1 %v8810_v1  ;;  %v8508_v1 = vcombine.low %v3561_v27, %v3565_v61 }
 0x3fd   : > { %7001 = vmatprep.subr.bf16.mxu1 %v8803_v2  ;;  %v8501_v2 = vcombine.high %v3553_v31, %v3557_v62 }
 0x3fe   : > { %6961 = vmatpush2.bf16.msra.mxu0 %v8674_v37  ;;  %v8372_v37 = vcombine.low %v3425_v19, %v3429_v12 }
 0x3ff   : > { %7012 = vmatprep.subr.bf16.mxu0 %v8413_v11  ;;  %v8365_v11 = vcombine.high %v3417_v3, %v3421_v5 }
 0x400   : > { %7002 = vmatpush2.bf16.msra.mxu1 %v8802_v10  ;;  %v8500_v10 = vcombine.low %v3553_v31, %v3557_v62 }
 0x401   : > { %7053 = vmatprep.subr.bf16.mxu1 %v8541_v15  ;;  %v10914_v40 = vpop.f32.mrf.mxu0  ;;  %6963 = vmatmul.mubr.bf16.vlgmr.msra.gmra.mxu0 %v10613_v29  ;;  %v8493_v15 = vcombine.high %v3545_v18, %v3549_v7 }
 0x402   : > { %7013 = vmatpush1.bf16.msra.mxu0 %v8412_v28  ;;  %7044 = vmatprep.mubr.bf16.mxu0 %v10491_v16  ;;  %v8517_v16 = vcombine.high %v3569_v53, %v3573_v54  ;;  %v8364_v28 = vcombine.low %v3417_v3, %v3421_v5  ;;  %v3653_v53 = vld [vmem:[%s9164_s8 + $0x7b8] sm:$0xff]  ;;  %v8476_v54 = vcombine.low %v3529_v36, %v3533_v38 }
 0x403   : > { %v10919_v44 = vpop.f32.mrf.mxu1  ;;  %7004 = vmatmul.mubr.bf16.vlgmr.msra.gmra.mxu1 %v10617_v35  ;;  %v10922_v46 = vpop.f32.mrf.mxu0  ;;  %7014 = vmatprep.subr.bf16.mxu0 %v8405_v34  ;;  %v8357_v34 = vcombine.high %v3409_v20, %v3413_v42 }
 0x404   : > { %7054 = vmatpush1.bf16.msra.mxu1 %v8540_v32  ;;  %7085 = vmatprep.mubr.bf16.mxu1 %v10493_v4  ;;  %v8388_v4 = vcombine.low %v3441_v9, %v3445_v51  ;;  %v8492_v32 = vcombine.low %v3545_v18, %v3549_v7  ;;  %v3521_v9 = vld [vmem:[%s9164_s8 + $0x398] sm:$0xff] }
 0x405   : > { %v10924_v49 = vpop.f32.mrf.mxu1  ;;  %7055 = vmatprep.subr.bf16.mxu1 %v8533_v59  ;;  %v6722_v52 = vpop.f32.mrf.mxu0  ;;  %v8485_v59 = vcombine.high %v3537_v24, %v3541_v26  ;;  %v3525_v51 = vld [vmem:[%s9164_s8 + $0x3b8] sm:$0xff] }
 0x406   : > { %7015 = vmatpush1.bf16.msra.mxu0 %v8404_v45  ;;  %v8356_v45 = vcombine.low %v3409_v20, %v3413_v42  ;;  %v3649_v52 = vld [vmem:[%s9164_s8 + $0x798] sm:$0xff]  ;;  %v8468_v60 = vcombine.low %v3521_v9, %v3525_v51 }
 0x407   : > { %v6763_v55 = vpop.f32.mrf.mxu1  ;;  %v6723_v58 = vpop.f32.mrf.mxu0  ;;  %7016 = vmatprep.subr.bf16.mxu0 %v8397_v48  ;;  %v8477_v48 = vcombine.high %v3529_v36, %v3533_v38  ;;  %v8596_v14 = vcombine.low %v3649_v52, %v3653_v53 }
 0x408   : > { %7056 = vmatpush1.bf16.msra.mxu1 %v8532_v47  ;;  %v8484_v47 = vcombine.low %v3537_v24, %v3541_v26  ;;  %v8604_v55 = vcombine.low %v3657_v41, %v3661_v43  ;;  %v8597_v58 = vcombine.high %v3649_v52, %v3653_v53 }
 0x409   : > { %v6764_v22 = vpop.f32.mrf.mxu1  ;;  %7057 = vmatprep.subr.bf16.mxu1 %v8525_v50  ;;  %v8605_v50 = vcombine.high %v3657_v41, %v3661_v43  ;;  %v3930_v43 = vsub.s32 2, %v10815_v63 }
 0x40a   : > { %7017 = vmatpush1.bf16.msra.mxu0 %v8396_v25  ;;  %v8469_v25 = vcombine.high %v3521_v9, %v3525_v51  ;;  %v3641_v22 = vld [vmem:[%s9164_s8 + $0x758] sm:$0xff]  ;;  %v3934_v51 = vsub.s32 3, %v10815_v63 }
 0x40b   : > { %7018 = vmatprep.subr.bf16.mxu0 %v8389_v57  ;;  %v3517_v57 = vld [vmem:[%s9164_s8 + $0x378] sm:$0xff] }
 0x40c   : > { %7058 = vmatpush1.bf16.msra.mxu1 %v8524_v56  ;;  %v3513_v56 = vld [vmem:[%s9164_s8 + $0x358] sm:$0xff] }
 0x40d   : > { %7059 = vmatprep.subr.bf16.mxu1 %v8517_v16  ;;  %v3645_v16 = vld [vmem:[%s9164_s8 + $0x778] sm:$0xff]  ;;  %v8461_v27 = vcombine.high %v3513_v56, %v3517_v57  ;;  %v8460_v19 = vcombine.low %v3513_v56, %v3517_v57 }
 0x40e   : > { %7019 = vmatpush1.bf16.msra.mxu0 %v8388_v4  ;;  %v8589_v61 = vcombine.high %v3641_v22, %v3645_v16  ;;  %v3505_v4 = vld [vmem:[%s9164_s8 + $0x318] sm:$0xff]  ;;  %v8588_v12 = vcombine.low %v3641_v22, %v3645_v16  ;;  %v3935_v16 = vrot.slane %v10825_v21, %v3934_v51 }
 0x40f   : > { %7020 = vmatprep.subr.bf16.mxu0 %v8381_v30  ;;  %v3633_v30 = vld [vmem:[%s9164_s8 + $0x718] sm:$0xff] }
 0x410   : > { %7060 = vmatpush1.bf16.msra.mxu1 %v8516_v33  ;;  %v3509_v33 = vld [vmem:[%s9164_s8 + $0x338] sm:$0xff] }
 0x411   : > { %7061 = vmatprep.subr.bf16.mxu1 %v8509_v39  ;;  %v3637_v39 = vld [vmem:[%s9164_s8 + $0x738] sm:$0xff]  ;;  %v8453_v31 = vcombine.high %v3505_v4, %v3509_v33  ;;  %v8452_v3 = vcombine.low %v3505_v4, %v3509_v33 }
 0x412   : > { %7021 = vmatpush1.bf16.msra.mxu0 %v8380_v0  ;;  %v8581_v62 = vcombine.high %v3633_v30, %v3637_v39  ;;  %v3497_v0 = vld [vmem:[%s9164_s8 + $0x2d8] sm:$0xff]  ;;  %v8580_v5 = vcombine.low %v3633_v30, %v3637_v39 }
 0x413   : > { %7022 = vmatprep.subr.bf16.mxu0 %v8373_v13  ;;  %v3625_v13 = vld [vmem:[%s9164_s8 + $0x6d8] sm:$0xff] }
 0x414   : > { %7062 = vmatpush1.bf16.msra.mxu1 %v8508_v1  ;;  %v3501_v1 = vld [vmem:[%s9164_s8 + $0x2f8] sm:$0xff] }
 0x415   : > { %7063 = vmatprep.subr.bf16.mxu1 %v8501_v2  ;;  %v3629_v2 = vld [vmem:[%s9164_s8 + $0x6f8] sm:$0xff]  ;;  %v8445_v18 = vcombine.high %v3497_v0, %v3501_v1  ;;  %v8444_v20 = vcombine.low %v3497_v0, %v3501_v1 }
 0x416   : > { %7023 = vmatpush1.bf16.msra.mxu0 %v8372_v37  ;;  %v8573_v7 = vcombine.high %v3625_v13, %v3629_v2  ;;  %v3489_v37 = vld [vmem:[%s9164_s8 + $0x298] sm:$0xff]  ;;  %v8572_v42 = vcombine.low %v3625_v13, %v3629_v2 }
 0x417   : > { %7024 = vmatprep.subr.bf16.mxu0 %v8365_v11  ;;  %v3617_v11 = vld [vmem:[%s9164_s8 + $0x698] sm:$0xff] }
 0x418   : > { %7064 = vmatpush1.bf16.msra.mxu1 %v8500_v10  ;;  %v3493_v10 = vld [vmem:[%s9164_s8 + $0x2b8] sm:$0xff] }
 0x419   : > { %7065 = vmatprep.subr.bf16.mxu1 %v8493_v15  ;;  %v3621_v15 = vld [vmem:[%s9164_s8 + $0x6b8] sm:$0xff]  ;;  %v8437_v24 = vcombine.high %v3489_v37, %v3493_v10  ;;  %v8436_v36 = vcombine.low %v3489_v37, %v3493_v10 }
 0x41a   : > { %7025 = vmatpush1.bf16.msra.mxu0 %v8364_v28  ;;  %v8565_v26 = vcombine.high %v3617_v11, %v3621_v15  ;;  %v3481_v28 = vld [vmem:[%s9164_s8 + $0x258] sm:$0xff]  ;;  %v8564_v38 = vcombine.low %v3617_v11, %v3621_v15 }
 0x41b   : > { %7026 = vmatprep.subr.bf16.mxu0 %v8357_v34  ;;  %v3609_v34 = vld [vmem:[%s9164_s8 + $0x658] sm:$0xff] }
 0x41c   : > { %7066 = vmatpush1.bf16.msra.mxu1 %v8492_v32  ;;  %v3485_v32 = vld [vmem:[%s9164_s8 + $0x278] sm:$0xff] }
 0x41d   : > { %7067 = vmatprep.subr.bf16.mxu1 %v8485_v59  ;;  %v3613_v59 = vld [vmem:[%s9164_s8 + $0x678] sm:$0xff]  ;;  %v8429_v41 = vcombine.high %v3481_v28, %v3485_v32  ;;  %v8428_v52 = vcombine.low %v3481_v28, %v3485_v32 }
 0x41e   : > { %7027 = vmatpush1.bf16.msra.mxu0 %v8356_v45  ;;  %v8557_v45 = vcombine.high %v3609_v34, %v3613_v59  ;;  %v3605_v9 = vld [vmem:[%s9164_s8 + $0x638] sm:$0xff]  ;;  %v8556_v53 = vcombine.low %v3609_v34, %v3613_v59 }
 0x41f   : > { %7028 = vmatprep.subr.bf16.mxu0 %v8477_v48  ;;  %v3477_v48 = vld [vmem:[%s9164_s8 + $0x238] sm:$0xff] }
 0x420   : > { %7068 = vmatpush1.bf16.msra.mxu1 %v8484_v47  ;;  %v3473_v47 = vld [vmem:[%s9164_s8 + $0x218] sm:$0xff] }
 0x421   : > { %7069 = vmatprep.subr.bf16.mxu1 %v8605_v50  ;;  %v3601_v50 = vld [vmem:[%s9164_s8 + $0x618] sm:$0xff] }
 0x422   : > { %7029 = vmatpush2.bf16.msra.mxu0 %v8476_v54  ;;  %v8421_v54 = vcombine.high %v3473_v47, %v3477_v48  ;;  %v3725_v56 = vld [vmem:[%s9164_s8 + $0x9f8] sm:$0xff] }
 0x423   : > { %7030 = vmatprep.subr.bf16.mxu0 %v8469_v25  ;;  %v8549_v25 = vcombine.high %v3601_v50, %v3605_v9  ;;  %v3849_v57 = vld [vmem:[%s9164_s8 + $0xdd8] sm:$0xff] }
 0x424   : > { %7070 = vmatpush2.bf16.msra.mxu1 %v8604_v55  ;;  %v3931_v55 = vrot.slane %v10825_v21, %v3930_v43  ;;  %v3853_v22 = vld [vmem:[%s9164_s8 + $0xdf8] sm:$0xff]  ;;  %v6721_v21 = vadd.f32 %v10922_v46, %v3935_v16 }
 0x425   : > { %7071 = vmatprep.subr.bf16.mxu1 %v8597_v58  ;;  %v3721_v58 = vld [vmem:[%s9164_s8 + $0x9d8] sm:$0xff]  ;;  %v8797_v4 = vcombine.high %v3849_v57, %v3853_v22 }
 0x426   : > { %7031 = vmatpush2.bf16.msra.mxu0 %v8468_v60  ;;  %v8420_v60 = vcombine.low %v3473_v47, %v3477_v48  ;;  %v3713_v33 = vld [vmem:[%s9164_s8 + $0x998] sm:$0xff] }
 0x427   : > { %7032 = vmatprep.subr.bf16.mxu0 %v8461_v27  ;;  %v8669_v27 = vcombine.high %v3721_v58, %v3725_v56  ;;  %v3717_v30 = vld [vmem:[%s9164_s8 + $0x9b8] sm:$0xff] }
 0x428   : > { %7072 = vmatpush2.bf16.msra.mxu1 %v8596_v14  ;;  %v8548_v14 = vcombine.low %v3601_v50, %v3605_v9  ;;  %v3841_v39 = vld [vmem:[%s9164_s8 + $0xd98] sm:$0xff] }
 0x429   : > { %7073 = vmatprep.subr.bf16.mxu1 %v8589_v61  ;;  %v6719_v61 = vadd.f32 %v10914_v40, %v3931_v55  ;;  %v3705_v1 = vld [vmem:[%s9164_s8 + $0x958] sm:$0xff] }
 0x42a   : > { %7033 = vmatpush2.bf16.msra.mxu0 %v8460_v19  ;;  %v3845_v19 = vld [vmem:[%s9164_s8 + $0xdb8] sm:$0xff] }
 0x42b   : > { %7034 = vmatprep.subr.bf16.mxu0 %v8453_v31  ;;  %v8796_v31 = vcombine.low %v3849_v57, %v3853_v22  ;;  %v6760_v40 = vadd.f32 %v10919_v44, %v6719_v61  ;;  %v8789_v0 = vcombine.high %v3841_v39, %v3845_v19  ;;  %v3709_v13 = vld [vmem:[%s9164_s8 + $0x978] sm:$0xff]  ;;  %v8660_v44 = vcombine.low %v3713_v33, %v3717_v30 }
 0x42c   : > { %7074 = vmatpush2.bf16.msra.mxu1 %v8588_v12  ;;  %v8668_v12 = vcombine.low %v3721_v58, %v3725_v56  ;;  %v8788_v10 = vcombine.low %v3841_v39, %v3845_v19  ;;  %v8653_v11 = vcombine.high %v3705_v1, %v3709_v13  ;;  %v3829_v28 = vld [vmem:[%s9164_s8 + $0xd38] sm:$0xff]  ;;  %v8652_v59 = vcombine.low %v3705_v1, %v3709_v13 }
 0x42d   : > { %7075 = vmatprep.subr.bf16.mxu1 %v8581_v62  ;;  %v8661_v62 = vcombine.high %v3713_v33, %v3717_v30  ;;  %v3689_v43 = vld [vmem:[%s9164_s8 + $0x8d8] sm:$0xff] }
 0x42e   : > { %7035 = vmatpush2.bf16.msra.mxu0 %v8452_v3  ;;  %v3833_v3 = vld [vmem:[%s9164_s8 + $0xd58] sm:$0xff] }
 0x42f   : > { %7036 = vmatprep.subr.bf16.mxu0 %v8445_v18  ;;  %v6762_v18 = vadd.f32 %v10924_v49, %v6721_v21  ;;  %v3817_v47 = vld [vmem:[%s9164_s8 + $0xcd8] sm:$0xff] }
 0x430   : > { %7076 = vmatpush2.bf16.msra.mxu1 %v8580_v5  ;;  %v3837_v5 = vld [vmem:[%s9164_s8 + $0xd78] sm:$0xff] }
 0x431   : > { %7077 = vmatprep.subr.bf16.mxu1 %v8573_v7  ;;  %v8781_v49 = vcombine.high %v3833_v3, %v3837_v5  ;;  %v3821_v48 = vld [vmem:[%s9164_s8 + $0xcf8] sm:$0xff] }
 0x432   : > { %7037 = vmatpush2.bf16.msra.mxu0 %v8444_v20  ;;  %v3809_v55 = vld [vmem:[%s9164_s8 + $0xc98] sm:$0xff]  ;;  %v8764_v56 = vcombine.low %v3817_v47, %v3821_v48 }
 0x433   : > { %7038 = vmatprep.subr.bf16.mxu0 %v8437_v24  ;;  %v3701_v24 = vld [vmem:[%s9164_s8 + $0x938] sm:$0xff] }
 0x434   : > { %7078 = vmatpush2.bf16.msra.mxu1 %v8572_v42  ;;  %v3697_v42 = vld [vmem:[%s9164_s8 + $0x918] sm:$0xff] }
 0x435   : > { %7079 = vmatprep.subr.bf16.mxu1 %v8565_v26  ;;  %v8644_v50 = vcombine.low %v3697_v42, %v3701_v24  ;;  %v3673_v16 = vld [vmem:[%s9164_s8 + $0x858] sm:$0xff] }
 0x436   : > { %7039 = vmatpush2.bf16.msra.mxu0 %v8436_v36  ;;  %v3665_v39 = vld [vmem:[%s9164_s8 + $0x818] sm:$0xff] }
 0x437   : > { %7040 = vmatprep.subr.bf16.mxu0 %v8429_v41  ;;  %v8645_v41 = vcombine.high %v3697_v42, %v3701_v24  ;;  %v3669_v19 = vld [vmem:[%s9164_s8 + $0x838] sm:$0xff] }
 0x438   : > { %7080 = vmatpush2.bf16.msra.mxu1 %v8564_v38  ;;  %v8780_v38 = vcombine.low %v3833_v3, %v3837_v5  ;;  %v3793_v21 = vld [vmem:[%s9164_s8 + $0xc18] sm:$0xff]  ;;  %v8612_v5 = vcombine.low %v3665_v39, %v3669_v19 }
 0x439   : > { %7081 = vmatprep.subr.bf16.mxu1 %v8557_v45  ;;  %v3693_v45 = vld [vmem:[%s9164_s8 + $0x8f8] sm:$0xff] }
 0x43a   : > { %7041 = vmatpush2.bf16.msra.mxu0 %v8428_v52  ;;  %v8637_v51 = vcombine.high %v3689_v43, %v3693_v45  ;;  %v8765_v52 = vcombine.high %v3817_v47, %v3821_v48  ;;  %v8636_v58 = vcombine.low %v3689_v43, %v3693_v45  ;;  %v3785_v1 = vld [vmem:[%s9164_s8 + $0xbd8] sm:$0xff] }
 0x43b   : > { %7042 = vmatprep.subr.bf16.mxu0 %v8421_v54  ;;  %v3685_v54 = vld [vmem:[%s9164_s8 + $0x8b8] sm:$0xff] }
 0x43c   : > { %7082 = vmatpush2.bf16.msra.mxu1 %v8556_v53  ;;  %v3681_v53 = vld [vmem:[%s9164_s8 + $0x898] sm:$0xff] }
 0x43d   : > { %7083 = vmatprep.subr.bf16.mxu1 %v8549_v25  ;;  %v3813_v25 = vld [vmem:[%s9164_s8 + $0xcb8] sm:$0xff]  ;;  %v8629_v57 = vcombine.high %v3681_v53, %v3685_v54  ;;  %v8628_v61 = vcombine.low %v3681_v53, %v3685_v54 }
 0x43e   : > { %7043 = vmatpush2.bf16.msra.mxu0 %v8420_v60  ;;  %v8757_v22 = vcombine.high %v3809_v55, %v3813_v25  ;;  %v3677_v60 = vld [vmem:[%s9164_s8 + $0x878] sm:$0xff] }
 0x43f   : > { %7094 = vmatprep.subr.bf16.mxu0 %v8669_v27  ;;  %v3805_v27 = vld [vmem:[%s9164_s8 + $0xc78] sm:$0xff]  ;;  %v8621_v33 = vcombine.high %v3673_v16, %v3677_v60 }
 0x440   : > { %7084 = vmatpush2.bf16.msra.mxu1 %v8548_v14  ;;  %v3801_v14 = vld [vmem:[%s9164_s8 + $0xc58] sm:$0xff] }
 0x441   : > { %7135 = vmatprep.subr.bf16.mxu1 %v8797_v4  ;;  %v6800_v2 = vpop.f32.mrf.mxu0  ;;  %7045 = vmatmul.mubr.bf16.vlgmr.msra.gmra.mxu0 %v10537_v6  ;;  %v8756_v4 = vcombine.low %v3809_v55, %v3813_v25  ;;  %v8749_v30 = vcombine.high %v3801_v14, %v3805_v27  ;;  %v3789_v13 = vld [vmem:[%s9164_s8 + $0xbf8] sm:$0xff] }
 0x442   : > { %v6801_v46 = vadd.f32 %v6800_v2, %v6760_v40  ;;  %7095 = vmatpush1.bf16.msra.mxu0 %v8668_v12  ;;  %7126 = vmatprep.mubr.bf16.mxu0 %v10545_v17  ;;  %v3797_v12 = vld [vmem:[%s9164_s8 + $0xc38] sm:$0xff]  ;;  %v8613_v40 = vcombine.high %v3665_v39, %v3669_v19 }
 0x443   : > { %v6841_v7 = vpop.f32.mrf.mxu1  ;;  %7086 = vmatmul.mubr.bf16.vlgmr.msra.gmra.mxu1 %v10541_v8  ;;  %v6802_v37 = vpop.f32.mrf.mxu0  ;;  %7096 = vmatprep.subr.bf16.mxu0 %v8661_v62  ;;  %v3825_v8 = vld [vmem:[%s9164_s8 + $0xd18] sm:$0xff]  ;;  %v8748_v62 = vcombine.low %v3801_v14, %v3805_v27 }
 0x444   : > { %7136 = vmatpush1.bf16.msra.mxu1 %v8796_v31  ;;  %v6842_v6 = vadd.f32 %v6841_v7, %v6801_v46  ;;  %v6803_v15 = vadd.f32 %v6802_v37, %v6762_v18  ;;  %7167 = vmatprep.mubr.bf16.mxu1 %v10550_v23  ;;  %v8773_v23 = vcombine.high %v3825_v8, %v3829_v28  ;;  %v3913_v2 = vld [vmem:[%s9164_s8 + $0xfd8] sm:$0xff] }
 0x445   : > { %v6843_v20 = vpop.f32.mrf.mxu1  ;;  %7137 = vmatprep.subr.bf16.mxu1 %v8789_v0  ;;  %v6804_v26 = vpop.f32.mrf.mxu0  ;;  %v8772_v9 = vcombine.low %v3825_v8, %v3829_v28  ;;  %v8620_v31 = vcombine.low %v3673_v16, %v3677_v60  ;;  %v8741_v0 = vcombine.high %v3793_v21, %v3797_v12  ;;  %v3917_v3 = vld [vmem:[%s9164_s8 + $0xff8] sm:$0xff]  ;;  %v8740_v18 = vcombine.low %v3793_v21, %v3797_v12 }
 0x446   : > { %7178 = vst [vmem:[#allocation2 + $0x18] sm:$0xff] %v6842_v6  ;;  %v6844_v32 = vadd.f32 %v6843_v20, %v6803_v15  ;;  %7097 = vmatpush1.bf16.msra.mxu0 %v8660_v44  ;;  %v8733_v46 = vcombine.high %v3785_v1, %v3789_v13  ;;  %v8861_v7 = vcombine.high %v3913_v2, %v3917_v3  ;;  %v3777_v44 = vld [vmem:[%s9164_s8 + $0xb98] sm:$0xff] }
 0x447   : > { %v6845_v34 = vpop.f32.mrf.mxu1  ;;  %v6805_v36 = vpop.f32.mrf.mxu0  ;;  %7098 = vmatprep.subr.bf16.mxu0 %v8653_v11  ;;  %v3781_v37 = vld [vmem:[%s9164_s8 + $0xbb8] sm:$0xff]  ;;  %v8732_v6 = vcombine.low %v3785_v1, %v3789_v13  ;;  %v8860_v15 = vcombine.low %v3913_v2, %v3917_v3 }
 0x448   : > { %7138 = vmatpush1.bf16.msra.mxu1 %v8788_v10  ;;  %7179 = vst [vmem:[#allocation2 + $0x10] sm:$0xff] %v6844_v32  ;;  %v3905_v10 = vld [vmem:[%s9164_s8 + $0xf98] sm:$0xff]  ;;  %v8725_v20 = vcombine.high %v3777_v44, %v3781_v37  ;;  %v8724_v28 = vcombine.low %v3777_v44, %v3781_v37 }
 0x449   : > { %v6846_v17 = vpop.f32.mrf.mxu1  ;;  %7139 = vmatprep.subr.bf16.mxu1 %v8781_v49  ;;  %v3909_v11 = vld [vmem:[%s9164_s8 + $0xfb8] sm:$0xff] }
 0x44a   : > { %7099 = vmatpush1.bf16.msra.mxu0 %v8652_v59  ;;  %v8853_v49 = vcombine.high %v3905_v10, %v3909_v11  ;;  %v3769_v42 = vld [vmem:[%s9164_s8 + $0xb58] sm:$0xff]  ;;  %v8852_v32 = vcombine.low %v3905_v10, %v3909_v11 }
 0x44b   : > { %7100 = vmatprep.subr.bf16.mxu0 %v8645_v41  ;;  %v3773_v24 = vld [vmem:[%s9164_s8 + $0xb78] sm:$0xff] }
 0x44c   : > { %7140 = vmatpush1.bf16.msra.mxu1 %v8780_v38  ;;  %v3897_v26 = vld [vmem:[%s9164_s8 + $0xf58] sm:$0xff]  ;;  %v8717_v34 = vcombine.high %v3769_v42, %v3773_v24 }
 0x44d   : > { %7141 = vmatprep.subr.bf16.mxu1 %v8773_v23  ;;  %v3901_v8 = vld [vmem:[%s9164_s8 + $0xf78] sm:$0xff]  ;;  %v8716_v23 = vcombine.low %v3769_v42, %v3773_v24 }
 0x44e   : > { %7101 = vmatpush1.bf16.msra.mxu0 %v8644_v50  ;;  %v8845_v59 = vcombine.high %v3897_v26, %v3901_v8  ;;  %v3761_v36 = vld [vmem:[%s9164_s8 + $0xb18] sm:$0xff]  ;;  %v8844_v43 = vcombine.low %v3897_v26, %v3901_v8 }
 0x44f   : > { %7102 = vmatprep.subr.bf16.mxu0 %v8637_v51  ;;  %v3765_v38 = vld [vmem:[%s9164_s8 + $0xb38] sm:$0xff] }
 0x450   : > { %7142 = vmatpush1.bf16.msra.mxu1 %v8772_v9  ;;  %v3889_v41 = vld [vmem:[%s9164_s8 + $0xf18] sm:$0xff]  ;;  %v8709_v45 = vcombine.high %v3761_v36, %v3765_v38 }
 0x451   : > { %7143 = vmatprep.subr.bf16.mxu1 %v8765_v52  ;;  %v3893_v17 = vld [vmem:[%s9164_s8 + $0xf38] sm:$0xff]  ;;  %v8708_v52 = vcombine.low %v3761_v36, %v3765_v38 }
 0x452   : > { %7103 = vmatpush1.bf16.msra.mxu0 %v8636_v58  ;;  %v8837_v47 = vcombine.high %v3889_v41, %v3893_v17  ;;  %v3753_v48 = vld [vmem:[%s9164_s8 + $0xad8] sm:$0xff]  ;;  %v8836_v53 = vcombine.low %v3889_v41, %v3893_v17 }
 0x453   : > { %7104 = vmatprep.subr.bf16.mxu0 %v8629_v57  ;;  %v3757_v50 = vld [vmem:[%s9164_s8 + $0xaf8] sm:$0xff] }
 0x454   : > { %7144 = vmatpush1.bf16.msra.mxu1 %v8764_v56  ;;  %v3881_v9 = vld [vmem:[%s9164_s8 + $0xed8] sm:$0xff]  ;;  %v8701_v54 = vcombine.high %v3753_v48, %v3757_v50 }
 0x455   : > { %7145 = vmatprep.subr.bf16.mxu1 %v8757_v22  ;;  %v3885_v51 = vld [vmem:[%s9164_s8 + $0xef8] sm:$0xff]  ;;  %v8700_v22 = vcombine.low %v3753_v48, %v3757_v50 }
 0x456   : > { %7105 = vmatpush1.bf16.msra.mxu0 %v8628_v61  ;;  %v8829_v55 = vcombine.high %v3881_v9, %v3885_v51  ;;  %v3745_v25 = vld [vmem:[%s9164_s8 + $0xa98] sm:$0xff]  ;;  %v8828_v16 = vcombine.low %v3881_v9, %v3885_v51 }
 0x457   : > { %7106 = vmatprep.subr.bf16.mxu0 %v8621_v33  ;;  %v3749_v58 = vld [vmem:[%s9164_s8 + $0xab8] sm:$0xff] }
 0x458   : > { %7146 = vmatpush1.bf16.msra.mxu1 %v8756_v4  ;;  %v3873_v56 = vld [vmem:[%s9164_s8 + $0xe98] sm:$0xff]  ;;  %v8693_v60 = vcombine.high %v3745_v25, %v3749_v58 }
 0x459   : > { %7147 = vmatprep.subr.bf16.mxu1 %v8749_v30  ;;  %v3877_v57 = vld [vmem:[%s9164_s8 + $0xeb8] sm:$0xff]  ;;  %v8692_v30 = vcombine.low %v3745_v25, %v3749_v58  ;;  %v3946_v25 = vsub.s32 6, %v10815_v63  ;;  %v3950_v58 = vsub.s32 7, %v10815_v63 }
 0x45a   : > { %7107 = vmatpush1.bf16.msra.mxu0 %v8620_v31  ;;  %v8821_v14 = vcombine.high %v3873_v56, %v3877_v57  ;;  %v3737_v27 = vld [vmem:[%s9164_s8 + $0xa58] sm:$0xff]  ;;  %v8820_v39 = vcombine.low %v3873_v56, %v3877_v57 }
 0x45b   : > { %7108 = vmatprep.subr.bf16.mxu0 %v8613_v40  ;;  %v3741_v61 = vld [vmem:[%s9164_s8 + $0xa78] sm:$0xff] }
 0x45c   : > { %7148 = vmatpush1.bf16.msra.mxu1 %v8748_v62  ;;  %v3865_v4 = vld [vmem:[%s9164_s8 + $0xe58] sm:$0xff]  ;;  %v8685_v19 = vcombine.high %v3737_v27, %v3741_v61 }
 0x45d   : > { %7149 = vmatprep.subr.bf16.mxu1 %v8741_v0  ;;  %v3869_v33 = vld [vmem:[%s9164_s8 + $0xe78] sm:$0xff]  ;;  %v8684_v0 = vcombine.low %v3737_v27, %v3741_v61 }
 0x45e   : > { %7109 = vmatpush1.bf16.msra.mxu0 %v8612_v5  ;;  %v8813_v21 = vcombine.high %v3865_v4, %v3869_v33  ;;  %v3729_v12 = vld [vmem:[%s9164_s8 + $0xa18] sm:$0xff]  ;;  %v8812_v1 = vcombine.low %v3865_v4, %v3869_v33 }
 0x45f   : > { %7110 = vmatprep.subr.bf16.mxu0 %v8733_v46  ;;  %v3733_v31 = vld [vmem:[%s9164_s8 + $0xa38] sm:$0xff] }
 0x460   : > { %7150 = vmatpush1.bf16.msra.mxu1 %v8740_v18  ;;  %v3857_v62 = vld [vmem:[%s9164_s8 + $0xe18] sm:$0xff]  ;;  %v8677_v13 = vcombine.high %v3729_v12, %v3733_v31  ;;  %v8676_v3 = vcombine.low %v3729_v12, %v3733_v31 }
 0x461   : > { %7151 = vmatprep.subr.bf16.mxu1 %v8861_v7  ;;  %v3861_v40 = vld [vmem:[%s9164_s8 + $0xe38] sm:$0xff] }
 0x462   : > { %7111 = vmatpush2.bf16.msra.mxu0 %v8732_v6  ;;  %v8805_v2 = vcombine.high %v3857_v62, %v3861_v40  ;;  %v8804_v5 = vcombine.low %v3857_v62, %v3861_v40 }
 0x463   : > { %7112 = vmatprep.subr.bf16.mxu0 %v8725_v20  ;;  %v3942_v20 = vsub.s32 5, %v10815_v63 }
 0x464   : > { %7152 = vmatpush2.bf16.msra.mxu1 %v8860_v15  ;;  %v3938_v15 = vsub.s32 4, %v10815_v63 }
 0x465   : > { %7153 = vmatprep.subr.bf16.mxu1 %v8853_v49  ;;  %v9034_v49 = vld [vmem:[%s9159_s28] sm:$0xff] }
 0x466   : > { %7113 = vmatpush2.bf16.msra.mxu0 %v8724_v28  ;;  %v3939_v42 = vrot.slane %v9034_v49, %v3938_v15  ;;  %v3943_v24 = vrot.slane %v9034_v49, %v3942_v20  ;;  %v3947_v56 = vrot.slane %v9034_v49, %v3946_v25  ;;  %v3951_v57 = vrot.slane %v9034_v49, %v3950_v58 }
 0x467   : > { %7114 = vmatprep.subr.bf16.mxu0 %v8717_v34 }
 0x468   : > { %7154 = vmatpush2.bf16.msra.mxu1 %v8852_v32 }
 0x469   : > { %7155 = vmatprep.subr.bf16.mxu1 %v8845_v59 }
 0x46a   : > { %7115 = vmatpush2.bf16.msra.mxu0 %v8716_v23 }
 0x46b   : > { %7116 = vmatprep.subr.bf16.mxu0 %v8709_v45 }
 0x46c   : > { %7156 = vmatpush2.bf16.msra.mxu1 %v8844_v43 }
 0x46d   : > { %7157 = vmatprep.subr.bf16.mxu1 %v8837_v47 }
 0x46e   : > { %7117 = vmatpush2.bf16.msra.mxu0 %v8708_v52 }
 0x46f   : > { %7118 = vmatprep.subr.bf16.mxu0 %v8701_v54 }
 0x470   : > { %7158 = vmatpush2.bf16.msra.mxu1 %v8836_v53 }
 0x471   : > { %7159 = vmatprep.subr.bf16.mxu1 %v8829_v55 }
 0x472   : > { %7119 = vmatpush2.bf16.msra.mxu0 %v8700_v22 }
 0x473   : > { %7120 = vmatprep.subr.bf16.mxu0 %v8693_v60 }
 0x474   : > { %7160 = vmatpush2.bf16.msra.mxu1 %v8828_v16 }
 0x475   : > { %7161 = vmatprep.subr.bf16.mxu1 %v8821_v14 }
 0x476   : > { %7121 = vmatpush2.bf16.msra.mxu0 %v8692_v30 }
 0x477   : > { %7122 = vmatprep.subr.bf16.mxu0 %v8685_v19 }
 0x478   : > { %7162 = vmatpush2.bf16.msra.mxu1 %v8820_v39 }
 0x479   : > { %7163 = vmatprep.subr.bf16.mxu1 %v8813_v21 }
 0x47a   : > { %7123 = vmatpush2.bf16.msra.mxu0 %v8684_v0 }
 0x47b   : > { %7124 = vmatprep.subr.bf16.mxu0 %v8677_v13 }
 0x47c   : > { %7164 = vmatpush2.bf16.msra.mxu1 %v8812_v1 }
 0x47d   : > { %7165 = vmatprep.subr.bf16.mxu1 %v8805_v2 }
 0x47e   : > { %7125 = vmatpush2.bf16.msra.mxu0 %v8676_v3 }
 0x480   : > { %7166 = vmatpush2.bf16.msra.mxu1 %v8804_v5 }
 0x481   : > { %v6882_v18 = vpop.f32.mrf.mxu0  ;;  %7127 = vmatmul.mubr.bf16.vlgmr.msra.gmra.mxu0 %v10613_v29 }
 0x482   : > { %v6883_v26 = vadd.f32 %v6882_v18, %v3939_v42 }
 0x483   : > { %v6923_v46 = vpop.f32.mrf.mxu1  ;;  %7168 = vmatmul.mubr.bf16.vlgmr.msra.gmra.mxu1 %v10617_v35  ;;  %v6884_v7 = vpop.f32.mrf.mxu0 }
 0x484   : > { %v6885_v8 = vadd.f32 %v6884_v7, %v3943_v24  ;;  %v6924_v28 = vadd.f32 %v6923_v46, %v6883_v26 }
 0x485   : > { %v6925_v44 = vpop.f32.mrf.mxu1  ;;  %v6886_v37 = vpop.f32.mrf.mxu0 }
 0x486   : > { %v6926_v32 = vadd.f32 %v6925_v44, %v6885_v8 }
 0x487   : > { %v6927_v10 = vpop.f32.mrf.mxu1  ;;  %v6887_v11 = vpop.f32.mrf.mxu0 }
 0x489   : > { %v6928_v6 = vpop.f32.mrf.mxu1 }
 0x4c1   : > { %v6964_v29 = vpop.f32.mrf.mxu0 }
 0x4c2   : > { %v6965_v34 = vadd.f32 %v6964_v29, %v6924_v28 }
 0x4c3   : > { %v7005_v35 = vpop.f32.mrf.mxu1  ;;  %v6966_v59 = vpop.f32.mrf.mxu0 }
 0x4c4   : > { %v7006_v36 = vadd.f32 %v7005_v35, %v6965_v34  ;;  %v6967_v38 = vadd.f32 %v6966_v59, %v6926_v32 }
 0x4c5   : > { %v7007_v41 = vpop.f32.mrf.mxu1  ;;  %v6968_v17 = vpop.f32.mrf.mxu0 }
 0x4c6   : > { %7180 = vst [vmem:[#allocation2 + $0x8] sm:$0xff] %v7006_v36  ;;  %v7008_v23 = vadd.f32 %v7007_v41, %v6967_v38 }
 0x4c7   : > { %v7009_v43 = vpop.f32.mrf.mxu1  ;;  %v6969_v45 = vpop.f32.mrf.mxu0 }
 0x4c8   : > { %7181 = vst [vmem:[#allocation2 + $0x20] sm:$0xff] %v7008_v23 }
 0x4c9   : > { %v7010_v47 = vpop.f32.mrf.mxu1 }
 0x501   : > { %v7046_v48 = vpop.f32.mrf.mxu0 }
 0x502   : > { %v7047_v22 = vadd.f32 %v7046_v48, %v3947_v56 }
 0x503   : > { %v7087_v50 = vpop.f32.mrf.mxu1  ;;  %v7048_v9 = vpop.f32.mrf.mxu0 }
 0x504   : > { %v7049_v16 = vadd.f32 %v7048_v9, %v3951_v57  ;;  %v7088_v60 = vadd.f32 %v7087_v50, %v7047_v22 }
 0x505   : > { %v7089_v51 = vpop.f32.mrf.mxu1  ;;  %v7050_v52 = vpop.f32.mrf.mxu0 }
 0x506   : > { %v7090_v27 = vadd.f32 %v7089_v51, %v7049_v16 }
 0x507   : > { %v7091_v53 = vpop.f32.mrf.mxu1  ;;  %v7051_v54 = vpop.f32.mrf.mxu0 }
 0x509   : > { %v7092_v55 = vpop.f32.mrf.mxu1 }
 0x541   : > { %v7128_v14 = vpop.f32.mrf.mxu0 }
 0x542   : > { %v7129_v61 = vadd.f32 %v7128_v14, %v7088_v60 }
 0x543   : > { %v7169_v4 = vpop.f32.mrf.mxu1  ;;  %v7130_v33 = vpop.f32.mrf.mxu0 }
 0x544   : > { %v7170_v30 = vadd.f32 %v7169_v4, %v7129_v61  ;;  %v7131_v39 = vadd.f32 %v7130_v33, %v7090_v27 }
 0x545   : > { %v7171_v19 = vpop.f32.mrf.mxu1  ;;  %v7132_v21 = vpop.f32.mrf.mxu0 }
 0x546   : > { %7182 = vst [vmem:[#allocation2 + $0x28] sm:$0xff] %v7170_v30  ;;  %v7172_v12 = vadd.f32 %v7171_v19, %v7131_v39 }
 0x547   : > { %v7173_v31 = vpop.f32.mrf.mxu1  ;;  %v7133_v62 = vpop.f32.mrf.mxu0 }
 0x548   : > { %7183 = vst [vmem:[#allocation2 + $0x38] sm:$0xff] %v7172_v12 }
 0x549   : > { %v7174_v63 = vpop.f32.mrf.mxu1 }
 0x54a PF: > { %p8862_p11 = scmp.ne.s32.totalorder %s9149_s22, 7 }
 0x54c   : > { %7187 = sbr.rel (%p8862_p11) target bundleno = 1629 (0x65d), region = 56 }
 0x551   : > { %v9035_v40 = vld [vmem:[%s11268_s3 + $0x78] sm:$0xff]   ;;  %v9039_v2 = vld [vmem:[%s11268_s3 + $0x70] sm:$0xff]   ;;  %v9043_v46 = vld [vmem:[%s11268_s3 + $0x68] sm:$0xff]   ;;  %vm7883_vm1 = vcmask 80896  }
 0x552   : > { %v9036_v0 = vld [vmem:[%s11268_s3 + $0xf8] sm:$0xff]   ;;  %8937 = vmatprep.subr.bf16.mxu0 %v9035_v40  ;;  %v9040_v3 = vld [vmem:[%s11268_s3 + $0xf0] sm:$0xff]   ;;  %v9044_v7 = vld [vmem:[%s11268_s3 + $0xe8] sm:$0xff]  }
 0x553   : > { %v9037_v1 = vld [vmem:[%s11268_s3 + $0x38] sm:$0xff]   ;;  %8959 = vmatprep.subr.bf16.mxu1 %v9036_v0  ;;  %v9041_v5 = vld [vmem:[%s11268_s3 + $0x30] sm:$0xff]   ;;  %v9045_v44 = vld [vmem:[%s11268_s3 + $0x28] sm:$0xff]  }
 0x554   : > { %v9038_v13 = vld [vmem:[%s11268_s3 + $0xb8] sm:$0xff]   ;;  %8938 = vmatpush3.bf16.msra.mxu0 %v9037_v1  ;;  %v9042_v18 = vld [vmem:[%s11268_s3 + $0xb0] sm:$0xff]   ;;  %v9046_v37 = vld [vmem:[%s11268_s3 + $0xa8] sm:$0xff]  }
 0x555   : > { %8960 = vmatpush3.bf16.msra.mxu1 %v9038_v13  ;;  %8939 = vmatprep.subr.bf16.mxu0 %v9039_v2  ;;  %v9047_v10 = vld [vmem:[%s11268_s3 + $0x60] sm:$0xff]   ;;  %v9051_v20 = vld [vmem:[%s11268_s3 + $0x58] sm:$0xff]   ;;  %v9055_v26 = vld [vmem:[%s11268_s3 + $0x50] sm:$0xff]  }
 0x556   : > { %8961 = vmatprep.subr.bf16.mxu1 %v9040_v3  ;;  %v9048_v11 = vld [vmem:[%s11268_s3 + $0xe0] sm:$0xff]   ;;  %v9052_v49 = vld [vmem:[%s11268_s3 + $0xd8] sm:$0xff]   ;;  %v9056_v8 = vld [vmem:[%s11268_s3 + $0xd0] sm:$0xff]  }
 0x557   : > { %v9049_v6 = vld [vmem:[%s11268_s3 + $0x20] sm:$0xff]   ;;  %v9053_v42 = vld [vmem:[%s11268_s3 + $0x18] sm:$0xff]   ;;  %v9057_v28 = vld [vmem:[%s11268_s3 + $0x10] sm:$0xff]  }
 0x558   : > { %8940 = vmatpush3.bf16.msra.mxu0 %v9041_v5  ;;  %v9050_v15 = vld [vmem:[%s11268_s3 + $0xa0] sm:$0xff]   ;;  %v9054_v24 = vld [vmem:[%s11268_s3 + $0x98] sm:$0xff]   ;;  %v9058_v29 = vld [vmem:[%s11268_s3 + $0x90] sm:$0xff]  }
 0x559   : > { %8962 = vmatpush3.bf16.msra.mxu1 %v9042_v18  ;;  %8941 = vmatprep.subr.bf16.mxu0 %v9043_v46  ;;  %v9059_v32 = vld [vmem:[%s11268_s3 + $0x48] sm:$0xff]   ;;  %v9063_v36 = vld [vmem:[%s11268_s3 + $0x40] sm:$0xff]   ;;  %v7191_v43 = vld [vmem:[#allocation2 + $0x10] sm:$0xff] }
 0x55a   : > { %8963 = vmatprep.subr.bf16.mxu1 %v9044_v7  ;;  %v9060_v34 = vld [vmem:[%s11268_s3 + $0xc8] sm:$0xff]   ;;  %v9064_v38 = vld [vmem:[%s11268_s3 + $0xc0] sm:$0xff]   ;;  %v7188_v45 = vld [vmem:[#allocation2 + $0x30] sm:$0xff]  ;;  %v7199_v48 = vpack.c.bf16 %v7191_v43, %v7191_v43 }
 0x55b   : > { %v9061_v35 = vld [vmem:[%s11268_s3 + $0x8] sm:$0xff]   ;;  %v9065_v41 = vld [vmem:[%s11268_s3] sm:$0xff]   ;;  %v7196_v50 = vpack.c.bf16 %v7188_v45, %v7188_v45  ;;  %v7190_v9 = vld [vmem:[#allocation2 + $0x18] sm:$0xff] }
 0x55c   : > { %8942 = vmatpush3.bf16.msra.mxu0 %v9045_v44  ;;  %v9062_v59 = vld [vmem:[%s11268_s3 + $0x88] sm:$0xff]   ;;  %v9066_v17 = vld [vmem:[%s11268_s3 + $0x80] sm:$0xff]   ;;  %v7198_v51 = vpack.c.bf16 %v7190_v9, %v7190_v9  ;;  %v9067_v52 = vld [vmem:[%s11268_s3 + $0x178] sm:$0xff]   ;;  %7795 = vmatprep.mubr.bf16.mxu1 %v7199_v48 }
 0x55d   : > { %8964 = vmatpush3.bf16.msra.mxu1 %v9046_v37  ;;  %8943 = vmatprep.subr.bf16.mxu0 %v9047_v10  ;;  %v7189_v23 = vld [vmem:[#allocation2] sm:$0xff]  ;;  %v9068_v53 = vld [vmem:[%s11268_s3 + $0x1f8] sm:$0xff]   ;;  %v9071_v25 = vld [vmem:[%s11268_s3 + $0x170] sm:$0xff]  }
 0x55e   : > { %8965 = vmatprep.subr.bf16.mxu1 %v9048_v11  ;;  %v7197_v47 = vpack.c.bf16 %v7189_v23, %v7189_v23  ;;  %v9069_v54 = vld [vmem:[%s11268_s3 + $0x138] sm:$0xff]   ;;  %v9072_v58 = vld [vmem:[%s11268_s3 + $0x1f0] sm:$0xff]   ;;  %v9075_v22 = vld [vmem:[%s11268_s3 + $0x168] sm:$0xff]  }
 0x55f   : > { %v9070_v55 = vld [vmem:[%s11268_s3 + $0x1b8] sm:$0xff]   ;;  %v9073_v56 = vld [vmem:[%s11268_s3 + $0x130] sm:$0xff]   ;;  %v9076_v16 = vld [vmem:[%s11268_s3 + $0x1e8] sm:$0xff]  }
 0x560   : > { %8944 = vmatpush3.bf16.msra.mxu0 %v9049_v6  ;;  %7755 = vmatprep.mubr.bf16.mxu0 %v7197_v47  ;;  %v9074_v57 = vld [vmem:[%s11268_s3 + $0x1b0] sm:$0xff]   ;;  %v9077_v60 = vld [vmem:[%s11268_s3 + $0x128] sm:$0xff]   ;;  %v9079_v27 = vld [vmem:[%s11268_s3 + $0x160] sm:$0xff]  }
 0x561   : > { %8966 = vmatpush3.bf16.msra.mxu1 %v9050_v15  ;;  %8945 = vmatprep.subr.bf16.mxu0 %v9051_v20  ;;  %v9078_v14 = vld [vmem:[%s11268_s3 + $0x1a8] sm:$0xff]   ;;  %v9080_v61 = vld [vmem:[%s11268_s3 + $0x1e0] sm:$0xff]   ;;  %v9083_v30 = vld [vmem:[%s11268_s3 + $0x158] sm:$0xff]  }
 0x562   : > { %8967 = vmatprep.subr.bf16.mxu1 %v9052_v49  ;;  %v9081_v4 = vld [vmem:[%s11268_s3 + $0x120] sm:$0xff]   ;;  %v9084_v39 = vld [vmem:[%s11268_s3 + $0x1d8] sm:$0xff]   ;;  %v9087_v12 = vld [vmem:[%s11268_s3 + $0x150] sm:$0xff]  }
 0x563   : > { %v9082_v33 = vld [vmem:[%s11268_s3 + $0x1a0] sm:$0xff]   ;;  %v9085_v19 = vld [vmem:[%s11268_s3 + $0x118] sm:$0xff]   ;;  %v9088_v31 = vld [vmem:[%s11268_s3 + $0x1d0] sm:$0xff]  }
 0x564   : > { %8946 = vmatpush3.bf16.msra.mxu0 %v9053_v42  ;;  %v9086_v21 = vld [vmem:[%s11268_s3 + $0x198] sm:$0xff]   ;;  %v9089_v62 = vld [vmem:[%s11268_s3 + $0x110] sm:$0xff]   ;;  %v9091_v40 = vld [vmem:[%s11268_s3 + $0x148] sm:$0xff]  }
 0x565   : > { %8968 = vmatpush3.bf16.msra.mxu1 %v9054_v24  ;;  %8947 = vmatprep.subr.bf16.mxu0 %v9055_v26  ;;  %v9090_v63 = vld [vmem:[%s11268_s3 + $0x190] sm:$0xff]   ;;  %v9092_v0 = vld [vmem:[%s11268_s3 + $0x1c8] sm:$0xff]   ;;  %v9095_v2 = vld [vmem:[%s11268_s3 + $0x140] sm:$0xff]  }
 0x566   : > { %8969 = vmatprep.subr.bf16.mxu1 %v9056_v8  ;;  %v9093_v1 = vld [vmem:[%s11268_s3 + $0x108] sm:$0xff]   ;;  %v9096_v3 = vld [vmem:[%s11268_s3 + $0x1c0] sm:$0xff]   ;;  %v7195_v7 = vld [vmem:[#allocation2 + $0x38] sm:$0xff] }
 0x567   : > { %v9094_v13 = vld [vmem:[%s11268_s3 + $0x188] sm:$0xff]   ;;  %v9097_v5 = vld [vmem:[%s11268_s3 + $0x100] sm:$0xff]   ;;  %v7203_v37 = vpack.c.bf16 %v7195_v7, %v7195_v7 }
 0x568   : > { %8948 = vmatpush3.bf16.msra.mxu0 %v9057_v28  ;;  %v9098_v18 = vld [vmem:[%s11268_s3 + $0x180] sm:$0xff]   ;;  %v7192_v10 = vld [vmem:[#allocation2 + $0x8] sm:$0xff] }
 0x569   : > { %8970 = vmatpush3.bf16.msra.mxu1 %v9058_v29  ;;  %8949 = vmatprep.subr.bf16.mxu0 %v9059_v32  ;;  %v7193_v46 = vld [vmem:[#allocation2 + $0x20] sm:$0xff]  ;;  %v7194_v11 = vld [vmem:[#allocation2 + $0x28] sm:$0xff]  ;;  %v7200_v6 = vpack.c.bf16 %v7192_v10, %v7192_v10 }
 0x56a   : > { %8971 = vmatprep.subr.bf16.mxu1 %v9060_v34  ;;  %v7201_v44 = vpack.c.bf16 %v7193_v46, %v7193_v46  ;;  %v7202_v15 = vpack.c.bf16 %v7194_v11, %v7194_v11  ;;  %v8863_v34 = vld [vmem:[%s11270_s5] ss:$0 sm:$0xff] }
 0x56c   : > { %8950 = vmatpush3.bf16.msra.mxu0 %v9061_v35 }
 0x56d   : > { %8972 = vmatpush3.bf16.msra.mxu1 %v9062_v59  ;;  %8951 = vmatprep.subr.bf16.mxu0 %v9063_v36 }
 0x56e   : > { %8973 = vmatprep.subr.bf16.mxu1 %v9064_v38 }
 0x570   : > { %8952 = vmatpush3.bf16.msra.mxu0 %v9065_v41 }
 0x571   : > { %8974 = vmatpush3.bf16.msra.mxu1 %v9066_v17  ;;  %8981 = vmatprep.subr.bf16.mxu0 %v9067_v52 }
 0x572   : > { %9003 = vmatprep.subr.bf16.mxu1 %v9068_v53 }
 0x573   : > { %7756 = vmatmul.mubr.bf16.vlgmr.msra.gmra.mxu0 %v7196_v50 }
 0x574   : > { %7796 = vmatmul.mubr.bf16.vlgmr.msra.gmra.mxu1 %v7198_v51  ;;  %8982 = vmatpush3.bf16.msra.mxu0 %v9069_v54 }
 0x575   : > { %9004 = vmatpush3.bf16.msra.mxu1 %v9070_v55  ;;  %8983 = vmatprep.subr.bf16.mxu0 %v9071_v25 }
 0x576   : > { %9005 = vmatprep.subr.bf16.mxu1 %v9072_v58  ;;  %7835 = vmatprep.mubr.bf16.mxu0 %v7201_v44 }
 0x577   : > { %7875 = vmatprep.mubr.bf16.mxu1 %v7203_v37 }
 0x578   : > { %8984 = vmatpush3.bf16.msra.mxu0 %v9073_v56 }
 0x579   : > { %9006 = vmatpush3.bf16.msra.mxu1 %v9074_v57  ;;  %8985 = vmatprep.subr.bf16.mxu0 %v9075_v22 }
 0x57a   : > { %9007 = vmatprep.subr.bf16.mxu1 %v9076_v16 }
 0x57c   : > { %8986 = vmatpush3.bf16.msra.mxu0 %v9077_v60 }
 0x57d   : > { %9008 = vmatpush3.bf16.msra.mxu1 %v9078_v14  ;;  %8987 = vmatprep.subr.bf16.mxu0 %v9079_v27 }
 0x57e   : > { %9009 = vmatprep.subr.bf16.mxu1 %v9080_v61 }
 0x580   : > { %8988 = vmatpush3.bf16.msra.mxu0 %v9081_v4 }
 0x581   : > { %9010 = vmatpush3.bf16.msra.mxu1 %v9082_v33  ;;  %8989 = vmatprep.subr.bf16.mxu0 %v9083_v30 }
 0x582   : > { %9011 = vmatprep.subr.bf16.mxu1 %v9084_v39 }
 0x584   : > { %8990 = vmatpush3.bf16.msra.mxu0 %v9085_v19 }
 0x585   : > { %9012 = vmatpush3.bf16.msra.mxu1 %v9086_v21  ;;  %8991 = vmatprep.subr.bf16.mxu0 %v9087_v12 }
 0x586   : > { %9013 = vmatprep.subr.bf16.mxu1 %v9088_v31 }
 0x588   : > { %8992 = vmatpush3.bf16.msra.mxu0 %v9089_v62 }
 0x589   : > { %9014 = vmatpush3.bf16.msra.mxu1 %v9090_v63  ;;  %8993 = vmatprep.subr.bf16.mxu0 %v9091_v40 }
 0x58a   : > { %9015 = vmatprep.subr.bf16.mxu1 %v9092_v0 }
 0x58c   : > { %8994 = vmatpush3.bf16.msra.mxu0 %v9093_v1 }
 0x58d   : > { %9016 = vmatpush3.bf16.msra.mxu1 %v9094_v13  ;;  %8995 = vmatprep.subr.bf16.mxu0 %v9095_v2 }
 0x58e   : > { %9017 = vmatprep.subr.bf16.mxu1 %v9096_v3 }
 0x590   : > { %8996 = vmatpush3.bf16.msra.mxu0 %v9097_v5 }
 0x591   : > { %9018 = vmatpush3.bf16.msra.mxu1 %v9098_v18 }
 0x593   : > { %7836 = vmatmul.mubr.bf16.vlgmr.msra.gmra.mxu0 %v7200_v6 }
 0x594   : > { %7876 = vmatmul.mubr.bf16.vlgmr.msra.gmra.mxu1 %v7202_v15 }
 0x633   : > { %v8953_v20 = vpop.f32.mrf.mxu0 }
 0x634   : > { %v8975_v49 = vpop.f32.mrf.mxu1 }
 0x635   : > { %v8954_v42 = vpop.f32.mrf.mxu0 }
 0x636   : > { %v8976_v24 = vpop.f32.mrf.mxu1  ;;  %v8955_v32 = vadd.f32 %v8954_v42, %v8953_v20 }
 0x637   : > { %v8956_v26 = vpop.f32.mrf.mxu0  ;;  %v8977_v59 = vadd.f32 %v8976_v24, %v8975_v49 }
 0x638   : > { %v8978_v8 = vpop.f32.mrf.mxu1  ;;  %v7758_v35 = vadd.f32 %v8955_v32, %v8863_v34 }
 0x639   : > { %v8957_v28 = vpop.f32.mrf.mxu0 }
 0x63a   : > { %v8979_v29 = vpop.f32.mrf.mxu1  ;;  %v7798_v17 = vadd.f32 %v8977_v59, %v7758_v35 }
 0x653   : > { %v8997_v36 = vpop.f32.mrf.mxu0 }
 0x654   : > { %v9019_v38 = vpop.f32.mrf.mxu1 }
 0x655   : > { %v8998_v41 = vpop.f32.mrf.mxu0 }
 0x656   : > { %v8999_v23 = vadd.f32 %v8998_v41, %v8997_v36  ;;  %v9020_v43 = vpop.f32.mrf.mxu1 }
 0x657   : > { %v9000_v45 = vpop.f32.mrf.mxu0  ;;  %v9021_v48 = vadd.f32 %v9020_v43, %v9019_v38 }
 0x658   : > { %v7838_v47 = vadd.f32 %v8999_v23, %v7798_v17  ;;  %v9022_v50 = vpop.f32.mrf.mxu1 }
 0x659   : > { %v9001_v9 = vpop.f32.mrf.mxu0 }
 0x65a   : > { %v7878_v51 = vadd.f32 %v9021_v48, %v7838_v47  ;;  %v9023_v52 = vpop.f32.mrf.mxu1 }
 0x65c   : > { %7884 = vst.msk [vmem:[%s11271_s6] sm:$0xff] %vm7883_vm1, %v7878_v51 }
 0x65d PF: > { %s16_s21 = sadd.s32 1, %s9105_s21  }
 0x65e   : > { %p13_p12 = scmp.ge.s32.totalorder %s16_s21, 10  }
 0x660   :  { %15 = sbr.rel (!%p13_p12) target bundleno = 1 (0x1), region = 85 }

</bundles_post_ra>
